<compile_context>
chip_gen: v7x
topology: tpu7x:2x2x1
jax: 0.10.0
libtpu: 0.0.40
codegen_flags: <defaults>
</compile_context>

<pallas_src>
import functools

import jax
import jax.numpy as jnp
from jax import lax
from jax.experimental import pallas as pl
from jax.experimental.pallas import tpu as pltpu

# ---------------- small, TPU-tile-friendly config ----------------
B = 2            # batch
S = 8            # seq len
D = 256          # model dim
N_HEAD = 4       # query heads
N_KV_HEAD = 2    # kv (local) heads -> GQA group = 2
HEAD_DIM = 128   # lane-aligned head dim
NUM_EXPERTS = 8
TOP_K = 2
MOE_INTER = 128  # moe_intermediate_size
EPS = 1e-6
QKV_OUT = (N_HEAD + 2 * N_KV_HEAD) * HEAD_DIM   # 1024


# ===================== single fused TransformerBlock kernel =====================
def _block_kernel(x_ref, anw_ref, wqkv_ref, wo_ref, qn_ref, kn_ref,
                  cos_ref, sin_ref, mask_ref, fnw_ref, gate_ref,
                  w13_ref, w2_ref, o_ref):
    Tm = x_ref.shape[0]
    group = N_HEAD // N_KV_HEAD
    scale = HEAD_DIM ** -0.5

    # ---------------- attention_norm ----------------
    x = x_ref[...]                                                      # [T, D] f32
    xn = x * lax.rsqrt(jnp.mean(x * x, axis=-1, keepdims=True) + EPS) * anw_ref[...]
    xn_bf = xn.astype(jnp.bfloat16)

    # ---------------- fused QKV projection (one K=256, N=1024 GEMM) ----------------
    qkv = jnp.dot(xn_bf, wqkv_ref[...], preferred_element_type=jnp.float32)  # [T, 1024]
    q = qkv[:, :N_HEAD * HEAD_DIM]                                           # [T, 512]
    k = qkv[:, N_HEAD * HEAD_DIM:(N_HEAD + N_KV_HEAD) * HEAD_DIM]            # [T, 256]
    v = qkv[:, (N_HEAD + N_KV_HEAD) * HEAD_DIM:]                             # [T, 256]

    cos = cos_ref[...]          # [T, hd]  rotate_half layout
    sin = sin_ref[...]          # [T, hd]  sign-folded (-sin | +sin)

    def norm_rope(u, w):
        # per-head RMSNorm then rotate_half RoPE: one roll + 2 FMAs
        u = u * lax.rsqrt(jnp.mean(u * u, axis=-1, keepdims=True) + EPS) * w
        return u * cos + pltpu.roll(u, HEAD_DIM // 2, 1) * sin

    # block-diagonal additive causal mask, stacked for the GQA group on the M axis
    mask_g = jnp.concatenate([mask_ref[...]] * group, axis=0)          # [group*T, T]

    # ---------------- GQA-stacked attention ----------------
    y_heads = [None] * N_HEAD
    for kh in range(N_KV_HEAD):
        kk = norm_rope(k[:, kh * HEAD_DIM:(kh + 1) * HEAD_DIM],
                       kn_ref[...]).astype(jnp.bfloat16)               # [T, hd]
        vv = v[:, kh * HEAD_DIM:(kh + 1) * HEAD_DIM].astype(jnp.bfloat16)
        # stack the `group` query heads that share this kv head along the M axis
        qg = jnp.concatenate(
            [norm_rope(q[:, h * HEAD_DIM:(h + 1) * HEAD_DIM], qn_ref[...])
             for h in range(kh * group, (kh + 1) * group)],
            axis=0).astype(jnp.bfloat16)                               # [group*T, hd]
        s = lax.dot_general(qg, kk, (((1,), (1,)), ((), ())),
                            preferred_element_type=jnp.float32) * scale + mask_g
        s = s - jnp.max(s, axis=-1, keepdims=True)
        p = jnp.exp(s)
        p = p / jnp.sum(p, axis=-1, keepdims=True)                     # exact divide (parity)
        yg = jnp.dot(p.astype(jnp.bfloat16), vv,
                     preferred_element_type=jnp.float32)               # [group*T, hd]
        for g in range(group):
            y_heads[kh * group + g] = yg[g * Tm:(g + 1) * Tm, :]

    # lane-concat head outputs (pure vreg placement) -> single K=512 o_proj GEMM
    y_all = jnp.concatenate(y_heads, axis=1).astype(jnp.bfloat16)      # [T, NH*hd]
    h = x + jnp.dot(y_all, wo_ref[...], preferred_element_type=jnp.float32)  # [T, D]

    # ---------------- ffn_norm + gate + top-k routing ----------------
    hn = h * lax.rsqrt(jnp.mean(h * h, axis=-1, keepdims=True) + EPS) * fnw_ref[...]
    hn_bf = hn.astype(jnp.bfloat16)

    scores = jnp.dot(hn, gate_ref[...], preferred_element_type=jnp.float32)  # [T, E] f32
    scores = scores - jnp.max(scores, axis=-1, keepdims=True)
    ps = jnp.exp(scores)
    probs = ps / jnp.sum(ps, axis=-1, keepdims=True)

    # manual top-k (k=2), first-index tie-break, renormalize (matches torch.topk + /= sum)
    e_iota = lax.broadcasted_iota(jnp.int32, probs.shape, 1)
    remaining = probs
    selected = None
    for _ in range(TOP_K):
        m = jnp.max(remaining, axis=-1, keepdims=True)
        idx = jnp.min(jnp.where(remaining == m, e_iota, NUM_EXPERTS),
                      axis=-1, keepdims=True)
        pick = e_iota == idx
        selected = pick if selected is None else jnp.logical_or(selected, pick)
        remaining = jnp.where(pick, -jnp.inf, remaining)
    topw = jnp.where(selected, probs, 0.0)
    dw = topw / jnp.sum(topw, axis=-1, keepdims=True)                  # [T, E]

    # ---------------- dense-over-experts SwiGLU (unrolled, VMEM-resident weights) ----------------
    acc = h                                                            # residual (f32)
    for e in range(NUM_EXPERTS):
        x13 = jnp.dot(hn_bf, w13_ref[e], preferred_element_type=jnp.float32)   # [T, 2I]
        x1 = x13[:, :MOE_INTER]
        x3 = x13[:, MOE_INTER:]
        hid = (x1 * jax.nn.sigmoid(x1)) * x3 * dw[:, e:e + 1]          # SiLU(x1)*x3*route (f32)
        acc = acc + jnp.dot(hid.astype(jnp.bfloat16), w2_ref[e],
                            preferred_element_type=jnp.float32)        # [T, D]
    o_ref[...] = acc


# ============================ one-time parameter preparation ============================
def _rotate_half_perm():
    half = HEAD_DIM // 2
    return jnp.concatenate([jnp.arange(half) * 2, jnp.arange(half) * 2 + 1])


def _permute_head_cols(w, n_heads, perm):
    din = w.shape[0]
    return w.reshape(din, n_heads, HEAD_DIM)[:, :, perm].reshape(din, n_heads * HEAD_DIM)


def prepare_params(params):
    """Hoisted weight relayout: rotate_half column permute, bf16 casts, QKV fuse,
    w1||w3 concat + transpose, w2 transpose, gate transpose. Call ONCE."""
    perm = _rotate_half_perm()
    wq = _permute_head_cols(params["wq"], N_HEAD, perm)
    wk = _permute_head_cols(params["wk"], N_KV_HEAD, perm)
    wqkv = jnp.concatenate([wq, wk, params["wv"]], axis=1).astype(jnp.bfloat16)  # [D, 1024]
    w13 = jnp.transpose(jnp.concatenate([params["w1"], params["w3"]], axis=1),
                        (0, 2, 1)).astype(jnp.bfloat16)                          # [E, D, 2I]
    w2 = jnp.transpose(params["w2"], (0, 2, 1)).astype(jnp.bfloat16)             # [E, I, D]
    return {
        "attention_norm": params["attention_norm"].reshape(1, D),
        "ffn_norm": params["ffn_norm"].reshape(1, D),
        "wqkv": wqkv,
        "wo": params["wo"].astype(jnp.bfloat16),                                 # [NH*hd, D]
        "qn": params["q_norm"][perm].reshape(1, HEAD_DIM),
        "kn": params["k_norm"][perm].reshape(1, HEAD_DIM),
        "gate_t": params["gate"].T,                                              # [D, E] f32
        "w13": w13,
        "w2": w2,
    }


# ============================ host-side forward wrapper ============================
def transformer_block_forward(prep, x, input_pos, freqs_cis, mask):
    del input_pos  # kv_cache is None in the reference module -> unused
    Bm, Sm, Dm = x.shape
    Tm = Bm * Sm

    # rotate_half RoPE tables (runtime freqs_cis -> [T, hd], trace-time, tiny)
    cos_p = freqs_cis[..., 0]                                           # [S, hd/2]
    sin_p = freqs_cis[..., 1]
    cos_rh = jnp.tile(jnp.concatenate([cos_p, cos_p], axis=-1), (Bm, 1))   # [T, hd]
    sin_rh = jnp.tile(jnp.concatenate([-sin_p, sin_p], axis=-1), (Bm, 1))  # sign-folded

    # block-diagonal additive causal mask over the folded (batch*seq) token axis (1 KB at T=16)
    same_b = jnp.arange(Bm)[:, None] == jnp.arange(Bm)[None, :]
    mask_bd = jnp.where(same_b[:, None, :, None], mask[None, :, None, :],
                        -1e30).reshape(Tm, Tm).astype(jnp.float32)

    call = pl.pallas_call(
        _block_kernel,
        out_shape=jax.ShapeDtypeStruct((Tm, Dm), jnp.float32),
        grid_spec=pltpu.PrefetchScalarGridSpec(
            num_scalar_prefetch=0,
            grid=(1,),
            in_specs=[
                pl.BlockSpec((Tm, Dm), lambda i: (0, 0)),                    # x
                pl.BlockSpec((1, Dm), lambda i: (0, 0)),                     # attention_norm w
                pl.BlockSpec((Dm, QKV_OUT), lambda i: (0, 0)),               # wqkv (bf16)
                pl.BlockSpec((N_HEAD * HEAD_DIM, Dm), lambda i: (0, 0)),     # wo (bf16)
                pl.BlockSpec((1, HEAD_DIM), lambda i: (0, 0)),               # q_norm
                pl.BlockSpec((1, HEAD_DIM), lambda i: (0, 0)),               # k_norm
                pl.BlockSpec((Tm, HEAD_DIM), lambda i: (0, 0)),              # cos
                pl.BlockSpec((Tm, HEAD_DIM), lambda i: (0, 0)),              # sin
                pl.BlockSpec((Tm, Tm), lambda i: (0, 0)),                    # mask
                pl.BlockSpec((1, Dm), lambda i: (0, 0)),                     # ffn_norm w
                pl.BlockSpec((Dm, NUM_EXPERTS), lambda i: (0, 0)),           # gate^T
                pl.BlockSpec((NUM_EXPERTS, Dm, 2 * MOE_INTER),
                             lambda i: (0, 0, 0)),                           # w13 [E, D, 2I]
                pl.BlockSpec((NUM_EXPERTS, MOE_INTER, Dm),
                             lambda i: (0, 0, 0)),                           # w2  [E, I, D]
            ],
            out_specs=pl.BlockSpec((Tm, Dm), lambda i: (0, 0)),
        ),
        compiler_params=pltpu.CompilerParams(dimension_semantics=("arbitrary",)),
    )
    out2d = call(x.reshape(Tm, Dm).astype(jnp.float32),
                 prep["attention_norm"], prep["wqkv"], prep["wo"],
                 prep["qn"], prep["kn"], cos_rh, sin_rh, mask_bd,
                 prep["ffn_norm"], prep["gate_t"], prep["w13"], prep["w2"])
    return out2d.reshape(Bm, Sm, Dm)


# ============================ deterministic setup ============================
def init_params(key):
    ks = jax.random.split(key, 8)
    scale = 0.02
    return {
        "attention_norm": jnp.ones((D,), jnp.float32),
        "ffn_norm": jnp.ones((D,), jnp.float32),
        "q_norm": jnp.ones((HEAD_DIM,), jnp.float32),
        "k_norm": jnp.ones((HEAD_DIM,), jnp.float32),
        "wq": jax.random.normal(ks[0], (D, N_HEAD * HEAD_DIM), jnp.float32) * scale,
        "wk": jax.random.normal(ks[1], (D, N_KV_HEAD * HEAD_DIM), jnp.float32) * scale,
        "wv": jax.random.normal(ks[2], (D, N_KV_HEAD * HEAD_DIM), jnp.float32) * scale,
        "wo": jax.random.normal(ks[3], (N_HEAD * HEAD_DIM, D), jnp.float32) * scale,
        "gate": jax.random.normal(ks[4], (NUM_EXPERTS, D), jnp.float32) * scale,
        "w1": jax.random.normal(ks[5], (NUM_EXPERTS, MOE_INTER, D), jnp.float32) * scale,
        "w2": jax.random.normal(ks[6], (NUM_EXPERTS, D, MOE_INTER), jnp.float32) * scale,
        "w3": jax.random.normal(ks[7], (NUM_EXPERTS, MOE_INTER, D), jnp.float32) * scale,
    }


def make_freqs_cis(seq_len, head_dim, base=1000000.0):
    half = head_dim // 2
    freqs = 1.0 / (base ** (jnp.arange(0, half, dtype=jnp.float32) / half))
    ang = jnp.outer(jnp.arange(seq_len, dtype=jnp.float32), freqs)
    return jnp.stack([jnp.cos(ang), jnp.sin(ang)], axis=-1)   # [S, head_dim//2, 2]


if __name__ == "__main__":
    key = jax.random.PRNGKey(0)
    kx, kp = jax.random.split(key)
    params = init_params(kp)
    prep = jax.tree_util.tree_map(jax.block_until_ready, prepare_params(params))  # one-time prep

    x = jax.random.normal(kx, (B, S, D), jnp.float32)
    freqs_cis = make_freqs_cis(S, HEAD_DIM)
    # additive float causal mask (0 allowed / -1e30 disallowed)
    mask = jnp.where(jnp.tril(jnp.ones((S, S), dtype=bool)), 0.0, -1e30).astype(jnp.float32)
    input_pos = jnp.arange(S, dtype=jnp.int32)

    fwd = jax.jit(functools.partial(transformer_block_forward, prep))
    out = fwd(x, input_pos, freqs_cis, mask)
    jax.block_until_ready(out)
    assert out.shape == (B, S, D) and out.dtype == jnp.float32
    print("KERNEL_OK")
</pallas_src>

<mosaic_0001>
module attributes {stable_mosaic.version = 11 : i64} {
  func.func @_block_kernel(%arg0: i32, %arg1: memref<16x256xf32, #tpu.memory_space<vmem>>, %arg2: memref<1x256xf32, #tpu.memory_space<vmem>>, %arg3: memref<256x1024xbf16, #tpu.memory_space<vmem>>, %arg4: memref<512x256xbf16, #tpu.memory_space<vmem>>, %arg5: memref<1x128xf32, #tpu.memory_space<vmem>>, %arg6: memref<1x128xf32, #tpu.memory_space<vmem>>, %arg7: memref<16x128xf32, #tpu.memory_space<vmem>>, %arg8: memref<16x128xf32, #tpu.memory_space<vmem>>, %arg9: memref<16x16xf32, #tpu.memory_space<vmem>>, %arg10: memref<1x256xf32, #tpu.memory_space<vmem>>, %arg11: memref<256x8xf32, #tpu.memory_space<vmem>>, %arg12: memref<8x256x256xbf16, #tpu.memory_space<vmem>>, %arg13: memref<8x128x256xbf16, #tpu.memory_space<vmem>>, %arg14: memref<16x256xf32, #tpu.memory_space<vmem>>) attributes {dimension_semantics = [#tpu.dimension_semantics<arbitrary>], iteration_bounds = array<i64: 1>, scalar_prefetch = 0 : i64, scratch_operands = 0 : i64, tpu.core_type = #tpu.core_type<tc>, window_params = [{pipeline_mode = #tpu.pipeline_mode<synchronous>, transform_indices = @transform_0, window_bounds = array<i64: 16, 256>}, {pipeline_mode = #tpu.pipeline_mode<synchronous>, transform_indices = @transform_1, window_bounds = array<i64: 1, 256>}, {pipeline_mode = #tpu.pipeline_mode<synchronous>, transform_indices = @transform_2, window_bounds = array<i64: 256, 1024>}, {pipeline_mode = #tpu.pipeline_mode<synchronous>, transform_indices = @transform_3, window_bounds = array<i64: 512, 256>}, {pipeline_mode = #tpu.pipeline_mode<synchronous>, transform_indices = @transform_4, window_bounds = array<i64: 1, 128>}, {pipeline_mode = #tpu.pipeline_mode<synchronous>, transform_indices = @transform_5, window_bounds = array<i64: 1, 128>}, {pipeline_mode = #tpu.pipeline_mode<synchronous>, transform_indices = @transform_6, window_bounds = array<i64: 16, 128>}, {pipeline_mode = #tpu.pipeline_mode<synchronous>, transform_indices = @transform_7, window_bounds = array<i64: 16, 128>}, {pipeline_mode = #tpu.pipeline_mode<synchronous>, transform_indices = @transform_8, window_bounds = array<i64: 16, 16>}, {pipeline_mode = #tpu.pipeline_mode<synchronous>, transform_indices = @transform_9, window_bounds = array<i64: 1, 256>}, {pipeline_mode = #tpu.pipeline_mode<synchronous>, transform_indices = @transform_10, window_bounds = array<i64: 256, 8>}, {pipeline_mode = #tpu.pipeline_mode<synchronous>, transform_indices = @transform_11, window_bounds = array<i64: 8, 256, 256>}, {pipeline_mode = #tpu.pipeline_mode<synchronous>, transform_indices = @transform_12, window_bounds = array<i64: 8, 128, 256>}, {pipeline_mode = #tpu.pipeline_mode<synchronous>, transform_indices = @transform_13, window_bounds = array<i64: 16, 256>}]} {
    %c0 = arith.constant 0 : index
    %c0_0 = arith.constant 0 : index
    %0 = vector.load %arg1[%c0, %c0_0] : memref<16x256xf32, #tpu.memory_space<vmem>>, vector<16x256xf32>
    %1 = arith.mulf %0, %0 : vector<16x256xf32>
    %cst = arith.constant dense<0.000000e+00> : vector<16xf32>
    %2 = vector.multi_reduction <add>, %1, %cst [1] : vector<16x256xf32> to vector<16xf32>
    %3 = vector.shape_cast %2 : vector<16xf32> to vector<16x1xf32>
    %cst_1 = arith.constant 2.560000e+02 : f32
    %4 = vector.broadcast %cst_1 : f32 to vector<16x1xf32>
    %5 = arith.divf %3, %4 : vector<16x1xf32>
    %cst_2 = arith.constant 9.99999997E-7 : f32
    %6 = vector.broadcast %cst_2 : f32 to vector<16x1xf32>
    %7 = arith.addf %5, %6 : vector<16x1xf32>
    %8 = math.rsqrt %7 : vector<16x1xf32>
    %9 = vector.broadcast %8 : vector<16x1xf32> to vector<16x256xf32>
    %10 = arith.mulf %0, %9 : vector<16x256xf32>
    %c0_3 = arith.constant 0 : index
    %c0_4 = arith.constant 0 : index
    %11 = vector.load %arg2[%c0_3, %c0_4] : memref<1x256xf32, #tpu.memory_space<vmem>>, vector<1x256xf32>
    %12 = vector.broadcast %11 : vector<1x256xf32> to vector<16x256xf32>
    %13 = arith.mulf %10, %12 : vector<16x256xf32>
    %14 = arith.truncf %13 : vector<16x256xf32> to vector<16x256xbf16>
    %c0_5 = arith.constant 0 : index
    %c0_6 = arith.constant 0 : index
    %15 = vector.load %arg3[%c0_5, %c0_6] : memref<256x1024xbf16, #tpu.memory_space<vmem>>, vector<256x1024xbf16>
    %cst_7 = arith.constant dense<0.000000e+00> : vector<16x1024xf32>
    %16 = tpu.matmul %14, %15, %cst_7 {dimension_numbers = #tpu.dot_dimension_numbers<[1], [0], [0], [1], [0, 0, 1, 1], [], []>} : vector<16x256xbf16>, vector<256x1024xbf16>, vector<16x1024xf32> -> vector<16x1024xf32>
    %17 = vector.extract_strided_slice %16 {offsets = [0, 0], sizes = [16, 512], strides = [1, 1]} : vector<16x1024xf32> to vector<16x512xf32>
    %18 = vector.extract_strided_slice %16 {offsets = [0, 512], sizes = [16, 256], strides = [1, 1]} : vector<16x1024xf32> to vector<16x256xf32>
    %19 = vector.extract_strided_slice %16 {offsets = [0, 768], sizes = [16, 256], strides = [1, 1]} : vector<16x1024xf32> to vector<16x256xf32>
    %c0_8 = arith.constant 0 : index
    %c0_9 = arith.constant 0 : index
    %20 = vector.load %arg7[%c0_8, %c0_9] : memref<16x128xf32, #tpu.memory_space<vmem>>, vector<16x128xf32>
    %c0_10 = arith.constant 0 : index
    %c0_11 = arith.constant 0 : index
    %21 = vector.load %arg8[%c0_10, %c0_11] : memref<16x128xf32, #tpu.memory_space<vmem>>, vector<16x128xf32>
    %c0_12 = arith.constant 0 : index
    %c0_13 = arith.constant 0 : index
    %22 = vector.load %arg9[%c0_12, %c0_13] : memref<16x16xf32, #tpu.memory_space<vmem>>, vector<16x16xf32>
    %23 = tpu.concatenate %22, %22 in 0 : vector<16x16xf32>, vector<16x16xf32> -> vector<32x16xf32>
    %24 = vector.extract_strided_slice %18 {offsets = [0, 0], sizes = [16, 128], strides = [1, 1]} : vector<16x256xf32> to vector<16x128xf32>
    %c0_14 = arith.constant 0 : index
    %c0_15 = arith.constant 0 : index
    %25 = vector.load %arg6[%c0_14, %c0_15] : memref<1x128xf32, #tpu.memory_space<vmem>>, vector<1x128xf32>
    %26 = arith.mulf %24, %24 : vector<16x128xf32>
    %cst_16 = arith.constant dense<0.000000e+00> : vector<16xf32>
    %27 = vector.multi_reduction <add>, %26, %cst_16 [1] : vector<16x128xf32> to vector<16xf32>
    %28 = vector.shape_cast %27 : vector<16xf32> to vector<16x1xf32>
    %cst_17 = arith.constant 1.280000e+02 : f32
    %29 = vector.broadcast %cst_17 : f32 to vector<16x1xf32>
    %30 = arith.divf %28, %29 : vector<16x1xf32>
    %cst_18 = arith.constant 9.99999997E-7 : f32
    %31 = vector.broadcast %cst_18 : f32 to vector<16x1xf32>
    %32 = arith.addf %30, %31 : vector<16x1xf32>
    %33 = math.rsqrt %32 : vector<16x1xf32>
    %34 = vector.broadcast %33 : vector<16x1xf32> to vector<16x128xf32>
    %35 = arith.mulf %24, %34 : vector<16x128xf32>
    %36 = vector.broadcast %25 : vector<1x128xf32> to vector<16x128xf32>
    %37 = arith.mulf %35, %36 : vector<16x128xf32>
    %38 = arith.mulf %37, %20 : vector<16x128xf32>
    %c64_i32 = arith.constant 64 : i32
    %39 = tpu.dynamic_rotate %37 by %c64_i32 dim 1 : vector<16x128xf32>, i32 -> vector<16x128xf32>
    %40 = arith.mulf %39, %21 : vector<16x128xf32>
    %41 = arith.addf %38, %40 : vector<16x128xf32>
    %42 = arith.truncf %41 : vector<16x128xf32> to vector<16x128xbf16>
    %43 = vector.extract_strided_slice %19 {offsets = [0, 0], sizes = [16, 128], strides = [1, 1]} : vector<16x256xf32> to vector<16x128xf32>
    %44 = arith.truncf %43 : vector<16x128xf32> to vector<16x128xbf16>
    %45 = vector.extract_strided_slice %17 {offsets = [0, 0], sizes = [16, 128], strides = [1, 1]} : vector<16x512xf32> to vector<16x128xf32>
    %c0_19 = arith.constant 0 : index
    %c0_20 = arith.constant 0 : index
    %46 = vector.load %arg5[%c0_19, %c0_20] : memref<1x128xf32, #tpu.memory_space<vmem>>, vector<1x128xf32>
    %47 = arith.mulf %45, %45 : vector<16x128xf32>
    %cst_21 = arith.constant dense<0.000000e+00> : vector<16xf32>
    %48 = vector.multi_reduction <add>, %47, %cst_21 [1] : vector<16x128xf32> to vector<16xf32>
    %49 = vector.shape_cast %48 : vector<16xf32> to vector<16x1xf32>
    %cst_22 = arith.constant 1.280000e+02 : f32
    %50 = vector.broadcast %cst_22 : f32 to vector<16x1xf32>
    %51 = arith.divf %49, %50 : vector<16x1xf32>
    %cst_23 = arith.constant 9.99999997E-7 : f32
    %52 = vector.broadcast %cst_23 : f32 to vector<16x1xf32>
    %53 = arith.addf %51, %52 : vector<16x1xf32>
    %54 = math.rsqrt %53 : vector<16x1xf32>
    %55 = vector.broadcast %54 : vector<16x1xf32> to vector<16x128xf32>
    %56 = arith.mulf %45, %55 : vector<16x128xf32>
    %57 = vector.broadcast %46 : vector<1x128xf32> to vector<16x128xf32>
    %58 = arith.mulf %56, %57 : vector<16x128xf32>
    %59 = arith.mulf %58, %20 : vector<16x128xf32>
    %c64_i32_24 = arith.constant 64 : i32
    %60 = tpu.dynamic_rotate %58 by %c64_i32_24 dim 1 : vector<16x128xf32>, i32 -> vector<16x128xf32>
    %61 = arith.mulf %60, %21 : vector<16x128xf32>
    %62 = arith.addf %59, %61 : vector<16x128xf32>
    %63 = vector.extract_strided_slice %17 {offsets = [0, 128], sizes = [16, 128], strides = [1, 1]} : vector<16x512xf32> to vector<16x128xf32>
    %c0_25 = arith.constant 0 : index
    %c0_26 = arith.constant 0 : index
    %64 = vector.load %arg5[%c0_25, %c0_26] : memref<1x128xf32, #tpu.memory_space<vmem>>, vector<1x128xf32>
    %65 = arith.mulf %63, %63 : vector<16x128xf32>
    %cst_27 = arith.constant dense<0.000000e+00> : vector<16xf32>
    %66 = vector.multi_reduction <add>, %65, %cst_27 [1] : vector<16x128xf32> to vector<16xf32>
    %67 = vector.shape_cast %66 : vector<16xf32> to vector<16x1xf32>
    %cst_28 = arith.constant 1.280000e+02 : f32
    %68 = vector.broadcast %cst_28 : f32 to vector<16x1xf32>
    %69 = arith.divf %67, %68 : vector<16x1xf32>
    %cst_29 = arith.constant 9.99999997E-7 : f32
    %70 = vector.broadcast %cst_29 : f32 to vector<16x1xf32>
    %71 = arith.addf %69, %70 : vector<16x1xf32>
    %72 = math.rsqrt %71 : vector<16x1xf32>
    %73 = vector.broadcast %72 : vector<16x1xf32> to vector<16x128xf32>
    %74 = arith.mulf %63, %73 : vector<16x128xf32>
    %75 = vector.broadcast %64 : vector<1x128xf32> to vector<16x128xf32>
    %76 = arith.mulf %74, %75 : vector<16x128xf32>
    %77 = arith.mulf %76, %20 : vector<16x128xf32>
    %c64_i32_30 = arith.constant 64 : i32
    %78 = tpu.dynamic_rotate %76 by %c64_i32_30 dim 1 : vector<16x128xf32>, i32 -> vector<16x128xf32>
    %79 = arith.mulf %78, %21 : vector<16x128xf32>
    %80 = arith.addf %77, %79 : vector<16x128xf32>
    %81 = tpu.concatenate %62, %80 in 0 : vector<16x128xf32>, vector<16x128xf32> -> vector<32x128xf32>
    %82 = arith.truncf %81 : vector<32x128xf32> to vector<32x128xbf16>
    %cst_31 = arith.constant dense<0.000000e+00> : vector<32x16xf32>
    %83 = tpu.matmul %82, %42, %cst_31 {dimension_numbers = #tpu.dot_dimension_numbers<[1], [1], [0], [0], [0, 0, 1, 0], [], []>} : vector<32x128xbf16>, vector<16x128xbf16>, vector<32x16xf32> -> vector<32x16xf32>
    %cst_32 = arith.constant 0.0883883461 : f32
    %84 = vector.broadcast %cst_32 : f32 to vector<32x16xf32>
    %85 = arith.mulf %83, %84 : vector<32x16xf32>
    %86 = arith.addf %85, %23 : vector<32x16xf32>
    %cst_33 = arith.constant dense<0xFF800000> : vector<32xf32>
    %87 = vector.multi_reduction <maximumf>, %86, %cst_33 [1] : vector<32x16xf32> to vector<32xf32>
    %88 = vector.shape_cast %87 : vector<32xf32> to vector<32x1xf32>
    %89 = vector.broadcast %88 : vector<32x1xf32> to vector<32x16xf32>
    %90 = arith.subf %86, %89 : vector<32x16xf32>
    %91 = math.exp %90 : vector<32x16xf32>
    %cst_34 = arith.constant dense<0.000000e+00> : vector<32xf32>
    %92 = vector.multi_reduction <add>, %91, %cst_34 [1] : vector<32x16xf32> to vector<32xf32>
    %93 = vector.shape_cast %92 : vector<32xf32> to vector<32x1xf32>
    %94 = vector.broadcast %93 : vector<32x1xf32> to vector<32x16xf32>
    %95 = arith.divf %91, %94 : vector<32x16xf32>
    %96 = arith.truncf %95 : vector<32x16xf32> to vector<32x16xbf16>
    %cst_35 = arith.constant dense<0.000000e+00> : vector<32x128xf32>
    %97 = tpu.matmul %96, %44, %cst_35 {dimension_numbers = #tpu.dot_dimension_numbers<[1], [0], [0], [1], [0, 0, 1, 1], [], []>} : vector<32x16xbf16>, vector<16x128xbf16>, vector<32x128xf32> -> vector<32x128xf32>
    %98 = vector.extract_strided_slice %97 {offsets = [0, 0], sizes = [16, 128], strides = [1, 1]} : vector<32x128xf32> to vector<16x128xf32>
    %99 = vector.extract_strided_slice %97 {offsets = [16, 0], sizes = [16, 128], strides = [1, 1]} : vector<32x128xf32> to vector<16x128xf32>
    %100 = vector.extract_strided_slice %18 {offsets = [0, 128], sizes = [16, 128], strides = [1, 1]} : vector<16x256xf32> to vector<16x128xf32>
    %c0_36 = arith.constant 0 : index
    %c0_37 = arith.constant 0 : index
    %101 = vector.load %arg6[%c0_36, %c0_37] : memref<1x128xf32, #tpu.memory_space<vmem>>, vector<1x128xf32>
    %102 = arith.mulf %100, %100 : vector<16x128xf32>
    %cst_38 = arith.constant dense<0.000000e+00> : vector<16xf32>
    %103 = vector.multi_reduction <add>, %102, %cst_38 [1] : vector<16x128xf32> to vector<16xf32>
    %104 = vector.shape_cast %103 : vector<16xf32> to vector<16x1xf32>
    %cst_39 = arith.constant 1.280000e+02 : f32
    %105 = vector.broadcast %cst_39 : f32 to vector<16x1xf32>
    %106 = arith.divf %104, %105 : vector<16x1xf32>
    %cst_40 = arith.constant 9.99999997E-7 : f32
    %107 = vector.broadcast %cst_40 : f32 to vector<16x1xf32>
    %108 = arith.addf %106, %107 : vector<16x1xf32>
    %109 = math.rsqrt %108 : vector<16x1xf32>
    %110 = vector.broadcast %109 : vector<16x1xf32> to vector<16x128xf32>
    %111 = arith.mulf %100, %110 : vector<16x128xf32>
    %112 = vector.broadcast %101 : vector<1x128xf32> to vector<16x128xf32>
    %113 = arith.mulf %111, %112 : vector<16x128xf32>
    %114 = arith.mulf %113, %20 : vector<16x128xf32>
    %c64_i32_41 = arith.constant 64 : i32
    %115 = tpu.dynamic_rotate %113 by %c64_i32_41 dim 1 : vector<16x128xf32>, i32 -> vector<16x128xf32>
    %116 = arith.mulf %115, %21 : vector<16x128xf32>
    %117 = arith.addf %114, %116 : vector<16x128xf32>
    %118 = arith.truncf %117 : vector<16x128xf32> to vector<16x128xbf16>
    %119 = vector.extract_strided_slice %19 {offsets = [0, 128], sizes = [16, 128], strides = [1, 1]} : vector<16x256xf32> to vector<16x128xf32>
    %120 = arith.truncf %119 : vector<16x128xf32> to vector<16x128xbf16>
    %121 = vector.extract_strided_slice %17 {offsets = [0, 256], sizes = [16, 128], strides = [1, 1]} : vector<16x512xf32> to vector<16x128xf32>
    %c0_42 = arith.constant 0 : index
    %c0_43 = arith.constant 0 : index
    %122 = vector.load %arg5[%c0_42, %c0_43] : memref<1x128xf32, #tpu.memory_space<vmem>>, vector<1x128xf32>
    %123 = arith.mulf %121, %121 : vector<16x128xf32>
    %cst_44 = arith.constant dense<0.000000e+00> : vector<16xf32>
    %124 = vector.multi_reduction <add>, %123, %cst_44 [1] : vector<16x128xf32> to vector<16xf32>
    %125 = vector.shape_cast %124 : vector<16xf32> to vector<16x1xf32>
    %cst_45 = arith.constant 1.280000e+02 : f32
    %126 = vector.broadcast %cst_45 : f32 to vector<16x1xf32>
    %127 = arith.divf %125, %126 : vector<16x1xf32>
    %cst_46 = arith.constant 9.99999997E-7 : f32
    %128 = vector.broadcast %cst_46 : f32 to vector<16x1xf32>
    %129 = arith.addf %127, %128 : vector<16x1xf32>
    %130 = math.rsqrt %129 : vector<16x1xf32>
    %131 = vector.broadcast %130 : vector<16x1xf32> to vector<16x128xf32>
    %132 = arith.mulf %121, %131 : vector<16x128xf32>
    %133 = vector.broadcast %122 : vector<1x128xf32> to vector<16x128xf32>
    %134 = arith.mulf %132, %133 : vector<16x128xf32>
    %135 = arith.mulf %134, %20 : vector<16x128xf32>
    %c64_i32_47 = arith.constant 64 : i32
    %136 = tpu.dynamic_rotate %134 by %c64_i32_47 dim 1 : vector<16x128xf32>, i32 -> vector<16x128xf32>
    %137 = arith.mulf %136, %21 : vector<16x128xf32>
    %138 = arith.addf %135, %137 : vector<16x128xf32>
    %139 = vector.extract_strided_slice %17 {offsets = [0, 384], sizes = [16, 128], strides = [1, 1]} : vector<16x512xf32> to vector<16x128xf32>
    %c0_48 = arith.constant 0 : index
    %c0_49 = arith.constant 0 : index
    %140 = vector.load %arg5[%c0_48, %c0_49] : memref<1x128xf32, #tpu.memory_space<vmem>>, vector<1x128xf32>
    %141 = arith.mulf %139, %139 : vector<16x128xf32>
    %cst_50 = arith.constant dense<0.000000e+00> : vector<16xf32>
    %142 = vector.multi_reduction <add>, %141, %cst_50 [1] : vector<16x128xf32> to vector<16xf32>
    %143 = vector.shape_cast %142 : vector<16xf32> to vector<16x1xf32>
    %cst_51 = arith.constant 1.280000e+02 : f32
    %144 = vector.broadcast %cst_51 : f32 to vector<16x1xf32>
    %145 = arith.divf %143, %144 : vector<16x1xf32>
    %cst_52 = arith.constant 9.99999997E-7 : f32
    %146 = vector.broadcast %cst_52 : f32 to vector<16x1xf32>
    %147 = arith.addf %145, %146 : vector<16x1xf32>
    %148 = math.rsqrt %147 : vector<16x1xf32>
    %149 = vector.broadcast %148 : vector<16x1xf32> to vector<16x128xf32>
    %150 = arith.mulf %139, %149 : vector<16x128xf32>
    %151 = vector.broadcast %140 : vector<1x128xf32> to vector<16x128xf32>
    %152 = arith.mulf %150, %151 : vector<16x128xf32>
    %153 = arith.mulf %152, %20 : vector<16x128xf32>
    %c64_i32_53 = arith.constant 64 : i32
    %154 = tpu.dynamic_rotate %152 by %c64_i32_53 dim 1 : vector<16x128xf32>, i32 -> vector<16x128xf32>
    %155 = arith.mulf %154, %21 : vector<16x128xf32>
    %156 = arith.addf %153, %155 : vector<16x128xf32>
    %157 = tpu.concatenate %138, %156 in 0 : vector<16x128xf32>, vector<16x128xf32> -> vector<32x128xf32>
    %158 = arith.truncf %157 : vector<32x128xf32> to vector<32x128xbf16>
    %cst_54 = arith.constant dense<0.000000e+00> : vector<32x16xf32>
    %159 = tpu.matmul %158, %118, %cst_54 {dimension_numbers = #tpu.dot_dimension_numbers<[1], [1], [0], [0], [0, 0, 1, 0], [], []>} : vector<32x128xbf16>, vector<16x128xbf16>, vector<32x16xf32> -> vector<32x16xf32>
    %cst_55 = arith.constant 0.0883883461 : f32
    %160 = vector.broadcast %cst_55 : f32 to vector<32x16xf32>
    %161 = arith.mulf %159, %160 : vector<32x16xf32>
    %162 = arith.addf %161, %23 : vector<32x16xf32>
    %cst_56 = arith.constant dense<0xFF800000> : vector<32xf32>
    %163 = vector.multi_reduction <maximumf>, %162, %cst_56 [1] : vector<32x16xf32> to vector<32xf32>
    %164 = vector.shape_cast %163 : vector<32xf32> to vector<32x1xf32>
    %165 = vector.broadcast %164 : vector<32x1xf32> to vector<32x16xf32>
    %166 = arith.subf %162, %165 : vector<32x16xf32>
    %167 = math.exp %166 : vector<32x16xf32>
    %cst_57 = arith.constant dense<0.000000e+00> : vector<32xf32>
    %168 = vector.multi_reduction <add>, %167, %cst_57 [1] : vector<32x16xf32> to vector<32xf32>
    %169 = vector.shape_cast %168 : vector<32xf32> to vector<32x1xf32>
    %170 = vector.broadcast %169 : vector<32x1xf32> to vector<32x16xf32>
    %171 = arith.divf %167, %170 : vector<32x16xf32>
    %172 = arith.truncf %171 : vector<32x16xf32> to vector<32x16xbf16>
    %cst_58 = arith.constant dense<0.000000e+00> : vector<32x128xf32>
    %173 = tpu.matmul %172, %120, %cst_58 {dimension_numbers = #tpu.dot_dimension_numbers<[1], [0], [0], [1], [0, 0, 1, 1], [], []>} : vector<32x16xbf16>, vector<16x128xbf16>, vector<32x128xf32> -> vector<32x128xf32>
    %174 = vector.extract_strided_slice %173 {offsets = [0, 0], sizes = [16, 128], strides = [1, 1]} : vector<32x128xf32> to vector<16x128xf32>
    %175 = vector.extract_strided_slice %173 {offsets = [16, 0], sizes = [16, 128], strides = [1, 1]} : vector<32x128xf32> to vector<16x128xf32>
    %176 = tpu.concatenate %98, %99, %174, %175 in 1 : vector<16x128xf32>, vector<16x128xf32>, vector<16x128xf32>, vector<16x128xf32> -> vector<16x512xf32>
    %177 = arith.truncf %176 : vector<16x512xf32> to vector<16x512xbf16>
    %c0_59 = arith.constant 0 : index
    %c0_60 = arith.constant 0 : index
    %178 = vector.load %arg4[%c0_59, %c0_60] : memref<512x256xbf16, #tpu.memory_space<vmem>>, vector<512x256xbf16>
    %cst_61 = arith.constant dense<0.000000e+00> : vector<16x256xf32>
    %179 = tpu.matmul %177, %178, %cst_61 {dimension_numbers = #tpu.dot_dimension_numbers<[1], [0], [0], [1], [0, 0, 1, 1], [], []>} : vector<16x512xbf16>, vector<512x256xbf16>, vector<16x256xf32> -> vector<16x256xf32>
    %180 = arith.addf %0, %179 : vector<16x256xf32>
    %181 = arith.mulf %180, %180 : vector<16x256xf32>
    %cst_62 = arith.constant dense<0.000000e+00> : vector<16xf32>
    %182 = vector.multi_reduction <add>, %181, %cst_62 [1] : vector<16x256xf32> to vector<16xf32>
    %183 = vector.shape_cast %182 : vector<16xf32> to vector<16x1xf32>
    %cst_63 = arith.constant 2.560000e+02 : f32
    %184 = vector.broadcast %cst_63 : f32 to vector<16x1xf32>
    %185 = arith.divf %183, %184 : vector<16x1xf32>
    %cst_64 = arith.constant 9.99999997E-7 : f32
    %186 = vector.broadcast %cst_64 : f32 to vector<16x1xf32>
    %187 = arith.addf %185, %186 : vector<16x1xf32>
    %188 = math.rsqrt %187 : vector<16x1xf32>
    %189 = vector.broadcast %188 : vector<16x1xf32> to vector<16x256xf32>
    %190 = arith.mulf %180, %189 : vector<16x256xf32>
    %c0_65 = arith.constant 0 : index
    %c0_66 = arith.constant 0 : index
    %191 = vector.load %arg10[%c0_65, %c0_66] : memref<1x256xf32, #tpu.memory_space<vmem>>, vector<1x256xf32>
    %192 = vector.broadcast %191 : vector<1x256xf32> to vector<16x256xf32>
    %193 = arith.mulf %190, %192 : vector<16x256xf32>
    %194 = arith.truncf %193 : vector<16x256xf32> to vector<16x256xbf16>
    %c0_67 = arith.constant 0 : index
    %c0_68 = arith.constant 0 : index
    %195 = vector.load %arg11[%c0_67, %c0_68] : memref<256x8xf32, #tpu.memory_space<vmem>>, vector<256x8xf32>
    %cst_69 = arith.constant dense<0.000000e+00> : vector<16x8xf32>
    %196 = tpu.matmul %193, %195, %cst_69 {dimension_numbers = #tpu.dot_dimension_numbers<[1], [0], [0], [1], [0, 0, 1, 1], [], []>} : vector<16x256xf32>, vector<256x8xf32>, vector<16x8xf32> -> vector<16x8xf32>
    %cst_70 = arith.constant dense<0xFF800000> : vector<16xf32>
    %197 = vector.multi_reduction <maximumf>, %196, %cst_70 [1] : vector<16x8xf32> to vector<16xf32>
    %198 = vector.shape_cast %197 : vector<16xf32> to vector<16x1xf32>
    %199 = vector.broadcast %198 : vector<16x1xf32> to vector<16x8xf32>
    %200 = arith.subf %196, %199 : vector<16x8xf32>
    %201 = math.exp %200 : vector<16x8xf32>
    %cst_71 = arith.constant dense<0.000000e+00> : vector<16xf32>
    %202 = vector.multi_reduction <add>, %201, %cst_71 [1] : vector<16x8xf32> to vector<16xf32>
    %203 = vector.shape_cast %202 : vector<16xf32> to vector<16x1xf32>
    %204 = vector.broadcast %203 : vector<16x1xf32> to vector<16x8xf32>
    %205 = arith.divf %201, %204 : vector<16x8xf32>
    %206 = tpu.iota {dimensions = array<i32: 1>} : vector<16x8xi32>
    %cst_72 = arith.constant dense<0xFF800000> : vector<16xf32>
    %207 = vector.multi_reduction <maximumf>, %205, %cst_72 [1] : vector<16x8xf32> to vector<16xf32>
    %208 = vector.shape_cast %207 : vector<16xf32> to vector<16x1xf32>
    %209 = vector.broadcast %208 : vector<16x1xf32> to vector<16x8xf32>
    %210 = arith.cmpf oeq, %205, %209 : vector<16x8xf32>
    %c8_i32 = arith.constant 8 : i32
    %211 = vector.broadcast %c8_i32 : i32 to vector<16x8xi32>
    %212 = arith.select %210, %206, %211 : vector<16x8xi1>, vector<16x8xi32>
    %cst_73 = arith.constant dense<2147483647> : vector<16xi32>
    %213 = vector.multi_reduction <minsi>, %212, %cst_73 [1] : vector<16x8xi32> to vector<16xi32>
    %214 = vector.shape_cast %213 : vector<16xi32> to vector<16x1xi32>
    %215 = vector.broadcast %214 : vector<16x1xi32> to vector<16x8xi32>
    %216 = arith.cmpi eq, %206, %215 : vector<16x8xi32>
    %cst_74 = arith.constant 0xFF800000 : f32
    %217 = vector.broadcast %cst_74 : f32 to vector<16x8xf32>
    %218 = arith.select %216, %217, %205 : vector<16x8xi1>, vector<16x8xf32>
    %cst_75 = arith.constant dense<0xFF800000> : vector<16xf32>
    %219 = vector.multi_reduction <maximumf>, %218, %cst_75 [1] : vector<16x8xf32> to vector<16xf32>
    %220 = vector.shape_cast %219 : vector<16xf32> to vector<16x1xf32>
    %221 = vector.broadcast %220 : vector<16x1xf32> to vector<16x8xf32>
    %222 = arith.cmpf oeq, %218, %221 : vector<16x8xf32>
    %c8_i32_76 = arith.constant 8 : i32
    %223 = vector.broadcast %c8_i32_76 : i32 to vector<16x8xi32>
    %224 = arith.select %222, %206, %223 : vector<16x8xi1>, vector<16x8xi32>
    %cst_77 = arith.constant dense<2147483647> : vector<16xi32>
    %225 = vector.multi_reduction <minsi>, %224, %cst_77 [1] : vector<16x8xi32> to vector<16xi32>
    %226 = vector.shape_cast %225 : vector<16xi32> to vector<16x1xi32>
    %227 = vector.broadcast %226 : vector<16x1xi32> to vector<16x8xi32>
    %228 = arith.cmpi eq, %206, %227 : vector<16x8xi32>
    %229 = arith.ori %216, %228 : vector<16x8xi1>
    %cst_78 = arith.constant 0.000000e+00 : f32
    %230 = vector.broadcast %cst_78 : f32 to vector<16x8xf32>
    %231 = arith.select %229, %205, %230 : vector<16x8xi1>, vector<16x8xf32>
    %cst_79 = arith.constant dense<0.000000e+00> : vector<16xf32>
    %232 = vector.multi_reduction <add>, %231, %cst_79 [1] : vector<16x8xf32> to vector<16xf32>
    %233 = vector.shape_cast %232 : vector<16xf32> to vector<16x1xf32>
    %234 = vector.broadcast %233 : vector<16x1xf32> to vector<16x8xf32>
    %235 = arith.divf %231, %234 : vector<16x8xf32>
    %c0_80 = arith.constant 0 : index
    %c0_81 = arith.constant 0 : index
    %c0_82 = arith.constant 0 : index
    %236 = vector.load %arg12[%c0_80, %c0_81, %c0_82] : memref<8x256x256xbf16, #tpu.memory_space<vmem>>, vector<1x256x256xbf16>
    %237 = vector.shape_cast %236 : vector<1x256x256xbf16> to vector<256x256xbf16>
    %cst_83 = arith.constant dense<0.000000e+00> : vector<16x256xf32>
    %238 = tpu.matmul %194, %237, %cst_83 {dimension_numbers = #tpu.dot_dimension_numbers<[1], [0], [0], [1], [0, 0, 1, 1], [], []>} : vector<16x256xbf16>, vector<256x256xbf16>, vector<16x256xf32> -> vector<16x256xf32>
    %239 = vector.extract_strided_slice %238 {offsets = [0, 0], sizes = [16, 128], strides = [1, 1]} : vector<16x256xf32> to vector<16x128xf32>
    %240 = vector.extract_strided_slice %238 {offsets = [0, 128], sizes = [16, 128], strides = [1, 1]} : vector<16x256xf32> to vector<16x128xf32>
    %241 = arith.negf %239 : vector<16x128xf32>
    %242 = math.exp %241 : vector<16x128xf32>
    %cst_84 = arith.constant 1.000000e+00 : f32
    %243 = vector.broadcast %cst_84 : f32 to vector<16x128xf32>
    %244 = arith.addf %243, %242 : vector<16x128xf32>
    %245 = arith.divf %243, %244 : vector<16x128xf32>
    %246 = arith.mulf %239, %245 : vector<16x128xf32>
    %247 = arith.mulf %246, %240 : vector<16x128xf32>
    %248 = vector.extract_strided_slice %235 {offsets = [0, 0], sizes = [16, 1], strides = [1, 1]} : vector<16x8xf32> to vector<16x1xf32>
    %249 = vector.broadcast %248 : vector<16x1xf32> to vector<16x128xf32>
    %250 = arith.mulf %247, %249 : vector<16x128xf32>
    %251 = arith.truncf %250 : vector<16x128xf32> to vector<16x128xbf16>
    %c0_85 = arith.constant 0 : index
    %c0_86 = arith.constant 0 : index
    %c0_87 = arith.constant 0 : index
    %252 = vector.load %arg13[%c0_85, %c0_86, %c0_87] : memref<8x128x256xbf16, #tpu.memory_space<vmem>>, vector<1x128x256xbf16>
    %253 = vector.shape_cast %252 : vector<1x128x256xbf16> to vector<128x256xbf16>
    %cst_88 = arith.constant dense<0.000000e+00> : vector<16x256xf32>
    %254 = tpu.matmul %251, %253, %cst_88 {dimension_numbers = #tpu.dot_dimension_numbers<[1], [0], [0], [1], [0, 0, 1, 1], [], []>} : vector<16x128xbf16>, vector<128x256xbf16>, vector<16x256xf32> -> vector<16x256xf32>
    %255 = arith.addf %180, %254 : vector<16x256xf32>
    %c1 = arith.constant 1 : index
    %c0_89 = arith.constant 0 : index
    %c0_90 = arith.constant 0 : index
    %256 = vector.load %arg12[%c1, %c0_89, %c0_90] : memref<8x256x256xbf16, #tpu.memory_space<vmem>>, vector<1x256x256xbf16>
    %257 = vector.shape_cast %256 : vector<1x256x256xbf16> to vector<256x256xbf16>
    %cst_91 = arith.constant dense<0.000000e+00> : vector<16x256xf32>
    %258 = tpu.matmul %194, %257, %cst_91 {dimension_numbers = #tpu.dot_dimension_numbers<[1], [0], [0], [1], [0, 0, 1, 1], [], []>} : vector<16x256xbf16>, vector<256x256xbf16>, vector<16x256xf32> -> vector<16x256xf32>
    %259 = vector.extract_strided_slice %258 {offsets = [0, 0], sizes = [16, 128], strides = [1, 1]} : vector<16x256xf32> to vector<16x128xf32>
    %260 = vector.extract_strided_slice %258 {offsets = [0, 128], sizes = [16, 128], strides = [1, 1]} : vector<16x256xf32> to vector<16x128xf32>
    %261 = arith.negf %259 : vector<16x128xf32>
    %262 = math.exp %261 : vector<16x128xf32>
    %cst_92 = arith.constant 1.000000e+00 : f32
    %263 = vector.broadcast %cst_92 : f32 to vector<16x128xf32>
    %264 = arith.addf %263, %262 : vector<16x128xf32>
    %265 = arith.divf %263, %264 : vector<16x128xf32>
    %266 = arith.mulf %259, %265 : vector<16x128xf32>
    %267 = arith.mulf %266, %260 : vector<16x128xf32>
    %268 = vector.extract_strided_slice %235 {offsets = [0, 1], sizes = [16, 1], strides = [1, 1]} : vector<16x8xf32> to vector<16x1xf32>
    %269 = vector.broadcast %268 : vector<16x1xf32> to vector<16x128xf32>
    %270 = arith.mulf %267, %269 : vector<16x128xf32>
    %271 = arith.truncf %270 : vector<16x128xf32> to vector<16x128xbf16>
    %c1_93 = arith.constant 1 : index
    %c0_94 = arith.constant 0 : index
    %c0_95 = arith.constant 0 : index
    %272 = vector.load %arg13[%c1_93, %c0_94, %c0_95] : memref<8x128x256xbf16, #tpu.memory_space<vmem>>, vector<1x128x256xbf16>
    %273 = vector.shape_cast %272 : vector<1x128x256xbf16> to vector<128x256xbf16>
    %cst_96 = arith.constant dense<0.000000e+00> : vector<16x256xf32>
    %274 = tpu.matmul %271, %273, %cst_96 {dimension_numbers = #tpu.dot_dimension_numbers<[1], [0], [0], [1], [0, 0, 1, 1], [], []>} : vector<16x128xbf16>, vector<128x256xbf16>, vector<16x256xf32> -> vector<16x256xf32>
    %275 = arith.addf %255, %274 : vector<16x256xf32>
    %c2 = arith.constant 2 : index
    %c0_97 = arith.constant 0 : index
    %c0_98 = arith.constant 0 : index
    %276 = vector.load %arg12[%c2, %c0_97, %c0_98] : memref<8x256x256xbf16, #tpu.memory_space<vmem>>, vector<1x256x256xbf16>
    %277 = vector.shape_cast %276 : vector<1x256x256xbf16> to vector<256x256xbf16>
    %cst_99 = arith.constant dense<0.000000e+00> : vector<16x256xf32>
    %278 = tpu.matmul %194, %277, %cst_99 {dimension_numbers = #tpu.dot_dimension_numbers<[1], [0], [0], [1], [0, 0, 1, 1], [], []>} : vector<16x256xbf16>, vector<256x256xbf16>, vector<16x256xf32> -> vector<16x256xf32>
    %279 = vector.extract_strided_slice %278 {offsets = [0, 0], sizes = [16, 128], strides = [1, 1]} : vector<16x256xf32> to vector<16x128xf32>
    %280 = vector.extract_strided_slice %278 {offsets = [0, 128], sizes = [16, 128], strides = [1, 1]} : vector<16x256xf32> to vector<16x128xf32>
    %281 = arith.negf %279 : vector<16x128xf32>
    %282 = math.exp %281 : vector<16x128xf32>
    %cst_100 = arith.constant 1.000000e+00 : f32
    %283 = vector.broadcast %cst_100 : f32 to vector<16x128xf32>
    %284 = arith.addf %283, %282 : vector<16x128xf32>
    %285 = arith.divf %283, %284 : vector<16x128xf32>
    %286 = arith.mulf %279, %285 : vector<16x128xf32>
    %287 = arith.mulf %286, %280 : vector<16x128xf32>
    %288 = vector.extract_strided_slice %235 {offsets = [0, 2], sizes = [16, 1], strides = [1, 1]} : vector<16x8xf32> to vector<16x1xf32>
    %289 = vector.broadcast %288 : vector<16x1xf32> to vector<16x128xf32>
    %290 = arith.mulf %287, %289 : vector<16x128xf32>
    %291 = arith.truncf %290 : vector<16x128xf32> to vector<16x128xbf16>
    %c2_101 = arith.constant 2 : index
    %c0_102 = arith.constant 0 : index
    %c0_103 = arith.constant 0 : index
    %292 = vector.load %arg13[%c2_101, %c0_102, %c0_103] : memref<8x128x256xbf16, #tpu.memory_space<vmem>>, vector<1x128x256xbf16>
    %293 = vector.shape_cast %292 : vector<1x128x256xbf16> to vector<128x256xbf16>
    %cst_104 = arith.constant dense<0.000000e+00> : vector<16x256xf32>
    %294 = tpu.matmul %291, %293, %cst_104 {dimension_numbers = #tpu.dot_dimension_numbers<[1], [0], [0], [1], [0, 0, 1, 1], [], []>} : vector<16x128xbf16>, vector<128x256xbf16>, vector<16x256xf32> -> vector<16x256xf32>
    %295 = arith.addf %275, %294 : vector<16x256xf32>
    %c3 = arith.constant 3 : index
    %c0_105 = arith.constant 0 : index
    %c0_106 = arith.constant 0 : index
    %296 = vector.load %arg12[%c3, %c0_105, %c0_106] : memref<8x256x256xbf16, #tpu.memory_space<vmem>>, vector<1x256x256xbf16>
    %297 = vector.shape_cast %296 : vector<1x256x256xbf16> to vector<256x256xbf16>
    %cst_107 = arith.constant dense<0.000000e+00> : vector<16x256xf32>
    %298 = tpu.matmul %194, %297, %cst_107 {dimension_numbers = #tpu.dot_dimension_numbers<[1], [0], [0], [1], [0, 0, 1, 1], [], []>} : vector<16x256xbf16>, vector<256x256xbf16>, vector<16x256xf32> -> vector<16x256xf32>
    %299 = vector.extract_strided_slice %298 {offsets = [0, 0], sizes = [16, 128], strides = [1, 1]} : vector<16x256xf32> to vector<16x128xf32>
    %300 = vector.extract_strided_slice %298 {offsets = [0, 128], sizes = [16, 128], strides = [1, 1]} : vector<16x256xf32> to vector<16x128xf32>
    %301 = arith.negf %299 : vector<16x128xf32>
    %302 = math.exp %301 : vector<16x128xf32>
    %cst_108 = arith.constant 1.000000e+00 : f32
    %303 = vector.broadcast %cst_108 : f32 to vector<16x128xf32>
    %304 = arith.addf %303, %302 : vector<16x128xf32>
    %305 = arith.divf %303, %304 : vector<16x128xf32>
    %306 = arith.mulf %299, %305 : vector<16x128xf32>
    %307 = arith.mulf %306, %300 : vector<16x128xf32>
    %308 = vector.extract_strided_slice %235 {offsets = [0, 3], sizes = [16, 1], strides = [1, 1]} : vector<16x8xf32> to vector<16x1xf32>
    %309 = vector.broadcast %308 : vector<16x1xf32> to vector<16x128xf32>
    %310 = arith.mulf %307, %309 : vector<16x128xf32>
    %311 = arith.truncf %310 : vector<16x128xf32> to vector<16x128xbf16>
    %c3_109 = arith.constant 3 : index
    %c0_110 = arith.constant 0 : index
    %c0_111 = arith.constant 0 : index
    %312 = vector.load %arg13[%c3_109, %c0_110, %c0_111] : memref<8x128x256xbf16, #tpu.memory_space<vmem>>, vector<1x128x256xbf16>
    %313 = vector.shape_cast %312 : vector<1x128x256xbf16> to vector<128x256xbf16>
    %cst_112 = arith.constant dense<0.000000e+00> : vector<16x256xf32>
    %314 = tpu.matmul %311, %313, %cst_112 {dimension_numbers = #tpu.dot_dimension_numbers<[1], [0], [0], [1], [0, 0, 1, 1], [], []>} : vector<16x128xbf16>, vector<128x256xbf16>, vector<16x256xf32> -> vector<16x256xf32>
    %315 = arith.addf %295, %314 : vector<16x256xf32>
    %c4 = arith.constant 4 : index
    %c0_113 = arith.constant 0 : index
    %c0_114 = arith.constant 0 : index
    %316 = vector.load %arg12[%c4, %c0_113, %c0_114] : memref<8x256x256xbf16, #tpu.memory_space<vmem>>, vector<1x256x256xbf16>
    %317 = vector.shape_cast %316 : vector<1x256x256xbf16> to vector<256x256xbf16>
    %cst_115 = arith.constant dense<0.000000e+00> : vector<16x256xf32>
    %318 = tpu.matmul %194, %317, %cst_115 {dimension_numbers = #tpu.dot_dimension_numbers<[1], [0], [0], [1], [0, 0, 1, 1], [], []>} : vector<16x256xbf16>, vector<256x256xbf16>, vector<16x256xf32> -> vector<16x256xf32>
    %319 = vector.extract_strided_slice %318 {offsets = [0, 0], sizes = [16, 128], strides = [1, 1]} : vector<16x256xf32> to vector<16x128xf32>
    %320 = vector.extract_strided_slice %318 {offsets = [0, 128], sizes = [16, 128], strides = [1, 1]} : vector<16x256xf32> to vector<16x128xf32>
    %321 = arith.negf %319 : vector<16x128xf32>
    %322 = math.exp %321 : vector<16x128xf32>
    %cst_116 = arith.constant 1.000000e+00 : f32
    %323 = vector.broadcast %cst_116 : f32 to vector<16x128xf32>
    %324 = arith.addf %323, %322 : vector<16x128xf32>
    %325 = arith.divf %323, %324 : vector<16x128xf32>
    %326 = arith.mulf %319, %325 : vector<16x128xf32>
    %327 = arith.mulf %326, %320 : vector<16x128xf32>
    %328 = vector.extract_strided_slice %235 {offsets = [0, 4], sizes = [16, 1], strides = [1, 1]} : vector<16x8xf32> to vector<16x1xf32>
    %329 = vector.broadcast %328 : vector<16x1xf32> to vector<16x128xf32>
    %330 = arith.mulf %327, %329 : vector<16x128xf32>
    %331 = arith.truncf %330 : vector<16x128xf32> to vector<16x128xbf16>
    %c4_117 = arith.constant 4 : index
    %c0_118 = arith.constant 0 : index
    %c0_119 = arith.constant 0 : index
    %332 = vector.load %arg13[%c4_117, %c0_118, %c0_119] : memref<8x128x256xbf16, #tpu.memory_space<vmem>>, vector<1x128x256xbf16>
    %333 = vector.shape_cast %332 : vector<1x128x256xbf16> to vector<128x256xbf16>
    %cst_120 = arith.constant dense<0.000000e+00> : vector<16x256xf32>
    %334 = tpu.matmul %331, %333, %cst_120 {dimension_numbers = #tpu.dot_dimension_numbers<[1], [0], [0], [1], [0, 0, 1, 1], [], []>} : vector<16x128xbf16>, vector<128x256xbf16>, vector<16x256xf32> -> vector<16x256xf32>
    %335 = arith.addf %315, %334 : vector<16x256xf32>
    %c5 = arith.constant 5 : index
    %c0_121 = arith.constant 0 : index
    %c0_122 = arith.constant 0 : index
    %336 = vector.load %arg12[%c5, %c0_121, %c0_122] : memref<8x256x256xbf16, #tpu.memory_space<vmem>>, vector<1x256x256xbf16>
    %337 = vector.shape_cast %336 : vector<1x256x256xbf16> to vector<256x256xbf16>
    %cst_123 = arith.constant dense<0.000000e+00> : vector<16x256xf32>
    %338 = tpu.matmul %194, %337, %cst_123 {dimension_numbers = #tpu.dot_dimension_numbers<[1], [0], [0], [1], [0, 0, 1, 1], [], []>} : vector<16x256xbf16>, vector<256x256xbf16>, vector<16x256xf32> -> vector<16x256xf32>
    %339 = vector.extract_strided_slice %338 {offsets = [0, 0], sizes = [16, 128], strides = [1, 1]} : vector<16x256xf32> to vector<16x128xf32>
    %340 = vector.extract_strided_slice %338 {offsets = [0, 128], sizes = [16, 128], strides = [1, 1]} : vector<16x256xf32> to vector<16x128xf32>
    %341 = arith.negf %339 : vector<16x128xf32>
    %342 = math.exp %341 : vector<16x128xf32>
    %cst_124 = arith.constant 1.000000e+00 : f32
    %343 = vector.broadcast %cst_124 : f32 to vector<16x128xf32>
    %344 = arith.addf %343, %342 : vector<16x128xf32>
    %345 = arith.divf %343, %344 : vector<16x128xf32>
    %346 = arith.mulf %339, %345 : vector<16x128xf32>
    %347 = arith.mulf %346, %340 : vector<16x128xf32>
    %348 = vector.extract_strided_slice %235 {offsets = [0, 5], sizes = [16, 1], strides = [1, 1]} : vector<16x8xf32> to vector<16x1xf32>
    %349 = vector.broadcast %348 : vector<16x1xf32> to vector<16x128xf32>
    %350 = arith.mulf %347, %349 : vector<16x128xf32>
    %351 = arith.truncf %350 : vector<16x128xf32> to vector<16x128xbf16>
    %c5_125 = arith.constant 5 : index
    %c0_126 = arith.constant 0 : index
    %c0_127 = arith.constant 0 : index
    %352 = vector.load %arg13[%c5_125, %c0_126, %c0_127] : memref<8x128x256xbf16, #tpu.memory_space<vmem>>, vector<1x128x256xbf16>
    %353 = vector.shape_cast %352 : vector<1x128x256xbf16> to vector<128x256xbf16>
    %cst_128 = arith.constant dense<0.000000e+00> : vector<16x256xf32>
    %354 = tpu.matmul %351, %353, %cst_128 {dimension_numbers = #tpu.dot_dimension_numbers<[1], [0], [0], [1], [0, 0, 1, 1], [], []>} : vector<16x128xbf16>, vector<128x256xbf16>, vector<16x256xf32> -> vector<16x256xf32>
    %355 = arith.addf %335, %354 : vector<16x256xf32>
    %c6 = arith.constant 6 : index
    %c0_129 = arith.constant 0 : index
    %c0_130 = arith.constant 0 : index
    %356 = vector.load %arg12[%c6, %c0_129, %c0_130] : memref<8x256x256xbf16, #tpu.memory_space<vmem>>, vector<1x256x256xbf16>
    %357 = vector.shape_cast %356 : vector<1x256x256xbf16> to vector<256x256xbf16>
    %cst_131 = arith.constant dense<0.000000e+00> : vector<16x256xf32>
    %358 = tpu.matmul %194, %357, %cst_131 {dimension_numbers = #tpu.dot_dimension_numbers<[1], [0], [0], [1], [0, 0, 1, 1], [], []>} : vector<16x256xbf16>, vector<256x256xbf16>, vector<16x256xf32> -> vector<16x256xf32>
    %359 = vector.extract_strided_slice %358 {offsets = [0, 0], sizes = [16, 128], strides = [1, 1]} : vector<16x256xf32> to vector<16x128xf32>
    %360 = vector.extract_strided_slice %358 {offsets = [0, 128], sizes = [16, 128], strides = [1, 1]} : vector<16x256xf32> to vector<16x128xf32>
    %361 = arith.negf %359 : vector<16x128xf32>
    %362 = math.exp %361 : vector<16x128xf32>
    %cst_132 = arith.constant 1.000000e+00 : f32
    %363 = vector.broadcast %cst_132 : f32 to vector<16x128xf32>
    %364 = arith.addf %363, %362 : vector<16x128xf32>
    %365 = arith.divf %363, %364 : vector<16x128xf32>
    %366 = arith.mulf %359, %365 : vector<16x128xf32>
    %367 = arith.mulf %366, %360 : vector<16x128xf32>
    %368 = vector.extract_strided_slice %235 {offsets = [0, 6], sizes = [16, 1], strides = [1, 1]} : vector<16x8xf32> to vector<16x1xf32>
    %369 = vector.broadcast %368 : vector<16x1xf32> to vector<16x128xf32>
    %370 = arith.mulf %367, %369 : vector<16x128xf32>
    %371 = arith.truncf %370 : vector<16x128xf32> to vector<16x128xbf16>
    %c6_133 = arith.constant 6 : index
    %c0_134 = arith.constant 0 : index
    %c0_135 = arith.constant 0 : index
    %372 = vector.load %arg13[%c6_133, %c0_134, %c0_135] : memref<8x128x256xbf16, #tpu.memory_space<vmem>>, vector<1x128x256xbf16>
    %373 = vector.shape_cast %372 : vector<1x128x256xbf16> to vector<128x256xbf16>
    %cst_136 = arith.constant dense<0.000000e+00> : vector<16x256xf32>
    %374 = tpu.matmul %371, %373, %cst_136 {dimension_numbers = #tpu.dot_dimension_numbers<[1], [0], [0], [1], [0, 0, 1, 1], [], []>} : vector<16x128xbf16>, vector<128x256xbf16>, vector<16x256xf32> -> vector<16x256xf32>
    %375 = arith.addf %355, %374 : vector<16x256xf32>
    %c7 = arith.constant 7 : index
    %c0_137 = arith.constant 0 : index
    %c0_138 = arith.constant 0 : index
    %376 = vector.load %arg12[%c7, %c0_137, %c0_138] : memref<8x256x256xbf16, #tpu.memory_space<vmem>>, vector<1x256x256xbf16>
    %377 = vector.shape_cast %376 : vector<1x256x256xbf16> to vector<256x256xbf16>
    %cst_139 = arith.constant dense<0.000000e+00> : vector<16x256xf32>
    %378 = tpu.matmul %194, %377, %cst_139 {dimension_numbers = #tpu.dot_dimension_numbers<[1], [0], [0], [1], [0, 0, 1, 1], [], []>} : vector<16x256xbf16>, vector<256x256xbf16>, vector<16x256xf32> -> vector<16x256xf32>
    %379 = vector.extract_strided_slice %378 {offsets = [0, 0], sizes = [16, 128], strides = [1, 1]} : vector<16x256xf32> to vector<16x128xf32>
    %380 = vector.extract_strided_slice %378 {offsets = [0, 128], sizes = [16, 128], strides = [1, 1]} : vector<16x256xf32> to vector<16x128xf32>
    %381 = arith.negf %379 : vector<16x128xf32>
    %382 = math.exp %381 : vector<16x128xf32>
    %cst_140 = arith.constant 1.000000e+00 : f32
    %383 = vector.broadcast %cst_140 : f32 to vector<16x128xf32>
    %384 = arith.addf %383, %382 : vector<16x128xf32>
    %385 = arith.divf %383, %384 : vector<16x128xf32>
    %386 = arith.mulf %379, %385 : vector<16x128xf32>
    %387 = arith.mulf %386, %380 : vector<16x128xf32>
    %388 = vector.extract_strided_slice %235 {offsets = [0, 7], sizes = [16, 1], strides = [1, 1]} : vector<16x8xf32> to vector<16x1xf32>
    %389 = vector.broadcast %388 : vector<16x1xf32> to vector<16x128xf32>
    %390 = arith.mulf %387, %389 : vector<16x128xf32>
    %391 = arith.truncf %390 : vector<16x128xf32> to vector<16x128xbf16>
    %c7_141 = arith.constant 7 : index
    %c0_142 = arith.constant 0 : index
    %c0_143 = arith.constant 0 : index
    %392 = vector.load %arg13[%c7_141, %c0_142, %c0_143] : memref<8x128x256xbf16, #tpu.memory_space<vmem>>, vector<1x128x256xbf16>
    %393 = vector.shape_cast %392 : vector<1x128x256xbf16> to vector<128x256xbf16>
    %cst_144 = arith.constant dense<0.000000e+00> : vector<16x256xf32>
    %394 = tpu.matmul %391, %393, %cst_144 {dimension_numbers = #tpu.dot_dimension_numbers<[1], [0], [0], [1], [0, 0, 1, 1], [], []>} : vector<16x128xbf16>, vector<128x256xbf16>, vector<16x256xf32> -> vector<16x256xf32>
    %395 = arith.addf %375, %394 : vector<16x256xf32>
    %c0_145 = arith.constant 0 : index
    %c0_146 = arith.constant 0 : index
    %396 = vector.load %arg14[%c0_145, %c0_146] : memref<16x256xf32, #tpu.memory_space<vmem>>, vector<16x256xf32>
    tpu.vector_store %arg14[%c0_145, %c0_146], %395 {strides = array<i32>} : memref<16x256xf32, #tpu.memory_space<vmem>>, vector<16x256xf32>,
    return
  }
  func.func @transform_0(%arg0: i32) -> (i32, i32) {
    %c0_i32 = arith.constant 0 : i32
    %c0_i32_0 = arith.constant 0 : i32
    %c0_i32_1 = arith.constant 0 : i32
    return %c0_i32, %c0_i32_0 : i32, i32
  }
  func.func @transform_1(%arg0: i32) -> (i32, i32) {
    %c0_i32 = arith.constant 0 : i32
    %c0_i32_0 = arith.constant 0 : i32
    %c0_i32_1 = arith.constant 0 : i32
    return %c0_i32, %c0_i32_0 : i32, i32
  }
  func.func @transform_2(%arg0: i32) -> (i32, i32) {
    %c0_i32 = arith.constant 0 : i32
    %c0_i32_0 = arith.constant 0 : i32
    %c0_i32_1 = arith.constant 0 : i32
    return %c0_i32, %c0_i32_0 : i32, i32
  }
  func.func @transform_3(%arg0: i32) -> (i32, i32) {
    %c0_i32 = arith.constant 0 : i32
    %c0_i32_0 = arith.constant 0 : i32
    %c0_i32_1 = arith.constant 0 : i32
    return %c0_i32, %c0_i32_0 : i32, i32
  }
  func.func @transform_4(%arg0: i32) -> (i32, i32) {
    %c0_i32 = arith.constant 0 : i32
    %c0_i32_0 = arith.constant 0 : i32
    %c0_i32_1 = arith.constant 0 : i32
    return %c0_i32, %c0_i32_0 : i32, i32
  }
  func.func @transform_5(%arg0: i32) -> (i32, i32) {
    %c0_i32 = arith.constant 0 : i32
    %c0_i32_0 = arith.constant 0 : i32
    %c0_i32_1 = arith.constant 0 : i32
    return %c0_i32, %c0_i32_0 : i32, i32
  }
  func.func @transform_6(%arg0: i32) -> (i32, i32) {
    %c0_i32 = arith.constant 0 : i32
    %c0_i32_0 = arith.constant 0 : i32
    %c0_i32_1 = arith.constant 0 : i32
    return %c0_i32, %c0_i32_0 : i32, i32
  }
  func.func @transform_7(%arg0: i32) -> (i32, i32) {
    %c0_i32 = arith.constant 0 : i32
    %c0_i32_0 = arith.constant 0 : i32
    %c0_i32_1 = arith.constant 0 : i32
    return %c0_i32, %c0_i32_0 : i32, i32
  }
  func.func @transform_8(%arg0: i32) -> (i32, i32) {
    %c0_i32 = arith.constant 0 : i32
    %c0_i32_0 = arith.constant 0 : i32
    %c0_i32_1 = arith.constant 0 : i32
    return %c0_i32, %c0_i32_0 : i32, i32
  }
  func.func @transform_9(%arg0: i32) -> (i32, i32) {
    %c0_i32 = arith.constant 0 : i32
    %c0_i32_0 = arith.constant 0 : i32
    %c0_i32_1 = arith.constant 0 : i32
    return %c0_i32, %c0_i32_0 : i32, i32
  }
  func.func @transform_10(%arg0: i32) -> (i32, i32) {
    %c0_i32 = arith.constant 0 : i32
    %c0_i32_0 = arith.constant 0 : i32
    %c0_i32_1 = arith.constant 0 : i32
    return %c0_i32, %c0_i32_0 : i32, i32
  }
  func.func @transform_11(%arg0: i32) -> (i32, i32, i32) {
    %c0_i32 = arith.constant 0 : i32
    %c0_i32_0 = arith.constant 0 : i32
    %c0_i32_1 = arith.constant 0 : i32
    %c0_i32_2 = arith.constant 0 : i32
    return %c0_i32, %c0_i32_0, %c0_i32_1 : i32, i32, i32
  }
  func.func @transform_12(%arg0: i32) -> (i32, i32, i32) {
    %c0_i32 = arith.constant 0 : i32
    %c0_i32_0 = arith.constant 0 : i32
    %c0_i32_1 = arith.constant 0 : i32
    %c0_i32_2 = arith.constant 0 : i32
    return %c0_i32, %c0_i32_0, %c0_i32_1 : i32, i32, i32
  }
  func.func @transform_13(%arg0: i32) -> (i32, i32) {
    %c0_i32 = arith.constant 0 : i32
    %c0_i32_0 = arith.constant 0 : i32
    %c0_i32_1 = arith.constant 0 : i32
    return %c0_i32, %c0_i32_0 : i32, i32
  }
}

</mosaic_0001>

<bundles_post_ra>
// kernel: neg.1
= control target key start
LH: loop header
LB: loop body
LE: loop exit
PB: predicated region body
PF: predicated region fallthrough
CT: control target
= control target key end

     0   :  { %s24_s0 = inlined_call_operand.vmem [shape: f32[8,64], index: 0, kind: input, shape index: {}]   ;;  %s25_s1 = inlined_call_operand.vmem [shape: f32[8,64], index: 1, kind: output, shape index: {}]  }
   0x1   :  { %v2_v0 = vld [vmem:[%s24_s0] sm:$0xff] }
   0x2   :  { %v5_v1 = vxor.u32 2147483648, %v2_v0 }
   0x4   :  { %7 = vst [vmem:[%s25_s1] sm:$0xff] %v5_v1 }

// kernel: transformer_block_forward.1
= control target key start
LH: loop header
LB: loop body
LE: loop exit
PB: predicated region body
PF: predicated region fallthrough
CT: control target
= control target key end

     0   :  { %s9894_s0 = inlined_call_operand.vmem [shape: f32[16,256], index: 0, kind: input, shape index: {}]   ;;  %s9895_s1 = inlined_call_operand.vmem [shape: f32[1,256], index: 1, kind: input, shape index: {}, may-alias: {1,9}]   ;;  %s9896_s2 = inlined_call_operand.vmem [shape: bf16[256,1024], index: 2, kind: input, shape index: {}]   ;;  %s9897_s3 = inlined_call_operand.vmem [shape: bf16[512,256], index: 3, kind: input, shape index: {}]   ;;  %s9898_s4 = inlined_call_operand.vmem [shape: f32[1,128], index: 4, kind: input, shape index: {}, may-alias: {4,5}]   ;;  %s9899_s5 = inlined_call_operand.vmem [shape: f32[1,128], index: 5, kind: input, shape index: {}, may-alias: {4,5}]   ;;  %s9900_s6 = inlined_call_operand.vmem [shape: f32[16,128], index: 6, kind: input, shape index: {}]   ;;  %s9901_s7 = inlined_call_operand.vmem [shape: f32[16,128], index: 7, kind: input, shape index: {}]   ;;  %s9902_s8 = inlined_call_operand.vmem [shape: f32[16,16], index: 8, kind: input, shape index: {}]   ;;  %s9903_s9 = inlined_call_operand.vmem [shape: f32[1,256], index: 9, kind: input, shape index: {}, may-alias: {1,9}]   ;;  %s9904_s10 = inlined_call_operand.vmem [shape: f32[256,8], index: 10, kind: input, shape index: {}]   ;;  %s9905_s11 = inlined_call_operand.vmem [shape: bf16[8,256,256], index: 11, kind: input, shape index: {}]   ;;  %s9906_s12 = inlined_call_operand.vmem [shape: bf16[8,128,256], index: 12, kind: input, shape index: {}]   ;;  %s9907_s13 = inlined_call_operand.hbm [shape: f32[16,256], index: 13, kind: output, shape index: {}]  }
   0x1   :  { %v46_v0 = vld [vmem:[%s9894_s0] sm:$0xff]  ;;  %v47_v1 = vld [vmem:[%s9894_s0 + $0x8] sm:$0xff]  ;;  %v48_v2 = vld [vmem:[%s9894_s0 + $0x10] sm:$0xff] }
   0x2   :  { %v50_v3 = vmul.f32 %v46_v0, %v46_v0  ;;  %v51_v4 = vmul.f32 %v47_v1, %v47_v1  ;;  %v49_v5 = vld [vmem:[%s9894_s0 + $0x18] sm:$0xff]  ;;  %v52_v6 = vmul.f32 %v48_v2, %v48_v2  ;;  %v89_v7 = vld [vmem:[%s9896_s2] sm:$0xff]  ;;  %v90_v11 = vld [vmem:[%s9896_s2 + $0x8] sm:$0xff] }
   0x3   :  { %v93_v8 = vld [vmem:[%s9896_s2 + $0x20] sm:$0xff]  ;;  %v53_v9 = vmul.f32 %v49_v5, %v49_v5  ;;  %v94_v12 = vld [vmem:[%s9896_s2 + $0x28] sm:$0xff] }
   0x4   :  { %v5556_v10 = vcombine.high %v89_v7, %v93_v8  ;;  %v5555_v13 = vcombine.low %v89_v7, %v93_v8  ;;  %v97_v14 = vld [vmem:[%s9896_s2 + $0x40] sm:$0xff]  ;;  %v54_v15 = vadd.f32 %v51_v4, %v50_v3  ;;  %v5558_v16 = vcombine.high %v90_v11, %v94_v12  ;;  %v98_v19 = vld [vmem:[%s9896_s2 + $0x48] sm:$0xff] }
   0x5   :  { %v5557_v17 = vcombine.low %v90_v11, %v94_v12  ;;  %v101_v18 = vld [vmem:[%s9896_s2 + $0x60] sm:$0xff]  ;;  %v102_v20 = vld [vmem:[%s9896_s2 + $0x68] sm:$0xff]  ;;  %v57_v26 = vadd.f32 %v53_v9, %v52_v6 }
   0x6   :  { %857 = vmatprep.subr.bf16.mxu0 %v5556_v10  ;;  %v5564_v21 = vcombine.high %v97_v14, %v101_v18  ;;  %v5566_v22 = vcombine.high %v98_v19, %v102_v20  ;;  %v105_v23 = vld [vmem:[%s9896_s2 + $0x80] sm:$0xff]  ;;  %v106_v25 = vld [vmem:[%s9896_s2 + $0x88] sm:$0xff]  ;;  %55 = vadd.xlane.f32.xlu0 %v54_v15  ;;  %v5563_v28 = vcombine.low %v97_v14, %v101_v18 }
   0x7   :  { %v109_v24 = vld [vmem:[%s9896_s2 + $0xa0] sm:$0xff]  ;;  %900 = vmatprep.subr.bf16.mxu1 %v5558_v16  ;;  %v110_v27 = vld [vmem:[%s9896_s2 + $0xa8] sm:$0xff]  ;;  %858 = vmatpush1.bf16.msra.mxu0 %v5555_v13  ;;  %v5565_v29 = vcombine.low %v98_v19, %v102_v20 }
   0x8   :  { %901 = vmatpush1.bf16.msra.mxu1 %v5557_v17  ;;  %859 = vmatprep.subr.bf16.mxu0 %v5564_v21  ;;  %v5572_v30 = vcombine.high %v105_v23, %v109_v24  ;;  %v5574_v31 = vcombine.high %v106_v25, %v110_v27  ;;  %v113_v32 = vld [vmem:[%s9896_s2 + $0xc0] sm:$0xff]  ;;  %v114_v34 = vld [vmem:[%s9896_s2 + $0xc8] sm:$0xff]  ;;  %v5571_v36 = vcombine.low %v105_v23, %v109_v24 }
   0x9   :  { %902 = vmatprep.subr.bf16.mxu1 %v5566_v22  ;;  %v117_v33 = vld [vmem:[%s9896_s2 + $0xe0] sm:$0xff]  ;;  %v118_v35 = vld [vmem:[%s9896_s2 + $0xe8] sm:$0xff]  ;;  %v5573_v37 = vcombine.low %v106_v25, %v110_v27 }
   0xa   :  { %58 = vadd.xlane.f32.xlu0 %v57_v26  ;;  %v5580_v38 = vcombine.high %v113_v32, %v117_v33  ;;  %v5582_v39 = vcombine.high %v114_v34, %v118_v35  ;;  %v121_v40 = vld [vmem:[%s9896_s2 + $0x100] sm:$0xff]  ;;  %v122_v42 = vld [vmem:[%s9896_s2 + $0x108] sm:$0xff]  ;;  %v5579_v44 = vcombine.low %v113_v32, %v117_v33  ;;  %v5581_v45 = vcombine.low %v114_v34, %v118_v35 }
   0xb   :  { %860 = vmatpush1.bf16.msra.mxu0 %v5563_v28  ;;  %v125_v41 = vld [vmem:[%s9896_s2 + $0x120] sm:$0xff]  ;;  %v126_v43 = vld [vmem:[%s9896_s2 + $0x128] sm:$0xff] }
   0xc   :  { %903 = vmatpush1.bf16.msra.mxu1 %v5565_v29  ;;  %861 = vmatprep.subr.bf16.mxu0 %v5572_v30  ;;  %v129_v46 = vld [vmem:[%s9896_s2 + $0x140] sm:$0xff]  ;;  %v130_v48 = vld [vmem:[%s9896_s2 + $0x148] sm:$0xff]  ;;  %v5588_v50 = vcombine.high %v121_v40, %v125_v41  ;;  %v5590_v51 = vcombine.high %v122_v42, %v126_v43  ;;  %v5587_v52 = vcombine.low %v121_v40, %v125_v41 }
   0xd   :  { %904 = vmatprep.subr.bf16.mxu1 %v5574_v31  ;;  %v133_v47 = vld [vmem:[%s9896_s2 + $0x160] sm:$0xff]  ;;  %v134_v49 = vld [vmem:[%s9896_s2 + $0x168] sm:$0xff]  ;;  %v5589_v53 = vcombine.low %v122_v42, %v126_v43 }
   0xe   :  { %v137_v54 = vld [vmem:[%s9896_s2 + $0x180] sm:$0xff]  ;;  %v138_v56 = vld [vmem:[%s9896_s2 + $0x188] sm:$0xff]  ;;  %v5596_v58 = vcombine.high %v129_v46, %v133_v47  ;;  %v5598_v59 = vcombine.high %v130_v48, %v134_v49  ;;  %v5595_v60 = vcombine.low %v129_v46, %v133_v47  ;;  %v5597_v61 = vcombine.low %v130_v48, %v134_v49  ;;  %v7767_v46 = vld [vmem:[%s9896_s2 + $0x38] sm:$0xff] }
   0xf   :  { %862 = vmatpush1.bf16.msra.mxu0 %v5571_v36  ;;  %v141_v55 = vld [vmem:[%s9896_s2 + $0x1a0] sm:$0xff]  ;;  %v142_v57 = vld [vmem:[%s9896_s2 + $0x1a8] sm:$0xff]  ;;  %v7740_v36 = vld [vmem:[%s9896_s2 + $0x10] sm:$0xff] }
  0x10   :  { %905 = vmatpush1.bf16.msra.mxu1 %v5573_v37  ;;  %863 = vmatprep.subr.bf16.mxu0 %v5580_v38  ;;  %v145_v62 = vld [vmem:[%s9896_s2 + $0x1c0] sm:$0xff]  ;;  %v146_v0 = vld [vmem:[%s9896_s2 + $0x1c8] sm:$0xff]  ;;  %v5604_v2 = vcombine.high %v137_v54, %v141_v55  ;;  %v5606_v3 = vcombine.high %v138_v56, %v142_v57  ;;  %v5603_v4 = vcombine.low %v137_v54, %v141_v55  ;;  %v7745_v37 = vld [vmem:[%s9896_s2 + $0x30] sm:$0xff] }
  0x11   :  { %906 = vmatprep.subr.bf16.mxu1 %v5582_v39  ;;  %v149_v63 = vld [vmem:[%s9896_s2 + $0x1e0] sm:$0xff]  ;;  %v150_v1 = vld [vmem:[%s9896_s2 + $0x1e8] sm:$0xff]  ;;  %v5605_v5 = vcombine.low %v138_v56, %v142_v57  ;;  %v7750_v38 = vld [vmem:[%s9896_s2 + $0x18] sm:$0xff]  ;;  %v5559_v48 = vcombine.low %v7740_v36, %v7745_v37 }
  0x12   :  { %v5612_v6 = vcombine.high %v145_v62, %v149_v63  ;;  %v5614_v7 = vcombine.high %v146_v0, %v150_v1  ;;  %v153_v8 = vld [vmem:[%s9896_s2 + $0x200] sm:$0xff]  ;;  %v154_v10 = vld [vmem:[%s9896_s2 + $0x208] sm:$0xff]  ;;  %v5611_v12 = vcombine.low %v145_v62, %v149_v63  ;;  %v5613_v13 = vcombine.low %v146_v0, %v150_v1 }
  0x13   :  { %864 = vmatpush1.bf16.msra.mxu0 %v5579_v44  ;;  %v157_v9 = vld [vmem:[%s9896_s2 + $0x220] sm:$0xff]  ;;  %v158_v11 = vld [vmem:[%s9896_s2 + $0x228] sm:$0xff]  ;;  %v5561_v49 = vcombine.low %v7750_v38, %v7767_v46 }
  0x14   :  { %907 = vmatpush1.bf16.msra.mxu1 %v5581_v45  ;;  %865 = vmatprep.subr.bf16.mxu0 %v5588_v50  ;;  %v161_v14 = vld [vmem:[%s9896_s2 + $0x240] sm:$0xff]  ;;  %v162_v16 = vld [vmem:[%s9896_s2 + $0x248] sm:$0xff]  ;;  %v5620_v18 = vcombine.high %v153_v8, %v157_v9  ;;  %v5622_v19 = vcombine.high %v154_v10, %v158_v11  ;;  %v5619_v20 = vcombine.low %v153_v8, %v157_v9 }
  0x15   :  { %908 = vmatprep.subr.bf16.mxu1 %v5590_v51  ;;  %v165_v15 = vld [vmem:[%s9896_s2 + $0x260] sm:$0xff]  ;;  %v166_v17 = vld [vmem:[%s9896_s2 + $0x268] sm:$0xff]  ;;  %v5621_v21 = vcombine.low %v154_v10, %v158_v11 }
  0x16   :  { %v169_v22 = vld [vmem:[%s9896_s2 + $0x280] sm:$0xff]  ;;  %v170_v24 = vld [vmem:[%s9896_s2 + $0x288] sm:$0xff]  ;;  %v5628_v26 = vcombine.high %v161_v14, %v165_v15  ;;  %v5630_v27 = vcombine.high %v162_v16, %v166_v17  ;;  %v5627_v30 = vcombine.low %v161_v14, %v165_v15  ;;  %v5629_v31 = vcombine.low %v162_v16, %v166_v17 }
  0x17   :  { %866 = vmatpush1.bf16.msra.mxu0 %v5587_v52  ;;  %v173_v23 = vld [vmem:[%s9896_s2 + $0x2a0] sm:$0xff]  ;;  %v174_v25 = vld [vmem:[%s9896_s2 + $0x2a8] sm:$0xff]  ;;  %v5560_v16 = vcombine.high %v7740_v36, %v7745_v37  ;;  %v5562_v17 = vcombine.high %v7750_v38, %v7767_v46  ;;  %v120_v36 = vld [vmem:[%s9896_s2 + $0xf8] sm:$0xff] }
  0x18   :  { %909 = vmatpush1.bf16.msra.mxu1 %v5589_v53  ;;  %867 = vmatprep.subr.bf16.mxu0 %v5596_v58  ;;  %v177_v28 = vld [vmem:[%s9896_s2 + $0x2c0] sm:$0xff]  ;;  %v178_v32 = vld [vmem:[%s9896_s2 + $0x2c8] sm:$0xff]  ;;  %v5636_v34 = vcombine.high %v169_v22, %v173_v23  ;;  %v5638_v35 = vcombine.high %v170_v24, %v174_v25  ;;  %v5635_v39 = vcombine.low %v169_v22, %v173_v23  ;;  %v73_v23 = vlaneseq }
  0x19   :  { %910 = vmatprep.subr.bf16.mxu1 %v5598_v59  ;;  %v181_v29 = vld [vmem:[%s9896_s2 + $0x2e0] sm:$0xff]  ;;  %v182_v33 = vld [vmem:[%s9896_s2 + $0x2e8] sm:$0xff]  ;;  %v5637_v40 = vcombine.low %v170_v24, %v174_v25 }
  0x1a   :  { %v5644_v41 = vcombine.high %v177_v28, %v181_v29  ;;  %v185_v42 = vld [vmem:[%s9896_s2 + $0x300] sm:$0xff]  ;;  %v186_v44 = vld [vmem:[%s9896_s2 + $0x308] sm:$0xff]  ;;  %v5646_v47 = vcombine.high %v178_v32, %v182_v33  ;;  %v5643_v50 = vcombine.low %v177_v28, %v181_v29  ;;  %v5645_v51 = vcombine.low %v178_v32, %v182_v33 }
  0x1b   :  { %868 = vmatpush1.bf16.msra.mxu0 %v5595_v60  ;;  %v189_v43 = vld [vmem:[%s9896_s2 + $0x320] sm:$0xff]  ;;  %v190_v45 = vld [vmem:[%s9896_s2 + $0x328] sm:$0xff]  ;;  %v7814_v25 = vshrl.u32 %v73_v23, 7 }
  0x1c   :  { %911 = vmatpush1.bf16.msra.mxu1 %v5597_v61  ;;  %869 = vmatprep.subr.bf16.mxu0 %v5604_v2  ;;  %v193_v52 = vld [vmem:[%s9896_s2 + $0x340] sm:$0xff]  ;;  %v194_v54 = vld [vmem:[%s9896_s2 + $0x348] sm:$0xff]  ;;  %v5652_v55 = vcombine.high %v185_v42, %v189_v43  ;;  %v5654_v56 = vcombine.high %v186_v44, %v190_v45  ;;  %v5651_v58 = vcombine.low %v185_v42, %v189_v43  ;;  %v7470_v42 = vld [vmem:[%s9894_s0 + $0x10] sm:$0xff] }
  0x1d   :  { %912 = vmatprep.subr.bf16.mxu1 %v5606_v3  ;;  %v197_v53 = vld [vmem:[%s9896_s2 + $0x360] sm:$0xff]  ;;  %v198_v57 = vld [vmem:[%s9896_s2 + $0x368] sm:$0xff]  ;;  %v5653_v59 = vcombine.low %v186_v44, %v190_v45  ;;  %v75_v28 = vsub.s32 0, %v7814_v25  ;;  %v99_v44 = vld [vmem:[%s9896_s2 + $0x50] sm:$0xff] }
  0x1e   :  { %v201_v60 = vld [vmem:[%s9896_s2 + $0x380] sm:$0xff]  ;;  %v202_v62 = vld [vmem:[%s9896_s2 + $0x388] sm:$0xff]  ;;  %v5660_v63 = vcombine.high %v193_v52, %v197_v53  ;;  %v5662_v0 = vcombine.high %v194_v54, %v198_v57  ;;  %v5659_v2 = vcombine.low %v193_v52, %v197_v53  ;;  %v5661_v3 = vcombine.low %v194_v54, %v198_v57  ;;  %v103_v45 = vld [vmem:[%s9896_s2 + $0x70] sm:$0xff] }
  0x1f   :  { %870 = vmatpush1.bf16.msra.mxu0 %v5603_v4  ;;  %v205_v61 = vld [vmem:[%s9896_s2 + $0x3a0] sm:$0xff]  ;;  %v206_v1 = vld [vmem:[%s9896_s2 + $0x3a8] sm:$0xff]  ;;  %v107_v57 = vld [vmem:[%s9896_s2 + $0x90] sm:$0xff] }
  0x20   :  { %913 = vmatpush1.bf16.msra.mxu1 %v5605_v5  ;;  %871 = vmatprep.subr.bf16.mxu0 %v5612_v6  ;;  %v209_v4 = vld [vmem:[%s9896_s2 + $0x3c0] sm:$0xff]  ;;  %v210_v6 = vld [vmem:[%s9896_s2 + $0x3c8] sm:$0xff]  ;;  %v5670_v8 = vcombine.high %v202_v62, %v206_v1  ;;  %v5667_v10 = vcombine.low %v201_v60, %v205_v61  ;;  %v5669_v11 = vcombine.low %v202_v62, %v206_v1  ;;  %v115_v1 = vld [vmem:[%s9896_s2 + $0xd0] sm:$0xff] }
  0x21   :  { %914 = vmatprep.subr.bf16.mxu1 %v5614_v7  ;;  %v213_v5 = vld [vmem:[%s9896_s2 + $0x3e0] sm:$0xff]  ;;  %v5668_v7 = vcombine.high %v201_v60, %v205_v61  ;;  %v214_v9 = vld [vmem:[%s9896_s2 + $0x3e8] sm:$0xff]  ;;  %v112_v60 = vld [vmem:[%s9896_s2 + $0xb8] sm:$0xff]  ;;  %v5568_v61 = vcombine.high %v99_v44, %v103_v45 }
  0x22   :  { %v5675_v14 = vcombine.low %v209_v4, %v213_v5  ;;  %v5677_v15 = vcombine.low %v210_v6, %v214_v9  ;;  %v7468_v33 = vld [vmem:[%s9894_s0] sm:$0xff] }
  0x23   :  { %872 = vmatpush1.bf16.msra.mxu0 %v5611_v12  ;;  %v5676_v12 = vcombine.high %v209_v4, %v213_v5  ;;  %v127_v4 = vld [vmem:[%s9896_s2 + $0x130] sm:$0xff]  ;;  %v124_v5 = vld [vmem:[%s9896_s2 + $0x118] sm:$0xff] }
  0x24   :  { %915 = vmatpush1.bf16.msra.mxu1 %v5613_v13  ;;  %873 = vmatprep.subr.bf16.mxu0 %v5620_v18  ;;  %v5678_v13 = vcombine.high %v210_v6, %v214_v9  ;;  %v128_v6 = vld [vmem:[%s9896_s2 + $0x138] sm:$0xff] }
  0x25   :  { %916 = vmatprep.subr.bf16.mxu1 %v5622_v19 }
  0x27   :  { %874 = vmatpush1.bf16.msra.mxu0 %v5619_v20 }
  0x28   :  { %917 = vmatpush1.bf16.msra.mxu1 %v5621_v21  ;;  %875 = vmatprep.subr.bf16.mxu0 %v5628_v26  ;;  %v71_v26 = vld [vmem:[%s9895_s1] sm:$0x3] }
  0x29   :  { %918 = vmatprep.subr.bf16.mxu1 %v5630_v27  ;;  %v79_v27 = vsub.s32 1, %v7814_v25 }
  0x2b   :  { %876 = vmatpush1.bf16.msra.mxu0 %v5627_v30  ;;  %v7467_v30 = vld [vmem:[%s9894_s0 + $0x8] sm:$0xff]  ;;  %v80_v32 = vrot.slane %v71_v26, %v79_v27 }
  0x2c   :  { %919 = vmatpush1.bf16.msra.mxu1 %v5629_v31  ;;  %877 = vmatprep.subr.bf16.mxu0 %v5636_v34 }
  0x2d   :  { %920 = vmatprep.subr.bf16.mxu1 %v5638_v35  ;;  %v76_v35 = vrot.slane %v71_v26, %v75_v28 }
  0x2f   :  { %878 = vmatpush1.bf16.msra.mxu0 %v5635_v39 }
  0x30   :  { %921 = vmatpush1.bf16.msra.mxu1 %v5637_v40  ;;  %879 = vmatprep.subr.bf16.mxu0 %v5644_v41  ;;  %v7469_v40 = vld [vmem:[%s9894_s0 + $0x18] sm:$0xff] }
  0x31   :  { %922 = vmatprep.subr.bf16.mxu1 %v5646_v47  ;;  %v100_v47 = vld [vmem:[%s9896_s2 + $0x58] sm:$0xff] }
  0x33   :  { %880 = vmatpush1.bf16.msra.mxu0 %v5643_v50  ;;  %v104_v50 = vld [vmem:[%s9896_s2 + $0x78] sm:$0xff] }
  0x34   :  { %923 = vmatpush1.bf16.msra.mxu1 %v5645_v51  ;;  %881 = vmatprep.subr.bf16.mxu0 %v5652_v55  ;;  %v5570_v62 = vcombine.high %v100_v47, %v104_v50 }
  0x35   :  { %924 = vmatprep.subr.bf16.mxu1 %v5654_v56 }
  0x37   :  { %882 = vmatpush1.bf16.msra.mxu0 %v5651_v58  ;;  %v111_v58 = vld [vmem:[%s9896_s2 + $0xb0] sm:$0xff] }
  0x38   :  { %925 = vmatpush1.bf16.msra.mxu1 %v5653_v59  ;;  %883 = vmatprep.subr.bf16.mxu0 %v5660_v63  ;;  %v108_v59 = vld [vmem:[%s9896_s2 + $0x98] sm:$0xff]  ;;  %v5567_v63 = vcombine.low %v99_v44, %v103_v45  ;;  %v5576_v37 = vcombine.high %v107_v57, %v111_v58  ;;  %v5575_v46 = vcombine.low %v107_v57, %v111_v58 }
  0x39   :  { %926 = vmatprep.subr.bf16.mxu1 %v5662_v0  ;;  %v5569_v0 = vcombine.low %v100_v47, %v104_v50  ;;  %v5578_v38 = vcombine.high %v108_v59, %v112_v60 }
  0x3b   :  { %884 = vmatpush1.bf16.msra.mxu0 %v5659_v2  ;;  %v119_v2 = vld [vmem:[%s9896_s2 + $0xf0] sm:$0xff] }
  0x3c   :  { %927 = vmatpush1.bf16.msra.mxu1 %v5661_v3  ;;  %885 = vmatprep.subr.bf16.mxu0 %v5668_v7  ;;  %v116_v3 = vld [vmem:[%s9896_s2 + $0xd8] sm:$0xff]  ;;  %v5584_v7 = vcombine.high %v115_v1, %v119_v2  ;;  %v5583_v9 = vcombine.low %v115_v1, %v119_v2 }
  0x3d   :  { %928 = vmatprep.subr.bf16.mxu1 %v5670_v8  ;;  %v5586_v8 = vcombine.high %v116_v3, %v120_v36 }
  0x3f   :  { %886 = vmatpush1.bf16.msra.mxu0 %v5667_v10  ;;  %v5585_v10 = vcombine.low %v116_v3, %v120_v36 }
  0x40   :  { %929 = vmatpush1.bf16.msra.mxu1 %v5669_v11  ;;  %887 = vmatprep.subr.bf16.mxu0 %v5676_v12  ;;  %v131_v11 = vld [vmem:[%s9896_s2 + $0x150] sm:$0xff] }
  0x41   :  { %930 = vmatprep.subr.bf16.mxu1 %v5678_v13  ;;  %v135_v12 = vld [vmem:[%s9896_s2 + $0x170] sm:$0xff]  ;;  %v132_v13 = vld [vmem:[%s9896_s2 + $0x158] sm:$0xff] }
  0x43   :  { %888 = vmatpush1.bf16.msra.mxu0 %v5675_v14  ;;  %v136_v14 = vld [vmem:[%s9896_s2 + $0x178] sm:$0xff] }
  0x44   :  { %931 = vmatpush1.bf16.msra.mxu1 %v5677_v15  ;;  %943 = vmatprep.subr.bf16.mxu0 %v5560_v16  ;;  %v5594_v16 = vcombine.high %v124_v5, %v128_v6  ;;  %v5602_v26 = vcombine.high %v132_v13, %v136_v14 }
  0x45   :  { %986 = vmatprep.subr.bf16.mxu1 %v5562_v17 }
  0x93   :  { %v56_v18 = vpop.xlane.xlu0 %55 }
  0x94   :  { %v61_v19 = vmul.f32 0.00390625, %v56_v18  ;;  %v5593_v18 = vcombine.low %v124_v5, %v128_v6 }
  0x96   :  { %v63_v20 = vadd.f32 1e-06, %v61_v19  ;;  %v139_v19 = vld [vmem:[%s9896_s2 + $0x190] sm:$0xff] }
  0x97   :  { %v59_v21 = vpop.xlane.xlu0 %58 }
  0x98   :  { %7327 = vrsqrt.f32 %v63_v20  ;;  %v62_v22 = vmul.f32 0.00390625, %v59_v21  ;;  %v143_v20 = vld [vmem:[%s9896_s2 + $0x1b0] sm:$0xff]  ;;  %v140_v21 = vld [vmem:[%s9896_s2 + $0x198] sm:$0xff] }
  0x9a   :  { %v64_v24 = vadd.f32 1e-06, %v62_v22  ;;  %v144_v22 = vld [vmem:[%s9896_s2 + $0x1b8] sm:$0xff] }
  0x9c   :  { %7329 = vrsqrt.f32 %v64_v24  ;;  %v5600_v24 = vcombine.high %v131_v11, %v135_v12 }
  0xa2   :  { %v7328_v29 = vpop.eup %7327 }
  0xa3   :  { %v68_v31 = vmul.f32 %v7467_v30, %v7328_v29  ;;  %v67_v34 = vmul.f32 %v7468_v33, %v7328_v29  ;;  %v5599_v29 = vcombine.low %v131_v11, %v135_v12  ;;  %v5601_v30 = vcombine.low %v132_v13, %v136_v14  ;;  %v148_v33 = vld [vmem:[%s9896_s2 + $0x1d8] sm:$0xff] }
  0xa5   :  { %v84_v51 = vmul.f32 %v80_v32, %v68_v31  ;;  %v83_v53 = vmul.f32 %v76_v35, %v67_v34  ;;  %v147_v31 = vld [vmem:[%s9896_s2 + $0x1d0] sm:$0xff]  ;;  %v152_v34 = vld [vmem:[%s9896_s2 + $0x1f8] sm:$0xff] }
  0xa6   :  { %v7330_v39 = vpop.eup %7329 }
  0xa7   :  { %v70_v41 = vmul.f32 %v7469_v40, %v7330_v39  ;;  %v69_v43 = vmul.f32 %v7470_v42, %v7330_v39  ;;  %v5610_v39 = vcombine.high %v140_v21, %v144_v22 }
  0xa9   :  { %v86_v52 = vmul.f32 %v80_v32, %v70_v41  ;;  %v85_v54 = vmul.f32 %v76_v35, %v69_v43  ;;  %v151_v32 = vld [vmem:[%s9896_s2 + $0x1f0] sm:$0xff]  ;;  %v5608_v35 = vcombine.high %v139_v19, %v143_v20 }
  0xab   :  { %v88_v55 = vpack.c.bf16 %v86_v52, %v84_v51  ;;  %v7849_v56 = vpack.c.bf16 %v85_v54, %v83_v53 }
  0xad   :  { %889 = vmatprep.mubr.bf16.mxu0 %v88_v55  ;;  %932 = vmatprep.mubr.bf16.mxu1 %v88_v55 }
  0xae   :  { %890 = vmatmul.mubr.bf16.vlgmr.msra.gmra.mrb[0].mxu0 %v7849_v56  ;;  %933 = vmatmul.mubr.bf16.vlgmr.msra.gmra.mrb[0].mxu1 %v7849_v56 }
  0xaf   :  { %944 = vmatpush1.bf16.msra.mxu0 %v5559_v48  ;;  %987 = vmatpush1.bf16.msra.mxu1 %v5561_v49  ;;  %v5577_v48 = vcombine.low %v108_v59, %v112_v60  ;;  %v123_v49 = vld [vmem:[%s9896_s2 + $0x110] sm:$0xff] }
  0xb0   :  { %975 = vmatprep.mubr.bf16.mxu0 %v88_v55  ;;  %1018 = vmatprep.mubr.bf16.mxu1 %v88_v55  ;;  %v5592_v15 = vcombine.high %v123_v49, %v127_v4  ;;  %v5591_v17 = vcombine.low %v123_v49, %v127_v4 }
  0xb1   :  { %945 = vmatprep.subr.bf16.mxu0 %v5568_v61  ;;  %988 = vmatprep.subr.bf16.mxu1 %v5570_v62 }
  0xb3   :  { %946 = vmatpush1.bf16.msra.mxu0 %v5567_v63  ;;  %989 = vmatpush1.bf16.msra.mxu1 %v5569_v0 }
  0xb4   :  { %947 = vmatprep.subr.bf16.mxu0 %v5576_v37  ;;  %990 = vmatprep.subr.bf16.mxu1 %v5578_v38 }
  0xb7   :  { %948 = vmatpush1.bf16.msra.mxu0 %v5575_v46  ;;  %991 = vmatpush1.bf16.msra.mxu1 %v5577_v48 }
  0xb8   :  { %949 = vmatprep.subr.bf16.mxu0 %v5584_v7  ;;  %992 = vmatprep.subr.bf16.mxu1 %v5586_v8 }
  0xbb   :  { %950 = vmatpush1.bf16.msra.mxu0 %v5583_v9  ;;  %993 = vmatpush1.bf16.msra.mxu1 %v5585_v10 }
  0xbc   :  { %951 = vmatprep.subr.bf16.mxu0 %v5592_v15  ;;  %994 = vmatprep.subr.bf16.mxu1 %v5594_v16 }
  0xbf   :  { %952 = vmatpush1.bf16.msra.mxu0 %v5591_v17  ;;  %995 = vmatpush1.bf16.msra.mxu1 %v5593_v18 }
  0xc0   :  { %953 = vmatprep.subr.bf16.mxu0 %v5600_v24  ;;  %996 = vmatprep.subr.bf16.mxu1 %v5602_v26 }
  0xc1   :  { %18 = vsyncpa [#allocation3], 0  ;;  %v5607_v40 = vcombine.low %v139_v19, %v143_v20  ;;  %v5609_v41 = vcombine.low %v140_v21, %v144_v22  ;;  %v5616_v42 = vcombine.high %v147_v31, %v151_v32  ;;  %v5618_v43 = vcombine.high %v148_v33, %v152_v34  ;;  %v155_v44 = vld [vmem:[%s9896_s2 + $0x210] sm:$0xff]  ;;  %v156_v47 = vld [vmem:[%s9896_s2 + $0x218] sm:$0xff]  ;;  %s7499_s21 = smov 64  }
  0xc2   :  { %v159_v45 = vld [vmem:[%s9896_s2 + $0x230] sm:$0xff]  ;;  %v160_v50 = vld [vmem:[%s9896_s2 + $0x238] sm:$0xff]  ;;  %v5615_v51 = vcombine.low %v147_v31, %v151_v32  ;;  %v5617_v52 = vcombine.low %v148_v33, %v152_v34  ;;  %vm1189_vm0 = vcmask 130048   ;;  %vm2154_vm1 = vcmask 64512  }
  0xc3   :  { %954 = vmatpush1.bf16.msra.mxu0 %v5599_v29  ;;  %997 = vmatpush1.bf16.msra.mxu1 %v5601_v30  ;;  %v5624_v53 = vcombine.high %v155_v44, %v159_v45  ;;  %v5626_v54 = vcombine.high %v156_v47, %v160_v50  ;;  %v163_v55 = vld [vmem:[%s9896_s2 + $0x250] sm:$0xff]  ;;  %v164_v58 = vld [vmem:[%s9896_s2 + $0x258] sm:$0xff]  ;;  %v5623_v60 = vcombine.low %v155_v44, %v159_v45 }
  0xc4   :  { %955 = vmatprep.subr.bf16.mxu0 %v5608_v35  ;;  %998 = vmatprep.subr.bf16.mxu1 %v5610_v39  ;;  %v167_v57 = vld [vmem:[%s9896_s2 + $0x270] sm:$0xff]  ;;  %v168_v59 = vld [vmem:[%s9896_s2 + $0x278] sm:$0xff]  ;;  %v5625_v61 = vcombine.low %v156_v47, %v160_v50 }
  0xc5   :  { %v5632_v62 = vcombine.high %v163_v55, %v167_v57  ;;  %v5634_v63 = vcombine.high %v164_v58, %v168_v59  ;;  %v171_v0 = vld [vmem:[%s9896_s2 + $0x290] sm:$0xff]  ;;  %v172_v2 = vld [vmem:[%s9896_s2 + $0x298] sm:$0xff]  ;;  %v5631_v36 = vcombine.low %v163_v55, %v167_v57  ;;  %v5633_v37 = vcombine.low %v164_v58, %v168_v59 }
  0xc6   :  { %v175_v1 = vld [vmem:[%s9896_s2 + $0x2b0] sm:$0xff]  ;;  %v176_v3 = vld [vmem:[%s9896_s2 + $0x2b8] sm:$0xff] }
  0xc7   :  { %956 = vmatpush1.bf16.msra.mxu0 %v5607_v40  ;;  %999 = vmatpush1.bf16.msra.mxu1 %v5609_v41  ;;  %v5640_v38 = vcombine.high %v171_v0, %v175_v1  ;;  %v5642_v46 = vcombine.high %v172_v2, %v176_v3  ;;  %v179_v48 = vld [vmem:[%s9896_s2 + $0x2d0] sm:$0xff]  ;;  %v180_v4 = vld [vmem:[%s9896_s2 + $0x2d8] sm:$0xff]  ;;  %v5639_v6 = vcombine.low %v171_v0, %v175_v1 }
  0xc8   :  { %957 = vmatprep.subr.bf16.mxu0 %v5616_v42  ;;  %1000 = vmatprep.subr.bf16.mxu1 %v5618_v43  ;;  %v183_v49 = vld [vmem:[%s9896_s2 + $0x2f0] sm:$0xff]  ;;  %v184_v5 = vld [vmem:[%s9896_s2 + $0x2f8] sm:$0xff]  ;;  %v5641_v7 = vcombine.low %v172_v2, %v176_v3 }
  0xc9   :  { %v5648_v8 = vcombine.high %v179_v48, %v183_v49  ;;  %v5650_v9 = vcombine.high %v180_v4, %v184_v5  ;;  %v187_v10 = vld [vmem:[%s9896_s2 + $0x310] sm:$0xff]  ;;  %v188_v12 = vld [vmem:[%s9896_s2 + $0x318] sm:$0xff]  ;;  %v5647_v14 = vcombine.low %v179_v48, %v183_v49  ;;  %v5649_v15 = vcombine.low %v180_v4, %v184_v5 }
  0xca   :  { %v191_v11 = vld [vmem:[%s9896_s2 + $0x330] sm:$0xff]  ;;  %v192_v13 = vld [vmem:[%s9896_s2 + $0x338] sm:$0xff] }
  0xcb   :  { %958 = vmatpush1.bf16.msra.mxu0 %v5615_v51  ;;  %1001 = vmatpush1.bf16.msra.mxu1 %v5617_v52  ;;  %v5656_v16 = vcombine.high %v187_v10, %v191_v11  ;;  %v5658_v17 = vcombine.high %v188_v12, %v192_v13  ;;  %v195_v18 = vld [vmem:[%s9896_s2 + $0x350] sm:$0xff]  ;;  %v196_v20 = vld [vmem:[%s9896_s2 + $0x358] sm:$0xff]  ;;  %v5655_v22 = vcombine.low %v187_v10, %v191_v11 }
  0xcc   :  { %959 = vmatprep.subr.bf16.mxu0 %v5624_v53  ;;  %1002 = vmatprep.subr.bf16.mxu1 %v5626_v54  ;;  %v199_v19 = vld [vmem:[%s9896_s2 + $0x370] sm:$0xff]  ;;  %v200_v21 = vld [vmem:[%s9896_s2 + $0x378] sm:$0xff]  ;;  %v5657_v24 = vcombine.low %v188_v12, %v192_v13  ;;  %v8060_v12 = vld [vmem:[%s9898_s4] ss:$0 sm:$0xff] }
  0xcd   :  { %v5664_v26 = vcombine.high %v195_v18, %v199_v19  ;;  %v5666_v29 = vcombine.high %v196_v20, %v200_v21  ;;  %v203_v30 = vld [vmem:[%s9896_s2 + $0x390] sm:$0xff]  ;;  %v204_v32 = vld [vmem:[%s9896_s2 + $0x398] sm:$0xff]  ;;  %v5663_v34 = vcombine.low %v195_v18, %v199_v19  ;;  %v5665_v35 = vcombine.low %v196_v20, %v200_v21 }
  0xce   :  { %v207_v31 = vld [vmem:[%s9896_s2 + $0x3b0] sm:$0xff]  ;;  %v208_v33 = vld [vmem:[%s9896_s2 + $0x3b8] sm:$0xff] }
  0xcf   :  { %960 = vmatpush1.bf16.msra.mxu0 %v5623_v60  ;;  %1003 = vmatpush1.bf16.msra.mxu1 %v5625_v61  ;;  %v5672_v39 = vcombine.high %v203_v30, %v207_v31  ;;  %v5674_v40 = vcombine.high %v204_v32, %v208_v33  ;;  %v211_v41 = vld [vmem:[%s9896_s2 + $0x3d0] sm:$0xff]  ;;  %v212_v43 = vld [vmem:[%s9896_s2 + $0x3d8] sm:$0xff]  ;;  %v5671_v45 = vcombine.low %v203_v30, %v207_v31 }
  0xd0   :  { %961 = vmatprep.subr.bf16.mxu0 %v5632_v62  ;;  %1004 = vmatprep.subr.bf16.mxu1 %v5634_v63  ;;  %v215_v42 = vld [vmem:[%s9896_s2 + $0x3f0] sm:$0xff]  ;;  %v216_v44 = vld [vmem:[%s9896_s2 + $0x3f8] sm:$0xff]  ;;  %v5673_v47 = vcombine.low %v204_v32, %v208_v33 }
  0xd1   :  { %v5680_v50 = vcombine.high %v211_v41, %v215_v42  ;;  %v5682_v51 = vcombine.high %v212_v43, %v216_v44  ;;  %v5679_v52 = vcombine.low %v211_v41, %v215_v42  ;;  %v5681_v53 = vcombine.low %v212_v43, %v216_v44  ;;  %v6804_v25 = vld [vmem:[%s9905_s11 + $0x14] ss:$8 sps:$4 sm:$0xff]  }
  0xd3   :  { %962 = vmatpush1.bf16.msra.mxu0 %v5631_v36  ;;  %1005 = vmatpush1.bf16.msra.mxu1 %v5633_v37 }
  0xd4   :  { %963 = vmatprep.subr.bf16.mxu0 %v5640_v38  ;;  %1006 = vmatprep.subr.bf16.mxu1 %v5642_v46 }
  0xd7   :  { %964 = vmatpush1.bf16.msra.mxu0 %v5639_v6  ;;  %1007 = vmatpush1.bf16.msra.mxu1 %v5641_v7 }
  0xd8   :  { %965 = vmatprep.subr.bf16.mxu0 %v5648_v8  ;;  %1008 = vmatprep.subr.bf16.mxu1 %v5650_v9 }
  0xdb   :  { %966 = vmatpush1.bf16.msra.mxu0 %v5647_v14  ;;  %1009 = vmatpush1.bf16.msra.mxu1 %v5649_v15 }
  0xdc   :  { %967 = vmatprep.subr.bf16.mxu0 %v5656_v16  ;;  %1010 = vmatprep.subr.bf16.mxu1 %v5658_v17 }
  0xdf   :  { %968 = vmatpush1.bf16.msra.mxu0 %v5655_v22  ;;  %1011 = vmatpush1.bf16.msra.mxu1 %v5657_v24 }
  0xe0   :  { %969 = vmatprep.subr.bf16.mxu0 %v5664_v26  ;;  %1012 = vmatprep.subr.bf16.mxu1 %v5666_v29 }
  0xe3   :  { %970 = vmatpush1.bf16.msra.mxu0 %v5663_v34  ;;  %1013 = vmatpush1.bf16.msra.mxu1 %v5665_v35 }
  0xe4   :  { %971 = vmatprep.subr.bf16.mxu0 %v5672_v39  ;;  %1014 = vmatprep.subr.bf16.mxu1 %v5674_v40  ;;  %v8067_v39 = vld [vmem:[%s9899_s5] ss:$0 sm:$0xff] }
  0xe7   :  { %972 = vmatpush1.bf16.msra.mxu0 %v5671_v45  ;;  %1015 = vmatpush1.bf16.msra.mxu1 %v5673_v47 }
  0xe8   :  { %973 = vmatprep.subr.bf16.mxu0 %v5680_v50  ;;  %1016 = vmatprep.subr.bf16.mxu1 %v5682_v51 }
  0xeb   :  { %974 = vmatpush1.bf16.msra.mxu0 %v5679_v52  ;;  %1017 = vmatpush1.bf16.msra.mxu1 %v5681_v53 }
  0xee   :  { %976 = vmatmul.mubr.bf16.vlgmr.msra.gmra.mrb[4].mxu0 %v7849_v56  ;;  %1019 = vmatmul.mubr.bf16.vlgmr.msra.gmra.mrb[4].mxu1 %v7849_v56 }
 0x181   :  { %v891_v54 = vpop.f32.mrb[0].mxu0  ;;  %v8029_v55 = vpop.f32.mrb[0].mxu1 }
 0x182   :  { %v8031_v57 = vpop.f32.mrb[1].mxu0  ;;  %v8033_v58 = vpop.f32.mrb[1].mxu1  ;;  %v1072_v59 = vmul.f32 %v891_v54, %v891_v54 }
 0x183   :  { %v8035_v60 = vpop.f32.mrb[2].mxu0  ;;  %v8037_v61 = vpop.f32.mrb[2].mxu1  ;;  %v1104_v56 = vmul.f32 %v8031_v57, %v8031_v57 }
 0x184   :  { %v8039_v62 = vpop.f32.mrb[3].mxu1  ;;  %1074 = vadd.xlane.f32.xlu0 %v1072_v59  ;;  %v8041_v63 = vpop.f32.mrb[3].mxu0  ;;  %v1073_v6 = vmul.f32 %v8035_v60, %v8035_v60 }
 0x185   :  { %v1105_v7 = vmul.f32 %v8041_v63, %v8041_v63 }
 0x188   :  { %1106 = vadd.xlane.f32.xlu0 %v1104_v56 }
 0x1c1   :  { %v977_v0 = vpop.f32.mrb[4].mxu0  ;;  %v1020_v1 = vpop.f32.mrb[4].mxu1 }
 0x1c2   :  { %v8045_v2 = vpop.f32.mrb[5].mxu0  ;;  %v1022_v3 = vpop.f32.mrb[5].mxu1  ;;  %v1036_v36 = vmul.f32 %v977_v0, %v977_v0 }
 0x1c3   :  { %v981_v37 = vpop.f32.mrb[6].mxu0  ;;  %v1024_v38 = vpop.f32.mrb[6].mxu1 }
 0x1c4   :  { %v8047_v46 = vpack.c.bf16 %v1024_v38, %v1020_v1  ;;  %v1026_v48 = vpop.f32.mrb[7].mxu1  ;;  %1038 = vadd.xlane.f32.xlu1 %v1036_v36  ;;  %v8049_v49 = vpop.f32.mrb[7].mxu0  ;;  %v1037_v5 = vmul.f32 %v981_v37, %v981_v37 }
 0x1c5   :  { %v8051_v4 = vpack.c.bf16 %v1026_v48, %v1022_v3  ;;  %v8101_v3 = vld [vmem:[%s9900_s6] sm:$0xff] }
 0x1c8   :  { %1040 = vadd.xlane.f32.xlu1 %v1037_v5 }
 0x1cc   :  { %1076 = vadd.xlane.f32.xlu1 %v1073_v6 }
 0x1d0   :  { %1108 = vadd.xlane.f32.xlu1 %v1105_v7 }
 0x211   :  { %v1075_v8 = vpop.xlane.xlu0 %1074 }
 0x212   :  { %v1078_v9 = vmul.f32 0.0078125, %v1075_v8 }
 0x214   :  { %v1080_v10 = vadd.f32 1e-06, %v1078_v9 }
 0x215   :  { %v1107_v15 = vpop.xlane.xlu0 %1106 }
 0x216   :  { %7331 = vrsqrt.f32 %v1080_v10  ;;  %v1110_v16 = vmul.f32 0.0078125, %v1107_v15 }
 0x218   :  { %v1112_v17 = vadd.f32 1e-06, %v1110_v16 }
 0x21a   :  { %7333 = vrsqrt.f32 %v1112_v17 }
 0x220   :  { %v7332_v11 = vpop.eup %7331 }
 0x221   :  { %v1084_v13 = vmul.f32 %v7332_v11, %v891_v54 }
 0x223   :  { %v1092_v14 = vmul.f32 %v8060_v12, %v1084_v13 }
 0x224   :  { %v7334_v33 = vpop.eup %7333 }
 0x225   :  { %1096 = vrot.lane.b32.xlu1 %v1092_v14, %s7499_s21  ;;  %v1116_v42 = vmul.f32 %v7334_v33, %v8031_v57  ;;  %v1094_v10 = vmul.f32 %v1092_v14, %v8101_v3 }
 0x227   :  { %v1118_v45 = vmul.f32 %v8060_v12, %v1116_v42 }
 0x251   :  { %v1039_v18 = vpop.xlane.xlu1 %1038 }
 0x252   :  { %v1043_v19 = vmul.f32 0.0078125, %v1039_v18 }
 0x254   :  { %v1045_v20 = vadd.f32 1e-06, %v1043_v19 }
 0x255   :  { %v1041_v21 = vpop.xlane.xlu1 %1040 }
 0x256   :  { %7335 = vrsqrt.f32 %v1045_v20  ;;  %v1044_v22 = vmul.f32 0.0078125, %v1041_v21  ;;  %v1120_v20 = vmul.f32 %v1118_v45, %v8101_v3 }
 0x258   :  { %v1046_v24 = vadd.f32 1e-06, %v1044_v22 }
 0x259   :  { %v1077_v26 = vpop.xlane.xlu1 %1076 }
 0x25a   :  { %7337 = vrsqrt.f32 %v1046_v24  ;;  %v1079_v29 = vmul.f32 0.0078125, %v1077_v26 }
 0x25c   :  { %v1081_v30 = vadd.f32 1e-06, %v1079_v29 }
 0x25d   :  { %v1109_v31 = vpop.xlane.xlu1 %1108 }
 0x25e   :  { %7339 = vrsqrt.f32 %v1081_v30  ;;  %v1111_v32 = vmul.f32 0.0078125, %v1109_v31 }
 0x260   :  { %v7336_v34 = vpop.eup %7335  ;;  %v1113_v35 = vadd.f32 1e-06, %v1111_v32  ;;  %v8119_v32 = vld [vmem:[%s9902_s8] sm:$0xff] }
 0x261   :  { %v1049_v40 = vmul.f32 %v7336_v34, %v977_v0  ;;  %v8085_v0 = vld [vmem:[%s9901_s7] sm:$0xff] }
 0x262   :  { %7341 = vrsqrt.f32 %v1113_v35 }
 0x263   :  { %v1057_v41 = vmul.f32 %v8067_v39, %v1049_v40 }
 0x264   :  { %v7338_v43 = vpop.eup %7337 }
 0x265   :  { %1061 = vrot.lane.b32.xlu0 %v1057_v41, %s7499_s21  ;;  %v1050_v44 = vmul.f32 %v7338_v43, %v981_v37  ;;  %v1059_v37 = vmul.f32 %v1057_v41, %v8101_v3  ;;  %v8124_v41 = vld [vmem:[%s9902_s8 + $0x8] sm:$0xff] }
 0x267   :  { %v1058_v47 = vmul.f32 %v8067_v39, %v1050_v44 }
 0x268   :  { %v7340_v50 = vpop.eup %7339 }
 0x269   :  { %1122 = vrot.lane.b32.xlu0 %v1118_v45, %s7499_s21  ;;  %1063 = vrot.lane.b32.xlu1 %v1058_v47, %s7499_s21  ;;  %v1085_v51 = vmul.f32 %v7340_v50, %v8035_v60  ;;  %v8090_v60 = vld [vmem:[%s9900_s6 + $0x8] sm:$0xff] }
 0x26a   :  { %v1060_v38 = vmul.f32 %v1058_v47, %v8090_v60 }
 0x26b   :  { %v1093_v52 = vmul.f32 %v8060_v12, %v1085_v51 }
 0x26c   :  { %v7342_v53 = vpop.eup %7341 }
 0x26d   :  { %1098 = vrot.lane.b32.xlu1 %v1093_v52, %s7499_s21  ;;  %v1117_v54 = vmul.f32 %v7342_v53, %v8041_v63  ;;  %v8095_v63 = vld [vmem:[%s9901_s7 + $0x8] sm:$0xff]  ;;  %v1095_v11 = vmul.f32 %v1093_v52, %v8090_v60  ;;  %v1292_v53 = vmul.f32 %v8049_v49, %v8049_v49 }
 0x26f   :  { %v1119_v57 = vmul.f32 %v8060_v12, %v1117_v54 }
 0x271   :  { %1124 = vrot.lane.b32.xlu1 %v1119_v57, %s7499_s21  ;;  %v1121_v21 = vmul.f32 %v1119_v57, %v8090_v60  ;;  %v1320_v57 = vmul.f32 %v8037_v61, %v8037_v61 }
 0x297   :  { %v1097_v59 = vpop.permute.xlu1 %1096 }
 0x298   :  { %v1100_v5 = vmul.f32 %v1097_v59, %v8085_v0  ;;  %v1291_v59 = vmul.f32 %v8045_v2, %v8045_v2 }
 0x29a   :  { %v1102_v16 = vadd.f32 %v1100_v5, %v1094_v10 }
 0x2d7   :  { %v1062_v56 = vpop.permute.xlu0 %1061 }
 0x2d8   :  { %v1065_v1 = vmul.f32 %v1062_v56, %v8085_v0  ;;  %v1346_v56 = vmul.f32 %v8039_v62, %v8039_v62 }
 0x2da   :  { %v1067_v6 = vadd.f32 %v1065_v1, %v1059_v37  ;;  %v1319_v1 = vmul.f32 %v8029_v55, %v8029_v55 }
 0x2db   :  { %v1064_v36 = vpop.permute.xlu1 %1063  ;;  %v1123_v8 = vpop.permute.xlu0 %1122 }
 0x2dc   :  { %v1066_v48 = vmul.f32 %v1064_v36, %v8095_v63  ;;  %v1126_v17 = vmul.f32 %v1123_v8, %v8085_v0  ;;  %v1345_v36 = vmul.f32 %v8033_v58, %v8033_v58 }
 0x2de   :  { %v1068_v7 = vadd.f32 %v1066_v48, %v1060_v38  ;;  %v1128_v24 = vadd.f32 %v1126_v17, %v1120_v20 }
 0x2df   :  { %v1099_v9 = vpop.permute.xlu1 %1098 }
 0x2e0   :  { %v1101_v13 = vmul.f32 %v1099_v9, %v8095_v63  ;;  %v1069_v15 = vpack.c.bf16 %v1068_v7, %v1067_v6 }
 0x2e2   :  { %v1103_v18 = vadd.f32 %v1101_v13, %v1095_v11  ;;  %6539 = vmatprep.subr.bf16.mxu0 %v1069_v15 }
 0x2e3   :  { %6540 = vmatpush3.bf16.xpose.msra.mxu0 %v1069_v15  ;;  %v1125_v19 = vpop.permute.xlu1 %1124 }
 0x2e4   :  { %v1127_v22 = vmul.f32 %v1125_v19, %v8095_v63  ;;  %6545 = vmatprep.subr.bf16.mxu0 %v8047_v46  ;;  %v1130_v14 = vpack.c.bf16 %v1103_v18, %v1102_v16 }
 0x2e6   :  { %v1129_v26 = vadd.f32 %v1127_v22, %v1121_v21  ;;  %6541 = vmatprep.mubr.bf16.mxu0 %v1130_v14 }
 0x2e8   :  { %v1131_v29 = vpack.c.bf16 %v1129_v26, %v1128_v24 }
 0x2ea   :  { %6542 = vmatmul.mubr.bf16.vlgmr.msra.gmra.mrb[8].mxu0 %v1131_v29 }
 0x2eb   :  { %6546 = vmatpush3.bf16.msra.mxu0 %v8047_v46 }
 0x3bd   :  { %v6543_v30 = vpop.f32.mrb[8].mxu0 }
 0x3be   :  { %v1166_v31 = vpop.f32.mrb[9].mxu0  ;;  %v1183_v33 = vmul.f32 0.088388346, %v6543_v30 }
 0x3bf   :  { %v1181_v34 = vmul.f32 0.088388346, %v1166_v31  ;;  %v6544_v35 = vpop.f32.mrb[10].mxu0 }
 0x3c0   :  { %v1169_v40 = vpop.f32.mrb[11].mxu0  ;;  %v1184_v43 = vmul.f32 0.088388346, %v6544_v35  ;;  %v1187_v47 = vadd.f32 %v1183_v33, %v8119_v32 }
 0x3c1   :  { %v1182_v42 = vmul.f32 0.088388346, %v1169_v40  ;;  %v1185_v46 = vadd.f32 %v1181_v34, %v8119_v32 }
 0x3c2   :  { %v1196_v51 = vsel %vm1189_vm0, %v1187_v47, -inf  ;;  %v8136_v52 = vadd.f32 %v1184_v43, %v8124_v41 }
 0x3c3   :  { %v1190_v44 = vsel %vm1189_vm0, %v1185_v46, -inf  ;;  %v8129_v45 = vadd.f32 %v1182_v42, %v8124_v41 }
 0x3c4   :  { %1191 = vmax.xlane.f32.xlu0 %v1190_v44  ;;  %v1199_v54 = vsel %vm1189_vm0, %v8136_v52, -inf }
 0x3c5   :  { %v1193_v50 = vsel %vm1189_vm0, %v8129_v45, -inf }
 0x3c6   :  { %1194 = vmax.xlane.f32.xlu1 %v1193_v50 }
 0x3c8   :  { %1197 = vmax.xlane.f32.xlu0 %v1196_v51 }
 0x3ca   :  { %1295 = vadd.xlane.f32.xlu1 %v1292_v53 }
 0x3cc   :  { %1200 = vmax.xlane.f32.xlu0 %v1199_v54 }
 0x3ce   :  { %1323 = vadd.xlane.f32.xlu1 %v1320_v57 }
 0x3d0   :  { %1293 = vadd.xlane.f32.xlu0 %v1291_v59 }
 0x3d2   :  { %1349 = vadd.xlane.f32.xlu1 %v1346_v56 }
 0x3d4   :  { %1321 = vadd.xlane.f32.xlu0 %v1319_v1 }
 0x3d8   :  { %1347 = vadd.xlane.f32.xlu0 %v1345_v36 }
 0x451   :  { %v1192_v37 = vpop.xlane.xlu0 %1191 }
 0x452   :  { %v1202_v38 = vsub.f32 %v1185_v46, %v1192_v37 }
 0x453   :  { %v1195_v48 = vpop.xlane.xlu1 %1194 }
 0x454   :  { %v1206_v7 = vmul.f32 1.442695, %v1202_v38  ;;  %v1203_v56 = vsub.f32 %v8129_v45, %v1195_v48 }
 0x455   :  { %v1198_v5 = vpop.xlane.xlu0 %1197 }
 0x456   :  { %v1204_v6 = vsub.f32 %v1187_v47, %v1198_v5  ;;  %v1208_v36 = vmul.f32 1.442695, %v1203_v56 }
 0x457   :  { %v1296_v8 = vpop.xlane.xlu1 %1295 }
 0x458   :  { %v1210_v9 = vmul.f32 1.442695, %v1204_v6  ;;  %v1298_v10 = vmul.f32 0.0078125, %v1296_v8 }
 0x459   :  { %v1201_v11 = vpop.xlane.xlu0 %1200 }
 0x45a   :  { %7343 = vpow2.f32 %v1210_v9  ;;  %v1300_v13 = vadd.f32 1e-06, %v1298_v10 }
 0x45b   :  { %7345 = vpow2.f32 %v1206_v7  ;;  %v1324_v15 = vpop.xlane.xlu1 %1323 }
 0x45c   :  { %7347 = vrsqrt.f32 %v1300_v13  ;;  %v1326_v16 = vmul.f32 0.0078125, %v1324_v15 }
 0x45d   :  { %v1294_v17 = vpop.xlane.xlu0 %1293 }
 0x45e   :  { %v1328_v18 = vadd.f32 1e-06, %v1326_v16  ;;  %v1297_v24 = vmul.f32 0.0078125, %v1294_v17 }
 0x460   :  { %7349 = vrsqrt.f32 %v1328_v18  ;;  %v1299_v33 = vadd.f32 1e-06, %v1297_v24 }
 0x461   :  { %v1322_v19 = vpop.xlane.xlu0 %1321 }
 0x462   :  { %v1325_v20 = vmul.f32 0.0078125, %v1322_v19 }
 0x464   :  { %v8152_v21 = vpop.eup %7343  ;;  %v1327_v22 = vadd.f32 1e-06, %v1325_v20 }
 0x465   :  { %v8154_v14 = vpop.eup %7345  ;;  %v1220_v26 = vsel %vm1189_vm0, %v8152_v21, 0.0  ;;  %v1348_v30 = vpop.xlane.xlu0 %1347 }
 0x466   :  { %v7348_v29 = vpop.eup %7347  ;;  %7351 = vrsqrt.f32 %v1327_v22  ;;  %1221 = vadd.xlane.f32.xlu0 %v1220_v26  ;;  %v1351_v34 = vmul.f32 0.0078125, %v1348_v30  ;;  %v1214_v35 = vsel %vm1189_vm0, %v8154_v14, 0.0 }
 0x467   :  { %v1304_v31 = vmul.f32 %v7348_v29, %v8049_v49  ;;  %7353 = vrsqrt.f32 %v1299_v33 }
 0x468   :  { %v1353_v42 = vadd.f32 1e-06, %v1351_v34 }
 0x469   :  { %v1306_v40 = vmul.f32 %v8067_v39, %v1304_v31 }
 0x46a   :  { %1215 = vadd.xlane.f32.xlu0 %v1214_v35  ;;  %v7350_v46 = vpop.eup %7349  ;;  %7355 = vrsqrt.f32 %v1353_v42 }
 0x46b   :  { %1311 = vrot.lane.b32.xlu1 %v1306_v40, %s7499_s21  ;;  %v1332_v49 = vmul.f32 %v7350_v46, %v8037_v61  ;;  %v1205_v61 = vsub.f32 %v8136_v52, %v1201_v11  ;;  %v1308_v22 = vmul.f32 %v1306_v40, %v8090_v60 }
 0x46d   :  { %v1334_v51 = vmul.f32 %v8060_v12, %v1332_v49  ;;  %v1212_v1 = vmul.f32 1.442695, %v1205_v61 }
 0x46f   :  { %7357 = vpow2.f32 %v1212_v1  ;;  %v1336_v13 = vmul.f32 %v1334_v51, %v8090_v60 }
 0x470   :  { %v7352_v43 = vpop.eup %7351  ;;  %7359 = vpow2.f32 %v1208_v36 }
 0x471   :  { %v1331_v44 = vmul.f32 %v7352_v43, %v8029_v55  ;;  %v7354_v50 = vpop.eup %7353 }
 0x472   :  { %v1303_v53 = vmul.f32 %v7354_v50, %v8045_v2  ;;  %v1350_v2 = vpop.xlane.xlu1 %1349 }
 0x473   :  { %v1333_v47 = vmul.f32 %v8060_v12, %v1331_v44  ;;  %v1352_v37 = vmul.f32 0.0078125, %v1350_v2 }
 0x474   :  { %v7356_v54 = vpop.eup %7355  ;;  %v1305_v57 = vmul.f32 %v8067_v39, %v1303_v53 }
 0x475   :  { %1337 = vrot.lane.b32.xlu1 %v1333_v47, %s7499_s21  ;;  %v1357_v59 = vmul.f32 %v7356_v54, %v8033_v58  ;;  %v1354_v39 = vadd.f32 1e-06, %v1352_v37  ;;  %v1335_v11 = vmul.f32 %v1333_v47, %v8101_v3 }
 0x476   :  { %v1307_v24 = vmul.f32 %v1305_v57, %v8101_v3 }
 0x477   :  { %v1359_v55 = vmul.f32 %v8060_v12, %v1357_v59  ;;  %7361 = vrsqrt.f32 %v1354_v39 }
 0x479   :  { %1339 = vrot.lane.b32.xlu1 %v1334_v51, %s7499_s21  ;;  %v7358_v38 = vpop.eup %7357  ;;  %v1361_v40 = vmul.f32 %v1359_v55, %v8101_v3 }
 0x47a   :  { %v1223_v58 = vsel %vm1189_vm0, %v7358_v38, 0.0  ;;  %v7360_v5 = vpop.eup %7359 }
 0x47b   :  { %v1217_v6 = vsel %vm1189_vm0, %v7360_v5, 0.0 }
 0x480   :  { %1309 = vrot.lane.b32.xlu0 %v1305_v57, %s7499_s21 }
 0x481   :  { %v7362_v7 = vpop.eup %7361 }
 0x482   :  { %v1358_v52 = vmul.f32 %v7362_v7, %v8039_v62 }
 0x484   :  { %1363 = vrot.lane.b32.xlu0 %v1359_v55, %s7499_s21  ;;  %v1360_v45 = vmul.f32 %v8060_v12, %v1358_v52 }
 0x486   :  { %v1362_v43 = vmul.f32 %v1360_v45, %v8090_v60 }
 0x49d   :  { %1224 = vadd.xlane.f32.xlu1 %v1223_v58 }
 0x4a1   :  { %1218 = vadd.xlane.f32.xlu1 %v1217_v6 }
 0x4b2   :  { %1365 = vrot.lane.b32.xlu1 %v1360_v45, %s7499_s21 }
 0x4dd   :  { %v1312_v48 = vpop.permute.xlu1 %1311 }
 0x4de   :  { %v1314_v12 = vmul.f32 %v1312_v48, %v8095_v63 }
 0x4e0   :  { %v1316_v29 = vadd.f32 %v1314_v12, %v1308_v22 }
 0x4e7   :  { %v1338_v8 = vpop.permute.xlu1 %1337 }
 0x4e8   :  { %v1341_v9 = vmul.f32 %v1338_v8, %v8085_v0 }
 0x4ea   :  { %v1343_v16 = vadd.f32 %v1341_v9, %v1335_v11 }
 0x4eb   :  { %v1340_v10 = vpop.permute.xlu1 %1339 }
 0x4ec   :  { %v1342_v15 = vmul.f32 %v1340_v10, %v8095_v63 }
 0x4ee   :  { %v1344_v17 = vadd.f32 %v1342_v15, %v1336_v13 }
 0x4f0   :  { %v1371_v18 = vpack.c.bf16 %v1344_v17, %v1343_v16 }
 0x4f3   :  { %v1222_v19 = vpop.xlane.xlu0 %1221 }
 0x4f7   :  { %v1216_v62 = vpop.xlane.xlu0 %1215 }
 0x4fb   :  { %v1310_v20 = vpop.permute.xlu0 %1309 }
 0x4fc   :  { %v1313_v26 = vmul.f32 %v1310_v20, %v8085_v0 }
 0x4fe   :  { %v1315_v30 = vadd.f32 %v1313_v26, %v1307_v24 }
 0x4ff   :  { %v1364_v34 = vpop.permute.xlu0 %1363 }
 0x500   :  { %v1317_v31 = vpack.c.bf16 %v1316_v29, %v1315_v30  ;;  %v1367_v42 = vmul.f32 %v1364_v34, %v8085_v0 }
 0x502   :  { %6551 = vmatprep.subr.bf16.mxu0 %v1317_v31  ;;  %v1369_v47 = vadd.f32 %v1367_v42, %v1361_v40  ;;  %v6657_v42 = vld [vmem:[%s9897_s3 + $0x4] ss:$8 sps:$4 sm:$0xff]  }
 0x52a   :  { %v1225_v33 = vpop.xlane.xlu1 %1224 }
 0x52b   :  { %7363 = vrcp.f32 %v1225_v33 }
 0x52c   :  { %7365 = vrcp.f32 %v1216_v62 }
 0x52d   :  { %7367 = vrcp.f32 %v1222_v19 }
 0x52e   :  { %v1219_v35 = vpop.xlane.xlu1 %1218 }
 0x52f   :  { %7369 = vrcp.f32 %v1219_v35 }
 0x532   :  { %v1366_v46 = vpop.permute.xlu1 %1365 }
 0x533   :  { %v1368_v44 = vmul.f32 %v1366_v46, %v8095_v63 }
 0x535   :  { %v1370_v49 = vadd.f32 %v1368_v44, %v1362_v43  ;;  %v7364_v50 = vpop.eup %7363 }
 0x536   :  { %v7366_v51 = vpop.eup %7365  ;;  %v1233_v59 = vmul.f32 %v7364_v50, %v7358_v38 }
 0x537   :  { %v1372_v53 = vpack.c.bf16 %v1370_v49, %v1369_v47  ;;  %v7368_v54 = vpop.eup %7367  ;;  %v1227_v61 = vmul.f32 %v7366_v51, %v8154_v14 }
 0x538   :  { %v1231_v0 = vmul.f32 %v7368_v54, %v8152_v21 }
 0x539   :  { %v7370_v57 = vpop.eup %7369 }
 0x53a   :  { %v1229_v56 = vmul.f32 %v7370_v57, %v7360_v5  ;;  %v1235_v36 = vpack.c.bf16 %v1233_v59, %v1231_v0 }
 0x53c   :  { %v1234_v1 = vpack.c.bf16 %v1229_v56, %v1227_v61  ;;  %v6655_v56 = vld [vmem:[%s9897_s3] ss:$8 sps:$4 sm:$0xff]  }
 0x53e   :  { %6547 = vmatprep.mubr.msk.bf16.mxu0 %vm1189_vm0, %v1234_v1  ;;  %v6660_v1 = vld [vmem:[%s9897_s3 + $0x14] ss:$8 sps:$4 sm:$0xff]  }
 0x53f   :  { %6548 = vmatmul.mubr.msk.bf16.vlgmr.msra.gmra.mrb[12].mxu0 %vm1189_vm0, %v1235_v36  ;;  %v6658_v36 = vld [vmem:[%s9897_s3 + $0x10] ss:$8 sps:$4 sm:$0xff]  }
 0x540   :  { %6552 = vmatpush3.bf16.xpose.msra.mxu0 %v1317_v31  ;;  %6553 = vmatprep.mubr.bf16.mxu0 %v1371_v18 }
 0x541   :  { %6557 = vmatprep.subr.bf16.mxu0 %v8051_v4 }
 0x547   :  { %6554 = vmatmul.mubr.bf16.vlgmr.msra.gmra.mrb[16].mxu0 %v1372_v53 }
 0x548   :  { %6558 = vmatpush3.bf16.msra.mxu0 %v8051_v4 }
 0x549   :  { %1919 = vmatprep.subr.bf16.mxu0 %v6657_v42  ;;  %v6726_v42 = vld [vmem:[%s9897_s3 + $0x174] ss:$8 sps:$4 sm:$0xff]  }
 0x612   :  { %v8200_v60 = vpop.f32.mrb[12].mxu0 }
 0x613   :  { %v8202_v63 = vpop.f32.mrb[13].mxu0 }
 0x614   :  { %v8204_v3 = vpop.f32.mrb[14].mxu0 }
 0x615   :  { %v1532_v21 = vpack.c.bf16 %v8204_v3, %v8200_v60  ;;  %v8208_v14 = vpop.f32.mrb[15].mxu0  ;;  %v6666_v60 = vld [vmem:[%s9897_s3 + $0x34] ss:$8 sps:$4 sm:$0xff]   ;;  %v6664_v3 = vld [vmem:[%s9897_s3 + $0x30] ss:$8 sps:$4 sm:$0xff]  }
 0x616   :  { %v1531_v55 = vpack.c.bf16 %v8208_v14, %v8202_v63  ;;  %v6714_v63 = vld [vmem:[%s9897_s3 + $0x134] ss:$8 sps:$4 sm:$0xff]   ;;  %v6712_v14 = vld [vmem:[%s9897_s3 + $0x130] ss:$8 sps:$4 sm:$0xff]  }
 0x61a   :  { %v6555_v2 = vpop.f32.mrb[16].mxu0 }
 0x61b   :  { %v1407_v37 = vpop.f32.mrb[17].mxu0  ;;  %v1424_v38 = vmul.f32 0.088388346, %v6555_v2  ;;  %v6663_v2 = vld [vmem:[%s9897_s3 + $0x24] ss:$8 sps:$4 sm:$0xff]  }
 0x61c   :  { %v1422_v39 = vmul.f32 0.088388346, %v1407_v37  ;;  %v6556_v58 = vpop.f32.mrb[18].mxu0  ;;  %v6661_v37 = vld [vmem:[%s9897_s3 + $0x20] ss:$8 sps:$4 sm:$0xff]  }
 0x61d   :  { %v1410_v4 = vpop.f32.mrb[19].mxu0  ;;  %v1425_v7 = vmul.f32 0.088388346, %v6556_v58  ;;  %v1428_v48 = vadd.f32 %v1424_v38, %v8119_v32  ;;  %v6667_v38 = vld [vmem:[%s9897_s3 + $0x40] ss:$8 sps:$4 sm:$0xff]  }
 0x61e   :  { %v1423_v5 = vmul.f32 0.088388346, %v1410_v4  ;;  %v1426_v6 = vadd.f32 %v1422_v39, %v8119_v32  ;;  %v6672_v39 = vld [vmem:[%s9897_s3 + $0x54] ss:$8 sps:$4 sm:$0xff]   ;;  %v6670_v58 = vld [vmem:[%s9897_s3 + $0x50] ss:$8 sps:$4 sm:$0xff]  }
 0x61f   :  { %v1436_v9 = vsel %vm1189_vm0, %v1428_v48, -inf  ;;  %v1429_v10 = vadd.f32 %v1425_v7, %v8124_v41  ;;  %v6675_v4 = vld [vmem:[%s9897_s3 + $0x64] ss:$8 sps:$4 sm:$0xff]   ;;  %v6676_v7 = vld [vmem:[%s9897_s3 + $0x70] ss:$8 sps:$4 sm:$0xff]  }
 0x620   :  { %v1430_v52 = vsel %vm1189_vm0, %v1426_v6, -inf  ;;  %v1427_v45 = vadd.f32 %v1423_v5, %v8124_v41  ;;  %v6673_v5 = vld [vmem:[%s9897_s3 + $0x60] ss:$8 sps:$4 sm:$0xff]  }
 0x621   :  { %1431 = vmax.xlane.f32.xlu0 %v1430_v52  ;;  %v1439_v11 = vsel %vm1189_vm0, %v1429_v10, -inf  ;;  %v6681_v52 = vld [vmem:[%s9897_s3 + $0x84] ss:$8 sps:$4 sm:$0xff]  }
 0x622   :  { %v1433_v8 = vsel %vm1189_vm0, %v1427_v45, -inf }
 0x623   :  { %1434 = vmax.xlane.f32.xlu1 %v1433_v8  ;;  %v6682_v8 = vld [vmem:[%s9897_s3 + $0x90] ss:$8 sps:$4 sm:$0xff]  }
 0x625   :  { %1437 = vmax.xlane.f32.xlu0 %v1436_v9  ;;  %v6687_v9 = vld [vmem:[%s9897_s3 + $0xa4] ss:$8 sps:$4 sm:$0xff]  }
 0x629   :  { %1440 = vmax.xlane.f32.xlu0 %v1439_v11  ;;  %v6690_v11 = vld [vmem:[%s9897_s3 + $0xb4] ss:$8 sps:$4 sm:$0xff]  }
 0x6ae   :  { %v1432_v13 = vpop.xlane.xlu0 %1431 }
 0x6af   :  { %v1442_v15 = vsub.f32 %v1426_v6, %v1432_v13  ;;  %v6678_v6 = vld [vmem:[%s9897_s3 + $0x74] ss:$8 sps:$4 sm:$0xff]   ;;  %v6688_v13 = vld [vmem:[%s9897_s3 + $0xb0] ss:$8 sps:$4 sm:$0xff]  }
 0x6b0   :  { %v1435_v16 = vpop.xlane.xlu1 %1434 }
 0x6b1   :  { %v1446_v17 = vmul.f32 1.442695, %v1442_v15  ;;  %v1443_v18 = vsub.f32 %v1427_v45, %v1435_v16  ;;  %v6679_v45 = vld [vmem:[%s9897_s3 + $0x80] ss:$8 sps:$4 sm:$0xff]   ;;  %v6693_v15 = vld [vmem:[%s9897_s3 + $0xc4] ss:$8 sps:$4 sm:$0xff]  }
 0x6b2   :  { %v1438_v19 = vpop.xlane.xlu0 %1437  ;;  %v6691_v16 = vld [vmem:[%s9897_s3 + $0xc0] ss:$8 sps:$4 sm:$0xff]  }
 0x6b3   :  { %7371 = vpow2.f32 %v1446_v17  ;;  %v1448_v32 = vmul.f32 1.442695, %v1443_v18  ;;  %v1444_v62 = vsub.f32 %v1428_v48, %v1438_v19  ;;  %v6684_v48 = vld [vmem:[%s9897_s3 + $0x94] ss:$8 sps:$4 sm:$0xff]   ;;  %v6694_v18 = vld [vmem:[%s9897_s3 + $0xd0] ss:$8 sps:$4 sm:$0xff]  }
 0x6b4   :  { %v6696_v17 = vld [vmem:[%s9897_s3 + $0xd4] ss:$8 sps:$4 sm:$0xff]   ;;  %v6699_v19 = vld [vmem:[%s9897_s3 + $0xe4] ss:$8 sps:$4 sm:$0xff]  }
 0x6b5   :  { %7373 = vpow2.f32 %v1448_v32  ;;  %v1450_v12 = vmul.f32 1.442695, %v1444_v62  ;;  %v6697_v32 = vld [vmem:[%s9897_s3 + $0xe0] ss:$8 sps:$4 sm:$0xff]   ;;  %v6702_v62 = vld [vmem:[%s9897_s3 + $0xf4] ss:$8 sps:$4 sm:$0xff]  }
 0x6b6   :  { %v1441_v20 = vpop.xlane.xlu0 %1440 }
 0x6b7   :  { %7375 = vpow2.f32 %v1450_v12  ;;  %v1445_v22 = vsub.f32 %v1429_v10, %v1441_v20  ;;  %v6685_v10 = vld [vmem:[%s9897_s3 + $0xa0] ss:$8 sps:$4 sm:$0xff]   ;;  %v6700_v12 = vld [vmem:[%s9897_s3 + $0xf0] ss:$8 sps:$4 sm:$0xff]   ;;  %v6705_v20 = vld [vmem:[%s9897_s3 + $0x104] ss:$8 sps:$4 sm:$0xff]  }
 0x6b9   :  { %v1452_v24 = vmul.f32 1.442695, %v1445_v22  ;;  %v6703_v22 = vld [vmem:[%s9897_s3 + $0x100] ss:$8 sps:$4 sm:$0xff]  }
 0x6bb   :  { %7377 = vpow2.f32 %v1452_v24  ;;  %v6708_v24 = vld [vmem:[%s9897_s3 + $0x114] ss:$8 sps:$4 sm:$0xff]  }
 0x6bd   :  { %v7372_v41 = vpop.eup %7371 }
 0x6be   :  { %v1454_v26 = vsel %vm1189_vm0, %v7372_v41, 0.0 }
 0x6bf   :  { %v7374_v29 = vpop.eup %7373  ;;  %1455 = vadd.xlane.f32.xlu0 %v1454_v26  ;;  %v6711_v26 = vld [vmem:[%s9897_s3 + $0x124] ss:$8 sps:$4 sm:$0xff]  }
 0x6c0   :  { %v1457_v30 = vsel %vm1189_vm0, %v7374_v29, 0.0 }
 0x6c1   :  { %v7376_v31 = vpop.eup %7375  ;;  %1458 = vadd.xlane.f32.xlu1 %v1457_v30  ;;  %v6715_v30 = vld [vmem:[%s9897_s3 + $0x140] ss:$8 sps:$4 sm:$0xff]  }
 0x6c2   :  { %v1460_v33 = vsel %vm1189_vm0, %v7376_v31, 0.0 }
 0x6c3   :  { %1461 = vadd.xlane.f32.xlu0 %v1460_v33  ;;  %v6718_v33 = vld [vmem:[%s9897_s3 + $0x150] ss:$8 sps:$4 sm:$0xff]  }
 0x6c5   :  { %v7378_v34 = vpop.eup %7377 }
 0x6c6   :  { %v1463_v35 = vsel %vm1189_vm0, %v7378_v34, 0.0 }
 0x6c7   :  { %1464 = vadd.xlane.f32.xlu1 %v1463_v35  ;;  %v6721_v35 = vld [vmem:[%s9897_s3 + $0x160] ss:$8 sps:$4 sm:$0xff]  }
 0x74c   :  { %v1456_v46 = vpop.xlane.xlu0 %1455 }
 0x74d   :  { %7379 = vrcp.f32 %v1456_v46  ;;  %v6724_v46 = vld [vmem:[%s9897_s3 + $0x170] ss:$8 sps:$4 sm:$0xff]  }
 0x74e   :  { %v1459_v40 = vpop.xlane.xlu1 %1458 }
 0x74f   :  { %7381 = vrcp.f32 %v1459_v40  ;;  %v6729_v40 = vld [vmem:[%s9897_s3 + $0x184] ss:$8 sps:$4 sm:$0xff]  }
 0x750   :  { %v1462_v43 = vpop.xlane.xlu0 %1461 }
 0x751   :  { %7383 = vrcp.f32 %v1462_v43  ;;  %v6727_v43 = vld [vmem:[%s9897_s3 + $0x180] ss:$8 sps:$4 sm:$0xff]  }
 0x754   :  { %v1465_v44 = vpop.xlane.xlu1 %1464 }
 0x755   :  { %7385 = vrcp.f32 %v1465_v44  ;;  %v6732_v44 = vld [vmem:[%s9897_s3 + $0x194] ss:$8 sps:$4 sm:$0xff]  }
 0x757   :  { %v7380_v47 = vpop.eup %7379 }
 0x758   :  { %v1467_v50 = vmul.f32 %v7380_v47, %v7372_v41  ;;  %v6706_v41 = vld [vmem:[%s9897_s3 + $0x110] ss:$8 sps:$4 sm:$0xff]  }
 0x759   :  { %v7382_v49 = vpop.eup %7381  ;;  %v6730_v47 = vld [vmem:[%s9897_s3 + $0x190] ss:$8 sps:$4 sm:$0xff]  }
 0x75a   :  { %v1469_v51 = vmul.f32 %v7382_v49, %v7374_v29  ;;  %v6709_v29 = vld [vmem:[%s9897_s3 + $0x120] ss:$8 sps:$4 sm:$0xff]   ;;  %v6735_v49 = vld [vmem:[%s9897_s3 + $0x1a4] ss:$8 sps:$4 sm:$0xff]  }
 0x75b   :  { %v7384_v54 = vpop.eup %7383 }
 0x75c   :  { %v1474_v53 = vpack.c.bf16 %v1469_v51, %v1467_v50  ;;  %v1471_v59 = vmul.f32 %v7384_v54, %v7376_v31  ;;  %v6720_v31 = vld [vmem:[%s9897_s3 + $0x154] ss:$8 sps:$4 sm:$0xff]   ;;  %v6733_v50 = vld [vmem:[%s9897_s3 + $0x1a0] ss:$8 sps:$4 sm:$0xff]   ;;  %v6741_v54 = vld [vmem:[%s9897_s3 + $0x1c4] ss:$8 sps:$4 sm:$0xff]  }
 0x75d   :  { %v6738_v51 = vld [vmem:[%s9897_s3 + $0x1b4] ss:$8 sps:$4 sm:$0xff]  }
 0x75e   :  { %6559 = vmatprep.mubr.msk.bf16.mxu0 %vm1189_vm0, %v1474_v53  ;;  %v6736_v53 = vld [vmem:[%s9897_s3 + $0x1b0] ss:$8 sps:$4 sm:$0xff]  }
 0x75f   :  { %v7386_v57 = vpop.eup %7385 }
 0x760   :  { %v1473_v61 = vmul.f32 %v7386_v57, %v7378_v34  ;;  %v6723_v34 = vld [vmem:[%s9897_s3 + $0x164] ss:$8 sps:$4 sm:$0xff]   ;;  %v6739_v57 = vld [vmem:[%s9897_s3 + $0x1c0] ss:$8 sps:$4 sm:$0xff]  }
 0x762   :  { %v1475_v0 = vpack.c.bf16 %v1473_v61, %v1471_v59  ;;  %v6744_v59 = vld [vmem:[%s9897_s3 + $0x1d4] ss:$8 sps:$4 sm:$0xff]   ;;  %v6742_v61 = vld [vmem:[%s9897_s3 + $0x1d0] ss:$8 sps:$4 sm:$0xff]  }
 0x764   :  { %6560 = vmatmul.mubr.msk.bf16.vlgmr.msra.gmra.mrb[20].mxu0 %vm1189_vm0, %v1475_v0  ;;  %v6745_v0 = vld [vmem:[%s9897_s3 + $0x1e0] ss:$8 sps:$4 sm:$0xff]  }
 0x765   :  { %1920 = vmatpush1.bf16.msra.mxu0 %v6655_v56  ;;  %1951 = vmatprep.mubr.bf16.mxu0 %v1532_v21  ;;  %v6669_v21 = vld [vmem:[%s9897_s3 + $0x44] ss:$8 sps:$4 sm:$0xff]  }
 0x766   :  { %1921 = vmatprep.subr.bf16.mxu0 %v6660_v1  ;;  %v6747_v56 = vld [vmem:[%s9897_s3 + $0x1e4] ss:$8 sps:$4 sm:$0xff]   ;;  %v6750_v1 = vld [vmem:[%s9897_s3 + $0x1f4] ss:$8 sps:$4 sm:$0xff]  }
 0x769   :  { %1922 = vmatpush1.bf16.msra.mxu0 %v6658_v36  ;;  %v6748_v36 = vld [vmem:[%s9897_s3 + $0x1f0] ss:$8 sps:$4 sm:$0xff]  }
 0x76a   :  { %1923 = vmatprep.subr.bf16.mxu0 %v6663_v2 }
 0x76d   :  { %1924 = vmatpush1.bf16.msra.mxu0 %v6661_v37 }
 0x76e   :  { %1925 = vmatprep.subr.bf16.mxu0 %v6666_v60 }
 0x771   :  { %1926 = vmatpush1.bf16.msra.mxu0 %v6664_v3 }
 0x772   :  { %1927 = vmatprep.subr.bf16.mxu0 %v6669_v21 }
 0x775   :  { %1928 = vmatpush1.bf16.msra.mxu0 %v6667_v38 }
 0x776   :  { %1929 = vmatprep.subr.bf16.mxu0 %v6672_v39  ;;  %v6751_v39 = vld [vmem:[%s9905_s11 + $0x100] ss:$8 sps:$4 sm:$0xff]  }
 0x779   :  { %1930 = vmatpush1.bf16.msra.mxu0 %v6670_v58  ;;  %v6753_v58 = vld [vmem:[%s9905_s11 + $0x104] ss:$8 sps:$4 sm:$0xff]  }
 0x77a   :  { %1931 = vmatprep.subr.bf16.mxu0 %v6675_v4  ;;  %v6756_v4 = vld [vmem:[%s9905_s11 + $0x114] ss:$8 sps:$4 sm:$0xff]  }
 0x77d   :  { %1932 = vmatpush1.bf16.msra.mxu0 %v6673_v5  ;;  %v6754_v5 = vld [vmem:[%s9905_s11 + $0x110] ss:$8 sps:$4 sm:$0xff]  }
 0x77e   :  { %1933 = vmatprep.subr.bf16.mxu0 %v6678_v6  ;;  %v6759_v6 = vld [vmem:[%s9905_s11 + $0x124] ss:$8 sps:$4 sm:$0xff]  }
 0x781   :  { %1934 = vmatpush1.bf16.msra.mxu0 %v6676_v7  ;;  %v2063_v7 = vld [vmem:[%s9904_s10 + $0x80] sm:$0xff] }
 0x782   :  { %1935 = vmatprep.subr.bf16.mxu0 %v6681_v52  ;;  %v2064_v52 = vld [vmem:[%s9904_s10 + $0x88] sm:$0xff] }
 0x785   :  { %1936 = vmatpush1.bf16.msra.mxu0 %v6679_v45  ;;  %v6563_v45 = vpack.c.bf16 %v2064_v52, %v2063_v7  ;;  %v2072_v7 = vld [vmem:[%s9904_s10 + $0xc8] sm:$0xff] }
 0x786   :  { %1937 = vmatprep.subr.bf16.mxu0 %v6684_v48  ;;  %v2047_v48 = vld [vmem:[%s9904_s10] sm:$0xff] }
 0x787   :  { %6564 = vmatprep.subr.bf16.mxu1 %v6563_v45  ;;  %v6786_v45 = vld [vmem:[%s9905_s11 + $0x1b4] ss:$8 sps:$4 sm:$0xff]  }
 0x789   :  { %1938 = vmatpush1.bf16.msra.mxu0 %v6682_v8  ;;  %v2048_v8 = vld [vmem:[%s9904_s10 + $0x8] sm:$0xff] }
 0x78a   :  { %1939 = vmatprep.subr.bf16.mxu0 %v6687_v9  ;;  %v2065_v9 = vld [vmem:[%s9904_s10 + $0x90] sm:$0xff] }
 0x78d   :  { %1940 = vmatpush1.bf16.msra.mxu0 %v6685_v10  ;;  %v6757_v10 = vld [vmem:[%s9905_s11 + $0x120] ss:$8 sps:$4 sm:$0xff]  }
 0x78e   :  { %1941 = vmatprep.subr.bf16.mxu0 %v6690_v11  ;;  %v6762_v11 = vld [vmem:[%s9905_s11 + $0x134] ss:$8 sps:$4 sm:$0xff]  }
 0x791   :  { %1942 = vmatpush1.bf16.msra.mxu0 %v6688_v13  ;;  %v6565_v13 = vpack.c.bf16 %v2048_v8, %v2047_v48  ;;  %v2055_v48 = vld [vmem:[%s9904_s10 + $0x40] sm:$0xff]  ;;  %v2056_v8 = vld [vmem:[%s9904_s10 + $0x48] sm:$0xff] }
 0x792   :  { %1943 = vmatprep.subr.bf16.mxu0 %v6693_v15  ;;  %v2066_v15 = vld [vmem:[%s9904_s10 + $0x98] sm:$0xff] }
 0x793   :  { %6566 = vmatpush3.bf16.msra.mxu1 %v6565_v13  ;;  %v2074_v13 = vld [vmem:[%s9904_s10 + $0xd8] sm:$0xff] }
 0x795   :  { %1944 = vmatpush1.bf16.msra.mxu0 %v6691_v16  ;;  %v6567_v16 = vpack.c.bf16 %v2066_v15, %v2065_v9  ;;  %v6784_v9 = vld [vmem:[%s9905_s11 + $0x1b0] ss:$8 sps:$4 sm:$0xff]  }
 0x796   :  { %1945 = vmatprep.subr.bf16.mxu0 %v6696_v17  ;;  %v2049_v17 = vld [vmem:[%s9904_s10 + $0x10] sm:$0xff] }
 0x797   :  { %6568 = vmatprep.subr.bf16.mxu1 %v6567_v16  ;;  %v6787_v16 = vld [vmem:[%s9905_s11 + $0x1c0] ss:$8 sps:$4 sm:$0xff]  }
 0x799   :  { %1946 = vmatpush1.bf16.msra.mxu0 %v6694_v18  ;;  %v2050_v18 = vld [vmem:[%s9904_s10 + $0x18] sm:$0xff] }
 0x79a   :  { %1947 = vmatprep.subr.bf16.mxu0 %v6699_v19  ;;  %v2067_v19 = vld [vmem:[%s9904_s10 + $0xa0] sm:$0xff] }
 0x79d   :  { %1948 = vmatpush1.bf16.msra.mxu0 %v6697_v32  ;;  %v6569_v32 = vpack.c.bf16 %v2050_v18, %v2049_v17  ;;  %v6789_v17 = vld [vmem:[%s9905_s11 + $0x1c4] ss:$8 sps:$4 sm:$0xff]   ;;  %v2057_v18 = vld [vmem:[%s9904_s10 + $0x50] sm:$0xff] }
 0x79e   :  { %1949 = vmatprep.subr.bf16.mxu0 %v6702_v62  ;;  %v2068_v62 = vld [vmem:[%s9904_s10 + $0xa8] sm:$0xff] }
 0x79f   :  { %6570 = vmatpush3.bf16.msra.mxu1 %v6569_v32  ;;  %v2075_v32 = vld [vmem:[%s9904_s10 + $0xe0] sm:$0xff] }
 0x7a1   :  { %1950 = vmatpush1.bf16.msra.mxu0 %v6700_v12  ;;  %v6571_v12 = vpack.c.bf16 %v2068_v62, %v2067_v19  ;;  %v2058_v19 = vld [vmem:[%s9904_s10 + $0x58] sm:$0xff]  ;;  %v2076_v62 = vld [vmem:[%s9904_s10 + $0xe8] sm:$0xff] }
 0x7a2   :  { %1962 = vmatprep.subr.bf16.mxu0 %v6705_v20  ;;  %v2051_v20 = vld [vmem:[%s9904_s10 + $0x20] sm:$0xff] }
 0x7a3   :  { %6572 = vmatprep.subr.bf16.mxu1 %v6571_v12  ;;  %v6585_v12 = vpack.c.bf16 %v2058_v19, %v2057_v18  ;;  %v6823_v18 = vld [vmem:[%s9905_s11 + $0x330] ss:$8 sps:$4 sm:$0xff]   ;;  %v6828_v19 = vld [vmem:[%s9905_s11 + $0x54] ss:$8 sps:$4 sm:$0xff]  }
 0x7a4   :  { %1952 = vmatmul.mubr.bf16.vlgmr.msra.gmra.mrb[24].mxu0 %v1531_v55  ;;  %v6717_v55 = vld [vmem:[%s9897_s3 + $0x144] ss:$8 sps:$4 sm:$0xff]  }
 0x7a5   :  { %1963 = vmatpush1.bf16.msra.mxu0 %v6703_v22  ;;  %v2052_v22 = vld [vmem:[%s9904_s10 + $0x28] sm:$0xff] }
 0x7a6   :  { %1964 = vmatprep.subr.bf16.mxu0 %v6708_v24  ;;  %v6760_v24 = vld [vmem:[%s9905_s11 + $0x130] ss:$8 sps:$4 sm:$0xff]  }
 0x7a9   :  { %1965 = vmatpush1.bf16.msra.mxu0 %v6706_v41  ;;  %v2069_v41 = vld [vmem:[%s9904_s10 + $0xb0] sm:$0xff] }
 0x7aa   :  { %1966 = vmatprep.subr.bf16.mxu0 %v6711_v26  ;;  %v2070_v26 = vld [vmem:[%s9904_s10 + $0xb8] sm:$0xff] }
 0x7ad   :  { %1967 = vmatpush1.bf16.msra.mxu0 %v6709_v29  ;;  %v6765_v29 = vld [vmem:[%s9905_s11 + $0x144] ss:$8 sps:$4 sm:$0xff]  }
 0x7ae   :  { %1968 = vmatprep.subr.bf16.mxu0 %v6714_v63  ;;  %v6573_v63 = vpack.c.bf16 %v2052_v22, %v2051_v20  ;;  %v6587_v20 = vpack.c.bf16 %v2076_v62, %v2075_v32  ;;  %v6790_v22 = vld [vmem:[%s9905_s11 + $0x1d0] ss:$8 sps:$4 sm:$0xff]   ;;  %v6831_v32 = vld [vmem:[%s9905_s11 + $0x344] ss:$8 sps:$4 sm:$0xff]  }
 0x7af   :  { %v6826_v62 = vld [vmem:[%s9905_s11 + $0x50] ss:$8 sps:$4 sm:$0xff]  }
 0x7b0   :  { %6574 = vmatpush3.bf16.msra.mxu1 %v6573_v63  ;;  %v2078_v63 = vld [vmem:[%s9904_s10 + $0xf8] sm:$0xff] }
 0x7b1   :  { %1969 = vmatpush1.bf16.msra.mxu0 %v6712_v14  ;;  %v6575_v14 = vpack.c.bf16 %v2070_v26, %v2069_v41  ;;  %v2059_v41 = vld [vmem:[%s9904_s10 + $0x60] sm:$0xff]  ;;  %v2060_v26 = vld [vmem:[%s9904_s10 + $0x68] sm:$0xff] }
 0x7b2   :  { %1970 = vmatprep.subr.bf16.mxu0 %v6717_v55  ;;  %v6763_v55 = vld [vmem:[%s9905_s11 + $0x140] ss:$8 sps:$4 sm:$0xff]  }
 0x7b3   :  { %6576 = vmatprep.subr.bf16.mxu1 %v6575_v14  ;;  %v6589_v14 = vpack.c.bf16 %v2060_v26, %v2059_v41  ;;  %v6835_v41 = vld [vmem:[%s9905_s11 + $0x350] ss:$8 sps:$4 sm:$0xff]   ;;  %v6840_v26 = vld [vmem:[%s9905_s11 + $0x74] ss:$8 sps:$4 sm:$0xff]  }
 0x7b5   :  { %1971 = vmatpush1.bf16.msra.mxu0 %v6715_v30  ;;  %v6768_v30 = vld [vmem:[%s9905_s11 + $0x154] ss:$8 sps:$4 sm:$0xff]  }
 0x7b6   :  { %1972 = vmatprep.subr.bf16.mxu0 %v6720_v31  ;;  %v6766_v31 = vld [vmem:[%s9905_s11 + $0x150] ss:$8 sps:$4 sm:$0xff]  }
 0x7b9   :  { %1973 = vmatpush1.bf16.msra.mxu0 %v6718_v33  ;;  %v6771_v33 = vld [vmem:[%s9905_s11 + $0x164] ss:$8 sps:$4 sm:$0xff]  }
 0x7ba   :  { %1974 = vmatprep.subr.bf16.mxu0 %v6723_v34  ;;  %v6769_v34 = vld [vmem:[%s9905_s11 + $0x160] ss:$8 sps:$4 sm:$0xff]  }
 0x7bd   :  { %1975 = vmatpush1.bf16.msra.mxu0 %v6721_v35  ;;  %v6774_v35 = vld [vmem:[%s9905_s11 + $0x174] ss:$8 sps:$4 sm:$0xff]  }
 0x7be   :  { %1976 = vmatprep.subr.bf16.mxu0 %v6726_v42  ;;  %v6772_v42 = vld [vmem:[%s9905_s11 + $0x170] ss:$8 sps:$4 sm:$0xff]  }
 0x7c1   :  { %1977 = vmatpush1.bf16.msra.mxu0 %v6724_v46  ;;  %v6777_v46 = vld [vmem:[%s9905_s11 + $0x184] ss:$8 sps:$4 sm:$0xff]  }
 0x7c2   :  { %1978 = vmatprep.subr.bf16.mxu0 %v6729_v40  ;;  %v6775_v40 = vld [vmem:[%s9905_s11 + $0x180] ss:$8 sps:$4 sm:$0xff]  }
 0x7c5   :  { %1979 = vmatpush1.bf16.msra.mxu0 %v6727_v43  ;;  %v6780_v43 = vld [vmem:[%s9905_s11 + $0x194] ss:$8 sps:$4 sm:$0xff]  }
 0x7c6   :  { %1980 = vmatprep.subr.bf16.mxu0 %v6732_v44  ;;  %v6778_v44 = vld [vmem:[%s9905_s11 + $0x190] ss:$8 sps:$4 sm:$0xff]  }
 0x7c9   :  { %1981 = vmatpush1.bf16.msra.mxu0 %v6730_v47  ;;  %v6783_v47 = vld [vmem:[%s9905_s11 + $0x1a4] ss:$8 sps:$4 sm:$0xff]  }
 0x7ca   :  { %1982 = vmatprep.subr.bf16.mxu0 %v6735_v49  ;;  %v6781_v49 = vld [vmem:[%s9905_s11 + $0x1a0] ss:$8 sps:$4 sm:$0xff]  }
 0x7cd   :  { %1983 = vmatpush1.bf16.msra.mxu0 %v6733_v50 }
 0x7ce   :  { %1984 = vmatprep.subr.bf16.mxu0 %v6738_v51  ;;  %v7471_v51 = vld [vmem:[%s9894_s0] sm:$0xff] }
 0x7d1   :  { %1985 = vmatpush1.bf16.msra.mxu0 %v6736_v53 }
 0x7d2   :  { %1986 = vmatprep.subr.bf16.mxu0 %v6741_v54 }
 0x7d5   :  { %1987 = vmatpush1.bf16.msra.mxu0 %v6739_v57  ;;  %v7472_v57 = vld [vmem:[%s9894_s0 + $0x8] sm:$0xff] }
 0x7d6   :  { %1988 = vmatprep.subr.bf16.mxu0 %v6744_v59 }
 0x7d9   :  { %1989 = vmatpush1.bf16.msra.mxu0 %v6742_v61 }
 0x7da   :  { %1990 = vmatprep.subr.bf16.mxu0 %v6747_v56  ;;  %v7473_v56 = vld [vmem:[%s9894_s0 + $0x10] sm:$0xff] }
 0x7dd   :  { %1991 = vmatpush1.bf16.msra.mxu0 %v6745_v0 }
 0x7de   :  { %1992 = vmatprep.subr.bf16.mxu0 %v6750_v1 }
 0x7e1   :  { %1993 = vmatpush1.bf16.msra.mxu0 %v6748_v36 }
 0x7e2   :  { %2879 = vmatprep.subr.bf16.mxu0 %v6753_v58  ;;  %v2053_v58 = vld [vmem:[%s9904_s10 + $0x30] sm:$0xff] }
 0x837   :  { %v6561_v2 = vpop.f32.mrb[20].mxu0 }
 0x838   :  { %v1516_v37 = vpop.f32.mrb[21].mxu0 }
 0x839   :  { %v6562_v60 = vpop.f32.mrb[22].mxu0 }
 0x83a   :  { %v1534_v3 = vpack.c.bf16 %v6562_v60, %v6561_v2  ;;  %v1519_v21 = vpop.f32.mrb[23].mxu0  ;;  %v7474_v2 = vld [vmem:[%s9894_s0 + $0x18] sm:$0xff] }
 0x83b   :  { %v1533_v38 = vpack.c.bf16 %v1519_v21, %v1516_v37 }
 0x83c   :  { %1994 = vmatprep.mubr.bf16.mxu0 %v1534_v3 }
 0x83d   :  { %1995 = vmatmul.mubr.bf16.vlgmr.msra.gmra.mrb[24].mxu0 %v1533_v38 }
 0x83e   :  { %2880 = vmatpush1.bf16.msra.mxu0 %v6751_v39 }
 0x83f   :  { %2881 = vmatprep.subr.bf16.mxu0 %v6756_v4  ;;  %v2054_v4 = vld [vmem:[%s9904_s10 + $0x38] sm:$0xff] }
 0x842   :  { %2882 = vmatpush1.bf16.msra.mxu0 %v6754_v5  ;;  %v6577_v5 = vpack.c.bf16 %v2054_v4, %v2053_v58 }
 0x843   :  { %2883 = vmatprep.subr.bf16.mxu0 %v6759_v6  ;;  %v2071_v6 = vld [vmem:[%s9904_s10 + $0xc0] sm:$0xff] }
 0x844   :  { %6578 = vmatpush3.bf16.msra.mxu1 %v6577_v5  ;;  %v6579_v52 = vpack.c.bf16 %v2072_v7, %v2071_v6  ;;  %v6802_v5 = vld [vmem:[%s9905_s11 + $0x10] ss:$8 sps:$4 sm:$0xff]   ;;  %v6805_v6 = vld [vmem:[%s9905_s11 + $0x300] ss:$8 sps:$4 sm:$0xff]  }
 0x846   :  { %2884 = vmatpush1.bf16.msra.mxu0 %v6757_v10  ;;  %v6581_v10 = vpack.c.bf16 %v2056_v8, %v2055_v48  ;;  %6580 = vmatprep.subr.bf16.mxu1 %v6579_v52  ;;  %v6810_v52 = vld [vmem:[%s9905_s11 + $0x24] ss:$8 sps:$4 sm:$0xff]   ;;  %v6808_v48 = vld [vmem:[%s9905_s11 + $0x20] ss:$8 sps:$4 sm:$0xff]   ;;  %v6811_v8 = vld [vmem:[%s9905_s11 + $0x310] ss:$8 sps:$4 sm:$0xff]  }
 0x847   :  { %2885 = vmatprep.subr.bf16.mxu0 %v6762_v11  ;;  %v2073_v11 = vld [vmem:[%s9904_s10 + $0xd0] sm:$0xff] }
 0x848   :  { %6582 = vmatpush3.bf16.msra.mxu1 %v6581_v10  ;;  %v6583_v15 = vpack.c.bf16 %v2074_v13, %v2073_v11  ;;  %v6819_v10 = vld [vmem:[%s9905_s11 + $0x324] ss:$8 sps:$4 sm:$0xff]   ;;  %v6814_v11 = vld [vmem:[%s9905_s11 + $0x30] ss:$8 sps:$4 sm:$0xff]   ;;  %v6817_v13 = vld [vmem:[%s9905_s11 + $0x320] ss:$8 sps:$4 sm:$0xff]  }
 0x84a   :  { %2886 = vmatpush1.bf16.msra.mxu0 %v6760_v24  ;;  %6584 = vmatprep.subr.bf16.mxu1 %v6583_v15  ;;  %v6792_v24 = vld [vmem:[%s9905_s11 + $0x1d4] ss:$8 sps:$4 sm:$0xff]   ;;  %v6822_v15 = vld [vmem:[%s9905_s11 + $0x44] ss:$8 sps:$4 sm:$0xff]  }
 0x84b   :  { %2887 = vmatprep.subr.bf16.mxu0 %v6765_v29  ;;  %v2077_v29 = vld [vmem:[%s9904_s10 + $0xf0] sm:$0xff] }
 0x84c   :  { %6586 = vmatpush3.bf16.msra.mxu1 %v6585_v12  ;;  %v6829_v12 = vld [vmem:[%s9905_s11 + $0x340] ss:$8 sps:$4 sm:$0xff]  }
 0x84d   :  { %6588 = vmatprep.subr.bf16.mxu1 %v6587_v20  ;;  %v6834_v20 = vld [vmem:[%s9905_s11 + $0x64] ss:$8 sps:$4 sm:$0xff]  }
 0x84e   :  { %2888 = vmatpush1.bf16.msra.mxu0 %v6763_v55  ;;  %v6795_v55 = vld [vmem:[%s9905_s11 + $0x1e4] ss:$8 sps:$4 sm:$0xff]  }
 0x84f   :  { %2889 = vmatprep.subr.bf16.mxu0 %v6768_v30  ;;  %v6591_v30 = vpack.c.bf16 %v2078_v63, %v2077_v29  ;;  %v6843_v29 = vld [vmem:[%s9905_s11 + $0x364] ss:$8 sps:$4 sm:$0xff]   ;;  %v6838_v63 = vld [vmem:[%s9905_s11 + $0x70] ss:$8 sps:$4 sm:$0xff]  }
 0x850   :  { %6590 = vmatpush3.bf16.msra.mxu1 %v6589_v14  ;;  %v6841_v14 = vld [vmem:[%s9905_s11 + $0x360] ss:$8 sps:$4 sm:$0xff]  }
 0x851   :  { %6592 = vmatprep.subr.bf16.mxu1 %v6591_v30  ;;  %v6849_v30 = vld [vmem:[%s9905_s11 + $0x374] ss:$8 sps:$4 sm:$0xff]  }
 0x852   :  { %2890 = vmatpush1.bf16.msra.mxu0 %v6766_v31  ;;  %v2061_v31 = vld [vmem:[%s9904_s10 + $0x70] sm:$0xff] }
 0x853   :  { %2891 = vmatprep.subr.bf16.mxu0 %v6771_v33  ;;  %v2062_v33 = vld [vmem:[%s9904_s10 + $0x78] sm:$0xff] }
 0x856   :  { %2892 = vmatpush1.bf16.msra.mxu0 %v6769_v34  ;;  %v6793_v34 = vld [vmem:[%s9905_s11 + $0x1e0] ss:$8 sps:$4 sm:$0xff]  }
 0x857   :  { %2893 = vmatprep.subr.bf16.mxu0 %v6774_v35  ;;  %v6593_v35 = vpack.c.bf16 %v2062_v33, %v2061_v31  ;;  %v6844_v31 = vld [vmem:[%s9905_s11 + $0x80] ss:$8 sps:$4 sm:$0xff]   ;;  %v6847_v33 = vld [vmem:[%s9905_s11 + $0x370] ss:$8 sps:$4 sm:$0xff]  }
 0x859   :  { %6594 = vmatpush3.bf16.msra.mxu1 %v6593_v35  ;;  %v6855_v35 = vld [vmem:[%s9905_s11 + $0x384] ss:$8 sps:$4 sm:$0xff]  }
 0x85a   :  { %2894 = vmatpush1.bf16.msra.mxu0 %v6772_v42  ;;  %v6798_v42 = vld [vmem:[%s9905_s11 + $0x4] ss:$8 sps:$4 sm:$0xff]  }
 0x85b   :  { %2895 = vmatprep.subr.bf16.mxu0 %v6777_v46  ;;  %v6801_v46 = vld [vmem:[%s9905_s11 + $0x1f4] ss:$8 sps:$4 sm:$0xff]   ;;  %2471 = vmatprep.subr.bf16.mxu1 %v6798_v42  ;;  %v6850_v42 = vld [vmem:[%s9905_s11 + $0x90] ss:$8 sps:$4 sm:$0xff]  }
 0x85e   :  { %2896 = vmatpush1.bf16.msra.mxu0 %v6775_v40  ;;  %v6799_v40 = vld [vmem:[%s9905_s11 + $0x1f0] ss:$8 sps:$4 sm:$0xff]  }
 0x85f   :  { %2897 = vmatprep.subr.bf16.mxu0 %v6780_v43  ;;  %v6807_v43 = vld [vmem:[%s9905_s11 + $0x304] ss:$8 sps:$4 sm:$0xff]  }
 0x862   :  { %2898 = vmatpush1.bf16.msra.mxu0 %v6778_v44 }
 0x863   :  { %2899 = vmatprep.subr.bf16.mxu0 %v6783_v47 }
 0x866   :  { %2900 = vmatpush1.bf16.msra.mxu0 %v6781_v49 }
 0x867   :  { %2901 = vmatprep.subr.bf16.mxu0 %v6786_v45  ;;  %v6813_v45 = vld [vmem:[%s9905_s11 + $0x314] ss:$8 sps:$4 sm:$0xff]  }
 0x86a   :  { %2902 = vmatpush1.bf16.msra.mxu0 %v6784_v9  ;;  %v6816_v9 = vld [vmem:[%s9905_s11 + $0x34] ss:$8 sps:$4 sm:$0xff]  }
 0x86b   :  { %2903 = vmatprep.subr.bf16.mxu0 %v6789_v17  ;;  %v6820_v17 = vld [vmem:[%s9905_s11 + $0x40] ss:$8 sps:$4 sm:$0xff]  }
 0x86e   :  { %2904 = vmatpush1.bf16.msra.mxu0 %v6787_v16  ;;  %v6825_v16 = vld [vmem:[%s9905_s11 + $0x334] ss:$8 sps:$4 sm:$0xff]  }
 0x86f   :  { %2905 = vmatprep.subr.bf16.mxu0 %v6792_v24  ;;  %v6832_v24 = vld [vmem:[%s9905_s11 + $0x60] ss:$8 sps:$4 sm:$0xff]  }
 0x872   :  { %2906 = vmatpush1.bf16.msra.mxu0 %v6790_v22  ;;  %v6837_v22 = vld [vmem:[%s9905_s11 + $0x354] ss:$8 sps:$4 sm:$0xff]  }
 0x873   :  { %2907 = vmatprep.subr.bf16.mxu0 %v6795_v55  ;;  %v6846_v55 = vld [vmem:[%s9905_s11 + $0x84] ss:$8 sps:$4 sm:$0xff]  }
 0x876   :  { %2908 = vmatpush1.bf16.msra.mxu0 %v6793_v34  ;;  %v6852_v34 = vld [vmem:[%s9905_s11 + $0x94] ss:$8 sps:$4 sm:$0xff]  }
 0x877   :  { %2909 = vmatprep.subr.bf16.mxu0 %v6801_v46  ;;  %v6853_v46 = vld [vmem:[%s9905_s11 + $0x380] ss:$8 sps:$4 sm:$0xff]  }
 0x87a   :  { %2910 = vmatpush1.bf16.msra.mxu0 %v6799_v40  ;;  %v6858_v40 = vld [vmem:[%s9905_s11 + $0xa4] ss:$8 sps:$4 sm:$0xff]  }
 0x87b   :  { %3693 = vmatprep.subr.bf16.mxu0 %v6807_v43  ;;  %v6861_v43 = vld [vmem:[%s9905_s11 + $0x394] ss:$8 sps:$4 sm:$0xff]  }
 0x910   :  { %v1996_v50 = vpop.f32.mrb[24].mxu0 }
 0x911   :  { %v8535_v53 = vadd.f32 %v7471_v51, %v1996_v50  ;;  %v1998_v54 = vpop.f32.mrb[25].mxu0 }
 0x912   :  { %v8540_v59 = vadd.f32 %v7472_v57, %v1998_v54  ;;  %v2000_v61 = vpop.f32.mrb[26].mxu0  ;;  %v2029_v57 = vld [vmem:[%s9903_s9] sm:$0x3] }
 0x913   :  { %v8545_v0 = vadd.f32 %v7473_v56, %v2000_v61  ;;  %v2002_v1 = vpop.f32.mrb[27].mxu0  ;;  %v2009_v36 = vmul.f32 %v8535_v53, %v8535_v53  ;;  %v2034_v61 = vrot.slane %v2029_v57, %v75_v28  ;;  %v2038_v56 = vrot.slane %v2029_v57, %v79_v27  ;;  %v6870_v57 = vld [vmem:[%s9905_s11 + $0xc4] ss:$8 sps:$4 sm:$0xff]  }
 0x914   :  { %v8552_v37 = vadd.f32 %v7474_v2, %v2002_v1  ;;  %v2010_v60 = vmul.f32 %v8540_v59, %v8540_v59 }
 0x915   :  { %v2011_v3 = vmul.f32 %v8545_v0, %v8545_v0 }
 0x916   :  { %v2013_v21 = vadd.f32 %v2010_v60, %v2009_v36  ;;  %v2012_v38 = vmul.f32 %v8552_v37, %v8552_v37 }
 0x918   :  { %2014 = vadd.xlane.f32.xlu0 %v2013_v21  ;;  %v2016_v39 = vadd.f32 %v2012_v38, %v2011_v3  ;;  %v6796_v21 = vld [vmem:[%s9905_s11] ss:$8 sps:$4 sm:$0xff]  }
 0x91a   :  { %2017 = vadd.xlane.f32.xlu1 %v2016_v39 }
 0x9a5   :  { %v2015_v44 = vpop.xlane.xlu0 %2014 }
 0x9a6   :  { %v2019_v47 = vmul.f32 0.00390625, %v2015_v44  ;;  %v6856_v44 = vld [vmem:[%s9905_s11 + $0xa0] ss:$8 sps:$4 sm:$0xff]  }
 0x9a7   :  { %v2018_v49 = vpop.xlane.xlu1 %2017 }
 0x9a8   :  { %v2021_v50 = vadd.f32 1e-06, %v2019_v47  ;;  %v2020_v51 = vmul.f32 0.00390625, %v2018_v49  ;;  %v6859_v47 = vld [vmem:[%s9905_s11 + $0x390] ss:$8 sps:$4 sm:$0xff]  }
 0x9a9   :  { %v6864_v49 = vld [vmem:[%s9905_s11 + $0xb4] ss:$8 sps:$4 sm:$0xff]  }
 0x9aa   :  { %7387 = vrsqrt.f32 %v2021_v50  ;;  %v2022_v54 = vadd.f32 1e-06, %v2020_v51  ;;  %v6867_v50 = vld [vmem:[%s9905_s11 + $0x3a4] ss:$8 sps:$4 sm:$0xff]   ;;  %v6862_v51 = vld [vmem:[%s9905_s11 + $0xb0] ss:$8 sps:$4 sm:$0xff]  }
 0x9ac   :  { %7389 = vrsqrt.f32 %v2022_v54  ;;  %v6865_v54 = vld [vmem:[%s9905_s11 + $0x3a0] ss:$8 sps:$4 sm:$0xff]  }
 0x9b4   :  { %v7388_v1 = vpop.eup %7387 }
 0x9b5   :  { %v2026_v36 = vmul.f32 %v7388_v1, %v8540_v59  ;;  %v2025_v2 = vmul.f32 %v7388_v1, %v8535_v53  ;;  %v6871_v1 = vld [vmem:[%s9905_s11 + $0x3b0] ss:$8 sps:$4 sm:$0xff]  }
 0x9b6   :  { %v7390_v60 = vpop.eup %7389 }
 0x9b7   :  { %v2042_v3 = vmul.f32 %v2038_v56, %v2026_v36  ;;  %v2041_v38 = vmul.f32 %v2034_v61, %v2025_v2  ;;  %v2028_v39 = vmul.f32 %v7390_v60, %v8552_v37  ;;  %v2027_v58 = vmul.f32 %v7390_v60, %v8545_v0  ;;  %v6876_v36 = vld [vmem:[%s9905_s11 + $0xd4] ss:$8 sps:$4 sm:$0xff]   ;;  %v6879_v2 = vld [vmem:[%s9905_s11 + $0x3c4] ss:$8 sps:$4 sm:$0xff]   ;;  %v6874_v60 = vld [vmem:[%s9905_s11 + $0xd0] ss:$8 sps:$4 sm:$0xff]  }
 0x9b9   :  { %2143 = vmatprep.mubr.f32.mxu1 %v2042_v3  ;;  %v2044_v27 = vmul.f32 %v2038_v56, %v2028_v39  ;;  %v2043_v28 = vmul.f32 %v2034_v61, %v2027_v58  ;;  %v6873_v61 = vld [vmem:[%s9905_s11 + $0x3b4] ss:$8 sps:$4 sm:$0xff]   ;;  %v6868_v56 = vld [vmem:[%s9905_s11 + $0xc0] ss:$8 sps:$4 sm:$0xff]   ;;  %v6883_v58 = vld [vmem:[%s9905_s11 + $0x3d0] ss:$8 sps:$4 sm:$0xff]  }
 0x9ba   :  { %2144 = vmatmul.mubr.f32.vlgmr.msra.gmra.mrb[8].mxu1 %v2041_v38  ;;  %v6880_v39 = vld [vmem:[%s9905_s11 + $0xe0] ss:$8 sps:$4 sm:$0xff]  }
 0x9bb   :  { %2472 = vmatpush1.bf16.msra.mxu1 %v6796_v21  ;;  %v8667_v4 = vpack.c.bf16 %v2044_v27, %v2042_v3  ;;  %2148 = vmatprep.mubr.f32.mxu1 %v2044_v27  ;;  %v8675_v7 = vpack.c.bf16 %v2043_v28, %v2041_v38  ;;  %v6877_v3 = vld [vmem:[%s9905_s11 + $0x3c0] ss:$8 sps:$4 sm:$0xff]   ;;  %v6882_v21 = vld [vmem:[%s9905_s11 + $0xe4] ss:$8 sps:$4 sm:$0xff]   ;;  %v6885_v38 = vld [vmem:[%s9905_s11 + $0x3d4] ss:$8 sps:$4 sm:$0xff]  }
 0x9bc   :  { %2473 = vmatprep.subr.bf16.mxu1 %v6804_v25  ;;  %v6888_v25 = vld [vmem:[%s9905_s11 + $0xf4] ss:$8 sps:$4 sm:$0xff]   ;;  %v6891_v27 = vld [vmem:[%s9905_s11 + $0x3e4] ss:$8 sps:$4 sm:$0xff]  }
 0x9bd   :  { %2911 = vmatprep.mubr.bf16.mxu0 %v8667_v4 }
 0x9be   :  { %2149 = vmatmul.mubr.f32.gmra.mrb[10].mxu1 %v2043_v28  ;;  %2912 = vmatmul.mubr.bf16.vlgmr.msra.gmra.mrb[28].mxu0 %v8675_v7  ;;  %v6886_v28 = vld [vmem:[%s9905_s11 + $0xf0] ss:$8 sps:$4 sm:$0xff]  }
 0x9bf   :  { %2474 = vmatpush1.bf16.msra.mxu1 %v6802_v5  ;;  %3694 = vmatpush1.bf16.msra.mxu0 %v6805_v6  ;;  %v6889_v5 = vld [vmem:[%s9905_s11 + $0x3e0] ss:$8 sps:$4 sm:$0xff]   ;;  %v6894_v6 = vld [vmem:[%s9905_s11 + $0x3f4] ss:$8 sps:$4 sm:$0xff]  }
 0x9c0   :  { %2503 = vmatprep.mubr.bf16.mxu1 %v8667_v4  ;;  %3725 = vmatprep.mubr.bf16.mxu0 %v8667_v4 }
 0x9c1   :  { %2475 = vmatprep.subr.bf16.mxu1 %v6810_v52  ;;  %3695 = vmatprep.subr.bf16.mxu0 %v6813_v45  ;;  %v6892_v52 = vld [vmem:[%s9905_s11 + $0x3f0] ss:$8 sps:$4 sm:$0xff]   ;;  %v6897_v45 = vld [vmem:[%s9905_s11 + $0x404] ss:$8 sps:$4 sm:$0xff]  }
 0x9c3   :  { %2476 = vmatpush1.bf16.msra.mxu1 %v6808_v48  ;;  %3696 = vmatpush1.bf16.msra.mxu0 %v6811_v8  ;;  %v6895_v48 = vld [vmem:[%s9905_s11 + $0x400] ss:$8 sps:$4 sm:$0xff]   ;;  %v6900_v8 = vld [vmem:[%s9905_s11 + $0x414] ss:$8 sps:$4 sm:$0xff]  }
 0x9c4   :  { %2477 = vmatprep.subr.bf16.mxu1 %v6816_v9  ;;  %3697 = vmatprep.subr.bf16.mxu0 %v6819_v10  ;;  %v6898_v9 = vld [vmem:[%s9905_s11 + $0x410] ss:$8 sps:$4 sm:$0xff]   ;;  %v6903_v10 = vld [vmem:[%s9905_s11 + $0x424] ss:$8 sps:$4 sm:$0xff]  }
 0x9c7   :  { %2478 = vmatpush1.bf16.msra.mxu1 %v6814_v11  ;;  %3698 = vmatpush1.bf16.msra.mxu0 %v6817_v13  ;;  %v6901_v11 = vld [vmem:[%s9905_s11 + $0x420] ss:$8 sps:$4 sm:$0xff]   ;;  %v6906_v13 = vld [vmem:[%s9905_s11 + $0x434] ss:$8 sps:$4 sm:$0xff]  }
 0x9c8   :  { %2479 = vmatprep.subr.bf16.mxu1 %v6822_v15  ;;  %3699 = vmatprep.subr.bf16.mxu0 %v6825_v16  ;;  %v6904_v15 = vld [vmem:[%s9905_s11 + $0x430] ss:$8 sps:$4 sm:$0xff]   ;;  %v6909_v16 = vld [vmem:[%s9905_s11 + $0x444] ss:$8 sps:$4 sm:$0xff]  }
 0x9cb   :  { %2480 = vmatpush1.bf16.msra.mxu1 %v6820_v17  ;;  %3700 = vmatpush1.bf16.msra.mxu0 %v6823_v18  ;;  %v6907_v17 = vld [vmem:[%s9905_s11 + $0x440] ss:$8 sps:$4 sm:$0xff]   ;;  %v6912_v18 = vld [vmem:[%s9905_s11 + $0x454] ss:$8 sps:$4 sm:$0xff]  }
 0x9cc   :  { %2481 = vmatprep.subr.bf16.mxu1 %v6828_v19  ;;  %3701 = vmatprep.subr.bf16.mxu0 %v6831_v32  ;;  %v6910_v19 = vld [vmem:[%s9905_s11 + $0x450] ss:$8 sps:$4 sm:$0xff]   ;;  %v6915_v32 = vld [vmem:[%s9905_s11 + $0x464] ss:$8 sps:$4 sm:$0xff]  }
 0x9cf   :  { %2482 = vmatpush1.bf16.msra.mxu1 %v6826_v62  ;;  %3702 = vmatpush1.bf16.msra.mxu0 %v6829_v12  ;;  %v6913_v62 = vld [vmem:[%s9905_s11 + $0x460] ss:$8 sps:$4 sm:$0xff]   ;;  %v6918_v12 = vld [vmem:[%s9905_s11 + $0x474] ss:$8 sps:$4 sm:$0xff]  }
 0x9d0   :  { %2483 = vmatprep.subr.bf16.mxu1 %v6834_v20  ;;  %3703 = vmatprep.subr.bf16.mxu0 %v6837_v22  ;;  %v6916_v20 = vld [vmem:[%s9905_s11 + $0x470] ss:$8 sps:$4 sm:$0xff]   ;;  %v6921_v22 = vld [vmem:[%s9905_s11 + $0x484] ss:$8 sps:$4 sm:$0xff]  }
 0x9d3   :  { %2484 = vmatpush1.bf16.msra.mxu1 %v6832_v24  ;;  %3704 = vmatpush1.bf16.msra.mxu0 %v6835_v41  ;;  %v6919_v24 = vld [vmem:[%s9905_s11 + $0x480] ss:$8 sps:$4 sm:$0xff]   ;;  %v6924_v41 = vld [vmem:[%s9905_s11 + $0x494] ss:$8 sps:$4 sm:$0xff]  }
 0x9d4   :  { %2485 = vmatprep.subr.bf16.mxu1 %v6840_v26  ;;  %3705 = vmatprep.subr.bf16.mxu0 %v6843_v29  ;;  %v6922_v26 = vld [vmem:[%s9905_s11 + $0x490] ss:$8 sps:$4 sm:$0xff]   ;;  %v6927_v29 = vld [vmem:[%s9905_s11 + $0x4a4] ss:$8 sps:$4 sm:$0xff]  }
 0x9d7   :  { %2486 = vmatpush1.bf16.msra.mxu1 %v6838_v63  ;;  %3706 = vmatpush1.bf16.msra.mxu0 %v6841_v14  ;;  %v6925_v63 = vld [vmem:[%s9905_s11 + $0x4a0] ss:$8 sps:$4 sm:$0xff]   ;;  %v6930_v14 = vld [vmem:[%s9905_s11 + $0x4b4] ss:$8 sps:$4 sm:$0xff]  }
 0x9d8   :  { %2487 = vmatprep.subr.bf16.mxu1 %v6846_v55  ;;  %3707 = vmatprep.subr.bf16.mxu0 %v6849_v30  ;;  %v6928_v55 = vld [vmem:[%s9905_s11 + $0x4b0] ss:$8 sps:$4 sm:$0xff]   ;;  %v6933_v30 = vld [vmem:[%s9905_s11 + $0x4c4] ss:$8 sps:$4 sm:$0xff]  }
 0x9db   :  { %2488 = vmatpush1.bf16.msra.mxu1 %v6844_v31  ;;  %3708 = vmatpush1.bf16.msra.mxu0 %v6847_v33  ;;  %v6931_v31 = vld [vmem:[%s9905_s11 + $0x4c0] ss:$8 sps:$4 sm:$0xff]   ;;  %v6936_v33 = vld [vmem:[%s9905_s11 + $0x4d4] ss:$8 sps:$4 sm:$0xff]  }
 0x9dc   :  { %2489 = vmatprep.subr.bf16.mxu1 %v6852_v34  ;;  %3709 = vmatprep.subr.bf16.mxu0 %v6855_v35  ;;  %v6934_v34 = vld [vmem:[%s9905_s11 + $0x4d0] ss:$8 sps:$4 sm:$0xff]   ;;  %v6939_v35 = vld [vmem:[%s9905_s11 + $0x4e4] ss:$8 sps:$4 sm:$0xff]  }
 0x9df   :  { %2490 = vmatpush1.bf16.msra.mxu1 %v6850_v42  ;;  %3710 = vmatpush1.bf16.msra.mxu0 %v6853_v46  ;;  %v6937_v42 = vld [vmem:[%s9905_s11 + $0x4e0] ss:$8 sps:$4 sm:$0xff]   ;;  %v6942_v46 = vld [vmem:[%s9905_s11 + $0x4f4] ss:$8 sps:$4 sm:$0xff]  }
 0x9e0   :  { %2491 = vmatprep.subr.bf16.mxu1 %v6858_v40  ;;  %3711 = vmatprep.subr.bf16.mxu0 %v6861_v43  ;;  %v6940_v40 = vld [vmem:[%s9905_s11 + $0x4f0] ss:$8 sps:$4 sm:$0xff]   ;;  %v6945_v43 = vld [vmem:[%s9905_s11 + $0x504] ss:$8 sps:$4 sm:$0xff]  }
 0x9e3   :  { %2492 = vmatpush1.bf16.msra.mxu1 %v6856_v44  ;;  %3712 = vmatpush1.bf16.msra.mxu0 %v6859_v47  ;;  %v6943_v44 = vld [vmem:[%s9905_s11 + $0x500] ss:$8 sps:$4 sm:$0xff]   ;;  %v6948_v47 = vld [vmem:[%s9905_s11 + $0x514] ss:$8 sps:$4 sm:$0xff]  }
 0x9e4   :  { %2493 = vmatprep.subr.bf16.mxu1 %v6864_v49  ;;  %3713 = vmatprep.subr.bf16.mxu0 %v6867_v50  ;;  %v6946_v49 = vld [vmem:[%s9905_s11 + $0x510] ss:$8 sps:$4 sm:$0xff]   ;;  %v6951_v50 = vld [vmem:[%s9905_s11 + $0x524] ss:$8 sps:$4 sm:$0xff]  }
 0x9e7   :  { %2494 = vmatpush1.bf16.msra.mxu1 %v6862_v51  ;;  %3714 = vmatpush1.bf16.msra.mxu0 %v6865_v54  ;;  %v6949_v51 = vld [vmem:[%s9905_s11 + $0x520] ss:$8 sps:$4 sm:$0xff]   ;;  %v6954_v54 = vld [vmem:[%s9905_s11 + $0x534] ss:$8 sps:$4 sm:$0xff]  }
 0x9e8   :  { %2495 = vmatprep.subr.bf16.mxu1 %v6870_v57  ;;  %3715 = vmatprep.subr.bf16.mxu0 %v6873_v61  ;;  %v6952_v57 = vld [vmem:[%s9905_s11 + $0x530] ss:$8 sps:$4 sm:$0xff]   ;;  %v6957_v61 = vld [vmem:[%s9905_s11 + $0x544] ss:$8 sps:$4 sm:$0xff]  }
 0x9eb   :  { %2496 = vmatpush1.bf16.msra.mxu1 %v6868_v56  ;;  %3716 = vmatpush1.bf16.msra.mxu0 %v6871_v1  ;;  %v6955_v56 = vld [vmem:[%s9905_s11 + $0x540] ss:$8 sps:$4 sm:$0xff]   ;;  %v6960_v1 = vld [vmem:[%s9905_s11 + $0x554] ss:$8 sps:$4 sm:$0xff]  }
 0x9ec   :  { %2497 = vmatprep.subr.bf16.mxu1 %v6876_v36  ;;  %3717 = vmatprep.subr.bf16.mxu0 %v6879_v2  ;;  %v6958_v36 = vld [vmem:[%s9905_s11 + $0x550] ss:$8 sps:$4 sm:$0xff]   ;;  %v6963_v2 = vld [vmem:[%s9905_s11 + $0x564] ss:$8 sps:$4 sm:$0xff]  }
 0x9ef   :  { %2498 = vmatpush1.bf16.msra.mxu1 %v6874_v60  ;;  %3718 = vmatpush1.bf16.msra.mxu0 %v6877_v3  ;;  %v6961_v60 = vld [vmem:[%s9905_s11 + $0x560] ss:$8 sps:$4 sm:$0xff]   ;;  %v6966_v3 = vld [vmem:[%s9905_s11 + $0x574] ss:$8 sps:$4 sm:$0xff]  }
 0x9f0   :  { %2499 = vmatprep.subr.bf16.mxu1 %v6882_v21  ;;  %3719 = vmatprep.subr.bf16.mxu0 %v6885_v38  ;;  %v6964_v21 = vld [vmem:[%s9905_s11 + $0x570] ss:$8 sps:$4 sm:$0xff]   ;;  %v6969_v38 = vld [vmem:[%s9905_s11 + $0x584] ss:$8 sps:$4 sm:$0xff]  }
 0x9f3   :  { %2500 = vmatpush1.bf16.msra.mxu1 %v6880_v39  ;;  %3720 = vmatpush1.bf16.msra.mxu0 %v6883_v58  ;;  %v6967_v39 = vld [vmem:[%s9905_s11 + $0x580] ss:$8 sps:$4 sm:$0xff]   ;;  %v6972_v58 = vld [vmem:[%s9905_s11 + $0x594] ss:$8 sps:$4 sm:$0xff]  }
 0x9f4   :  { %2501 = vmatprep.subr.bf16.mxu1 %v6888_v25  ;;  %3721 = vmatprep.subr.bf16.mxu0 %v6891_v27  ;;  %v6970_v25 = vld [vmem:[%s9905_s11 + $0x590] ss:$8 sps:$4 sm:$0xff]   ;;  %v6975_v27 = vld [vmem:[%s9905_s11 + $0x5a4] ss:$8 sps:$4 sm:$0xff]  }
 0x9f7   :  { %2502 = vmatpush1.bf16.msra.mxu1 %v6886_v28  ;;  %3722 = vmatpush1.bf16.msra.mxu0 %v6889_v5  ;;  %v6973_v28 = vld [vmem:[%s9905_s11 + $0x5a0] ss:$8 sps:$4 sm:$0xff]   ;;  %v6978_v5 = vld [vmem:[%s9905_s11 + $0x5b4] ss:$8 sps:$4 sm:$0xff]  }
 0x9f8   :  { %3723 = vmatprep.subr.bf16.mxu0 %v6894_v6  ;;  %v6976_v6 = vld [vmem:[%s9905_s11 + $0x5b0] ss:$8 sps:$4 sm:$0xff]  }
 0x9fa   :  { %2504 = vmatmul.mubr.bf16.vlgmr.msra.gmra.mrb[12].mxu1 %v8675_v7 }
 0x9fb   :  { %3724 = vmatpush1.bf16.msra.mxu0 %v6892_v52  ;;  %v6981_v52 = vld [vmem:[%s9905_s11 + $0x5c4] ss:$8 sps:$4 sm:$0xff]  }
 0x9fc   :  { %4100 = vmatprep.subr.bf16.mxu0 %v6897_v45  ;;  %v6979_v45 = vld [vmem:[%s9905_s11 + $0x5c0] ss:$8 sps:$4 sm:$0xff]  }
 0x9fe   :  { %3726 = vmatmul.mubr.bf16.vlgmr.msra.gmra.mrb[32].mxu0 %v8675_v7 }
 0x9ff   :  { %4101 = vmatpush1.bf16.msra.mxu0 %v6895_v48  ;;  %4132 = vmatprep.mubr.bf16.mxu0 %v8667_v4  ;;  %v6984_v48 = vld [vmem:[%s9905_s11 + $0x5d4] ss:$8 sps:$4 sm:$0xff]  }
 0xa00   :  { %4102 = vmatprep.subr.bf16.mxu0 %v6900_v8  ;;  %v6982_v8 = vld [vmem:[%s9905_s11 + $0x5d0] ss:$8 sps:$4 sm:$0xff]  }
 0xa03   :  { %4103 = vmatpush1.bf16.msra.mxu0 %v6898_v9  ;;  %v6987_v9 = vld [vmem:[%s9905_s11 + $0x5e4] ss:$8 sps:$4 sm:$0xff]  }
 0xa04   :  { %4104 = vmatprep.subr.bf16.mxu0 %v6903_v10  ;;  %v6985_v10 = vld [vmem:[%s9905_s11 + $0x5e0] ss:$8 sps:$4 sm:$0xff]  }
 0xa07   :  { %4105 = vmatpush1.bf16.msra.mxu0 %v6901_v11  ;;  %v6990_v11 = vld [vmem:[%s9905_s11 + $0x5f4] ss:$8 sps:$4 sm:$0xff]  }
 0xa08   :  { %4106 = vmatprep.subr.bf16.mxu0 %v6906_v13  ;;  %v6988_v13 = vld [vmem:[%s9905_s11 + $0x5f0] ss:$8 sps:$4 sm:$0xff]  }
 0xa0b   :  { %4107 = vmatpush1.bf16.msra.mxu0 %v6904_v15  ;;  %v6993_v15 = vld [vmem:[%s9905_s11 + $0x704] ss:$8 sps:$4 sm:$0xff]  }
 0xa0c   :  { %4108 = vmatprep.subr.bf16.mxu0 %v6909_v16  ;;  %v6991_v16 = vld [vmem:[%s9905_s11 + $0x700] ss:$8 sps:$4 sm:$0xff]  }
 0xa0f   :  { %4109 = vmatpush1.bf16.msra.mxu0 %v6907_v17  ;;  %v6996_v17 = vld [vmem:[%s9905_s11 + $0x714] ss:$8 sps:$4 sm:$0xff]  }
 0xa10   :  { %4110 = vmatprep.subr.bf16.mxu0 %v6912_v18  ;;  %v6994_v18 = vld [vmem:[%s9905_s11 + $0x710] ss:$8 sps:$4 sm:$0xff]  }
 0xa13   :  { %4111 = vmatpush1.bf16.msra.mxu0 %v6910_v19  ;;  %v6999_v19 = vld [vmem:[%s9905_s11 + $0x724] ss:$8 sps:$4 sm:$0xff]  }
 0xa14   :  { %4112 = vmatprep.subr.bf16.mxu0 %v6915_v32  ;;  %v6997_v32 = vld [vmem:[%s9905_s11 + $0x720] ss:$8 sps:$4 sm:$0xff]  }
 0xa17   :  { %4113 = vmatpush1.bf16.msra.mxu0 %v6913_v62  ;;  %v7002_v62 = vld [vmem:[%s9905_s11 + $0x734] ss:$8 sps:$4 sm:$0xff]  }
 0xa18   :  { %4114 = vmatprep.subr.bf16.mxu0 %v6918_v12  ;;  %v7000_v12 = vld [vmem:[%s9905_s11 + $0x730] ss:$8 sps:$4 sm:$0xff]  }
 0xa1b   :  { %4115 = vmatpush1.bf16.msra.mxu0 %v6916_v20  ;;  %v7005_v20 = vld [vmem:[%s9905_s11 + $0x744] ss:$8 sps:$4 sm:$0xff]  }
 0xa1c   :  { %4116 = vmatprep.subr.bf16.mxu0 %v6921_v22  ;;  %v7003_v22 = vld [vmem:[%s9905_s11 + $0x740] ss:$8 sps:$4 sm:$0xff]  }
 0xa1f   :  { %4117 = vmatpush1.bf16.msra.mxu0 %v6919_v24  ;;  %v7008_v24 = vld [vmem:[%s9905_s11 + $0x754] ss:$8 sps:$4 sm:$0xff]  }
 0xa20   :  { %4118 = vmatprep.subr.bf16.mxu0 %v6924_v41 }
 0xa23   :  { %4119 = vmatpush1.bf16.msra.mxu0 %v6922_v26 }
 0xa24   :  { %4120 = vmatprep.subr.bf16.mxu0 %v6927_v29 }
 0xa27   :  { %4121 = vmatpush1.bf16.msra.mxu0 %v6925_v63  ;;  %v7006_v63 = vld [vmem:[%s9905_s11 + $0x750] ss:$8 sps:$4 sm:$0xff]  }
 0xa28   :  { %4122 = vmatprep.subr.bf16.mxu0 %v6930_v14  ;;  %v7011_v14 = vld [vmem:[%s9905_s11 + $0x764] ss:$8 sps:$4 sm:$0xff]  }
 0xa2b   :  { %4123 = vmatpush1.bf16.msra.mxu0 %v6928_v55 }
 0xa2c   :  { %4124 = vmatprep.subr.bf16.mxu0 %v6933_v30 }
 0xa2f   :  { %4125 = vmatpush1.bf16.msra.mxu0 %v6931_v31 }
 0xa30   :  { %4126 = vmatprep.subr.bf16.mxu0 %v6936_v33 }
 0xa33   :  { %4127 = vmatpush1.bf16.msra.mxu0 %v6934_v34 }
 0xa34   :  { %4128 = vmatprep.subr.bf16.mxu0 %v6939_v35 }
 0xa37   :  { %4129 = vmatpush1.bf16.msra.mxu0 %v6937_v42 }
 0xa38   :  { %4130 = vmatprep.subr.bf16.mxu0 %v6942_v46 }
 0xa3b   :  { %4131 = vmatpush1.bf16.msra.mxu0 %v6940_v40  ;;  %v7009_v40 = vld [vmem:[%s9905_s11 + $0x760] ss:$8 sps:$4 sm:$0xff]  }
 0xa3c   :  { %4507 = vmatprep.subr.bf16.mxu0 %v6945_v43 }
 0xa3e   :  { %4133 = vmatmul.mubr.bf16.vlgmr.msra.gmra.mrb[36].mxu0 %v8675_v7 }
 0xa3f   :  { %4508 = vmatpush1.bf16.msra.mxu0 %v6943_v44  ;;  %4539 = vmatprep.mubr.bf16.mxu0 %v8667_v4 }
 0xa40   :  { %4509 = vmatprep.subr.bf16.mxu0 %v6948_v47  ;;  %v7014_v47 = vld [vmem:[%s9905_s11 + $0x774] ss:$8 sps:$4 sm:$0xff]  }
 0xa43   :  { %4510 = vmatpush1.bf16.msra.mxu0 %v6946_v49 }
 0xa44   :  { %4511 = vmatprep.subr.bf16.mxu0 %v6951_v50  ;;  %v7012_v50 = vld [vmem:[%s9905_s11 + $0x770] ss:$8 sps:$4 sm:$0xff]  }
 0xa47   :  { %4512 = vmatpush1.bf16.msra.mxu0 %v6949_v51  ;;  %v7017_v51 = vld [vmem:[%s9905_s11 + $0x784] ss:$8 sps:$4 sm:$0xff]  }
 0xa48   :  { %4513 = vmatprep.subr.bf16.mxu0 %v6954_v54  ;;  %v7015_v54 = vld [vmem:[%s9905_s11 + $0x780] ss:$8 sps:$4 sm:$0xff]  }
 0xa4b   :  { %4514 = vmatpush1.bf16.msra.mxu0 %v6952_v57  ;;  %v7020_v57 = vld [vmem:[%s9905_s11 + $0x794] ss:$8 sps:$4 sm:$0xff]  }
 0xa4c   :  { %4515 = vmatprep.subr.bf16.mxu0 %v6957_v61 }
 0xa4f   :  { %4516 = vmatpush1.bf16.msra.mxu0 %v6955_v56 }
 0xa50   :  { %4517 = vmatprep.subr.bf16.mxu0 %v6960_v1  ;;  %v7018_v1 = vld [vmem:[%s9905_s11 + $0x790] ss:$8 sps:$4 sm:$0xff]  }
 0xa53   :  { %4518 = vmatpush1.bf16.msra.mxu0 %v6958_v36 }
 0xa54   :  { %4519 = vmatprep.subr.bf16.mxu0 %v6963_v2  ;;  %v7023_v2 = vld [vmem:[%s9905_s11 + $0x7a4] ss:$8 sps:$4 sm:$0xff]  }
 0xa57   :  { %4520 = vmatpush1.bf16.msra.mxu0 %v6961_v60 }
 0xa58   :  { %4521 = vmatprep.subr.bf16.mxu0 %v6966_v3  ;;  %v7021_v3 = vld [vmem:[%s9905_s11 + $0x7a0] ss:$8 sps:$4 sm:$0xff]  }
 0xa5b   :  { %4522 = vmatpush1.bf16.msra.mxu0 %v6964_v21  ;;  %v7026_v21 = vld [vmem:[%s9905_s11 + $0x7b4] ss:$8 sps:$4 sm:$0xff]  }
 0xa5c   :  { %4523 = vmatprep.subr.bf16.mxu0 %v6969_v38  ;;  %v7024_v38 = vld [vmem:[%s9905_s11 + $0x7b0] ss:$8 sps:$4 sm:$0xff]  }
 0xa5f   :  { %4524 = vmatpush1.bf16.msra.mxu0 %v6967_v39  ;;  %v7029_v39 = vld [vmem:[%s9905_s11 + $0x7c4] ss:$8 sps:$4 sm:$0xff]  }
 0xa60   :  { %4525 = vmatprep.subr.bf16.mxu0 %v6972_v58 }
 0xa63   :  { %4526 = vmatpush1.bf16.msra.mxu0 %v6970_v25  ;;  %v7027_v25 = vld [vmem:[%s9905_s11 + $0x7c0] ss:$8 sps:$4 sm:$0xff]  }
 0xa64   :  { %4527 = vmatprep.subr.bf16.mxu0 %v6975_v27 }
 0xa67   :  { %4528 = vmatpush1.bf16.msra.mxu0 %v6973_v28  ;;  %v7032_v28 = vld [vmem:[%s9905_s11 + $0x7d4] ss:$8 sps:$4 sm:$0xff]  }
 0xa68   :  { %4529 = vmatprep.subr.bf16.mxu0 %v6978_v5 }
 0xa6b   :  { %4530 = vmatpush1.bf16.msra.mxu0 %v6976_v6 }
 0xa6c   :  { %4531 = vmatprep.subr.bf16.mxu0 %v6981_v52 }
 0xa6f   :  { %4532 = vmatpush1.bf16.msra.mxu0 %v6979_v45  ;;  %v7030_v45 = vld [vmem:[%s9905_s11 + $0x7d0] ss:$8 sps:$4 sm:$0xff]  }
 0xa70   :  { %4533 = vmatprep.subr.bf16.mxu0 %v6984_v48 }
 0xa73   :  { %4534 = vmatpush1.bf16.msra.mxu0 %v6982_v8  ;;  %v7035_v8 = vld [vmem:[%s9905_s11 + $0x7e4] ss:$8 sps:$4 sm:$0xff]  }
 0xa74   :  { %4535 = vmatprep.subr.bf16.mxu0 %v6987_v9  ;;  %v7033_v9 = vld [vmem:[%s9905_s11 + $0x7e0] ss:$8 sps:$4 sm:$0xff]  }
 0xa77   :  { %4536 = vmatpush1.bf16.msra.mxu0 %v6985_v10  ;;  %v7038_v10 = vld [vmem:[%s9905_s11 + $0x7f4] ss:$8 sps:$4 sm:$0xff]  }
 0xa78   :  { %4537 = vmatprep.subr.bf16.mxu0 %v6990_v11  ;;  %v7036_v11 = vld [vmem:[%s9905_s11 + $0x7f0] ss:$8 sps:$4 sm:$0xff]  }
 0xa7b   :  { %4538 = vmatpush1.bf16.msra.mxu0 %v6988_v13 }
 0xa7c   :  { %5321 = vmatprep.subr.bf16.mxu0 %v6993_v15 }
 0xa7e   :  { %4540 = vmatmul.mubr.bf16.vlgmr.msra.gmra.mrb[40].mxu0 %v8675_v7 }
 0xa7f   :  { %5322 = vmatpush1.bf16.msra.mxu0 %v6991_v16  ;;  %5353 = vmatprep.mubr.bf16.mxu0 %v8667_v4 }
 0xa80   :  { %5323 = vmatprep.subr.bf16.mxu0 %v6996_v17 }
 0xa83   :  { %5324 = vmatpush1.bf16.msra.mxu0 %v6994_v18 }
 0xa84   :  { %5325 = vmatprep.subr.bf16.mxu0 %v6999_v19 }
 0xa87   :  { %5326 = vmatpush1.bf16.msra.mxu0 %v6997_v32 }
 0xa88   :  { %5327 = vmatprep.subr.bf16.mxu0 %v7002_v62 }
 0xa8b   :  { %5328 = vmatpush1.bf16.msra.mxu0 %v7000_v12 }
 0xa8c   :  { %5329 = vmatprep.subr.bf16.mxu0 %v7005_v20 }
 0xa8d   :  { %v6533_v41 = vpop.f32.mrb[8].mxu1 }
 0xa8e   :  { %v6534_v26 = vpop.f32.mrb[9].mxu1 }
 0xa8f   :  { %v9087_v29 = vadd.f32 %v6534_v26, %v6533_v41  ;;  %5330 = vmatpush1.bf16.msra.mxu0 %v7003_v22 }
 0xa90   :  { %5331 = vmatprep.subr.bf16.mxu0 %v7008_v24 }
 0xa91   :  { %v6536_v55 = vpop.f32.mrb[10].mxu1  ;;  %v2913_v30 = vpop.f32.mrb[28].mxu0  ;;  %v2155_v31 = vsel %vm2154_vm1, %v9087_v29, -inf }
 0xa92   :  { %v5867_v33 = vmul.f32 -1.442695, %v2913_v30  ;;  %2156 = vmax.xlane.f32.xlu0 %v2155_v31  ;;  %v6537_v34 = vpop.f32.mrb[11].mxu1  ;;  %v2915_v35 = vpop.f32.mrb[29].mxu0 }
 0xa93   :  { %v9097_v42 = vadd.f32 %v6537_v34, %v6536_v55  ;;  %5332 = vmatpush1.bf16.msra.mxu0 %v7006_v63  ;;  %v2917_v46 = vpop.f32.mrb[30].mxu0 }
 0xa94   :  { %7391 = vpow2.f32 %v5867_v33  ;;  %v5868_v43 = vmul.f32 -1.442695, %v2917_v46  ;;  %v2919_v44 = vpop.f32.mrb[31].mxu0  ;;  %5333 = vmatprep.subr.bf16.mxu0 %v7011_v14 }
 0xa95   :  { %v2158_v49 = vsel %vm2154_vm1, %v9097_v42, -inf }
 0xa96   :  { %7393 = vpow2.f32 %v5868_v43  ;;  %2159 = vmax.xlane.f32.xlu1 %v2158_v49 }
 0xa97   :  { %5334 = vmatpush1.bf16.msra.mxu0 %v7009_v40 }
 0xa98   :  { %5335 = vmatprep.subr.bf16.mxu0 %v7014_v47 }
 0xa9b   :  { %5336 = vmatpush1.bf16.msra.mxu0 %v7012_v50 }
 0xa9c   :  { %5337 = vmatprep.subr.bf16.mxu0 %v7017_v51 }
 0xa9e   :  { %v7392_v61 = vpop.eup %7391 }
 0xa9f   :  { %v2928_v56 = vadd.f32 1.0, %v7392_v61  ;;  %5338 = vmatpush1.bf16.msra.mxu0 %v7015_v54 }
 0xaa0   :  { %v7394_v36 = vpop.eup %7393  ;;  %5339 = vmatprep.subr.bf16.mxu0 %v7020_v57 }
 0xaa1   :  { %7395 = vrcp.f32 %v2928_v56  ;;  %v2929_v60 = vadd.f32 1.0, %v7394_v36 }
 0xaa3   :  { %7397 = vrcp.f32 %v2929_v60  ;;  %5340 = vmatpush1.bf16.msra.mxu0 %v7018_v1 }
 0xaa4   :  { %5341 = vmatprep.subr.bf16.mxu0 %v7023_v2 }
 0xaa7   :  { %5342 = vmatpush1.bf16.msra.mxu0 %v7021_v3 }
 0xaa8   :  { %5343 = vmatprep.subr.bf16.mxu0 %v7026_v21 }
 0xaab   :  { %v7396_v58 = vpop.eup %7395  ;;  %5344 = vmatpush1.bf16.msra.mxu0 %v7024_v38 }
 0xaac   :  { %v2934_v27 = vmul.f32 %v7396_v58, %v2913_v30  ;;  %5345 = vmatprep.subr.bf16.mxu0 %v7029_v39 }
 0xaad   :  { %v7398_v5 = vpop.eup %7397 }
 0xaae   :  { %v9143_v6 = vmul.f32 %v2934_v27, %v2915_v35  ;;  %v2935_v52 = vmul.f32 %v7398_v5, %v2917_v46 }
 0xaaf   :  { %5346 = vmatpush1.bf16.msra.mxu0 %v7027_v25 }
 0xab0   :  { %v9148_v48 = vmul.f32 %v2935_v52, %v2919_v44  ;;  %5347 = vmatprep.subr.bf16.mxu0 %v7032_v28 }
 0xab3   :  { %5348 = vmatpush1.bf16.msra.mxu0 %v7030_v45 }
 0xab4   :  { %5349 = vmatprep.subr.bf16.mxu0 %v7035_v8 }
 0xab7   :  { %5350 = vmatpush1.bf16.msra.mxu0 %v7033_v9 }
 0xab8   :  { %5351 = vmatprep.subr.bf16.mxu0 %v7038_v10 }
 0xabb   :  { %5352 = vmatpush1.bf16.msra.mxu0 %v7036_v11 }
 0xabe   :  { %5354 = vmatmul.mubr.bf16.vlgmr.msra.gmra.mrb[44].mxu0 %v8675_v7 }
 0xacd   :  { %v2505_v13 = vpop.f32.mrb[12].mxu1 }
 0xace   :  { %v5785_v15 = vmul.f32 -1.442695, %v2505_v13  ;;  %v2507_v16 = vpop.f32.mrb[13].mxu1 }
 0xacf   :  { %v2509_v17 = vpop.f32.mrb[14].mxu1 }
 0xad0   :  { %7399 = vpow2.f32 %v5785_v15  ;;  %v5786_v18 = vmul.f32 -1.442695, %v2509_v17  ;;  %v2511_v19 = vpop.f32.mrb[15].mxu1 }
 0xad1   :  { %v3727_v32 = vpop.f32.mrb[32].mxu0 }
 0xad2   :  { %7401 = vpow2.f32 %v5786_v18  ;;  %v6063_v62 = vmul.f32 -1.442695, %v3727_v32  ;;  %v3729_v12 = vpop.f32.mrb[33].mxu0 }
 0xad3   :  { %v3731_v20 = vpop.f32.mrb[34].mxu0 }
 0xad4   :  { %7403 = vpow2.f32 %v6063_v62  ;;  %v6064_v22 = vmul.f32 -1.442695, %v3731_v20  ;;  %v3733_v24 = vpop.f32.mrb[35].mxu0 }
 0xad6   :  { %7405 = vpow2.f32 %v6064_v22 }
 0xada   :  { %v7400_v41 = vpop.eup %7399 }
 0xadb   :  { %v2520_v26 = vadd.f32 1.0, %v7400_v41 }
 0xadc   :  { %v7402_v63 = vpop.eup %7401 }
 0xadd   :  { %7407 = vrcp.f32 %v2520_v26  ;;  %v2521_v14 = vadd.f32 1.0, %v7402_v63 }
 0xade   :  { %v7404_v55 = vpop.eup %7403 }
 0xadf   :  { %7409 = vrcp.f32 %v2521_v14  ;;  %v3742_v30 = vadd.f32 1.0, %v7404_v55 }
 0xae0   :  { %v7406_v31 = vpop.eup %7405 }
 0xae1   :  { %7411 = vrcp.f32 %v3742_v30  ;;  %v3743_v33 = vadd.f32 1.0, %v7406_v31 }
 0xae3   :  { %7413 = vrcp.f32 %v3743_v33 }
 0xae7   :  { %v7408_v34 = vpop.eup %7407 }
 0xae8   :  { %v2526_v35 = vmul.f32 %v7408_v34, %v2505_v13 }
 0xae9   :  { %v7410_v46 = vpop.eup %7409 }
 0xaea   :  { %v9163_v40 = vmul.f32 %v2526_v35, %v2507_v16  ;;  %v2527_v43 = vmul.f32 %v7410_v46, %v2509_v17 }
 0xaeb   :  { %v7412_v44 = vpop.eup %7411 }
 0xaec   :  { %v9165_v47 = vmul.f32 %v2527_v43, %v2511_v19  ;;  %v3748_v49 = vmul.f32 %v7412_v44, %v3727_v32 }
 0xaed   :  { %v7414_v50 = vpop.eup %7413 }
 0xaee   :  { %v9167_v51 = vmul.f32 %v3748_v49, %v3729_v12  ;;  %v3749_v54 = vmul.f32 %v7414_v50, %v3731_v20 }
 0xaf0   :  { %v9169_v57 = vmul.f32 %v3749_v54, %v3733_v24 }
 0xb11   :  { %v4134_v61 = vpop.f32.mrb[36].mxu0 }
 0xb12   :  { %v6161_v56 = vmul.f32 -1.442695, %v4134_v61  ;;  %v4136_v1 = vpop.f32.mrb[37].mxu0 }
 0xb13   :  { %v4138_v36 = vpop.f32.mrb[38].mxu0 }
 0xb14   :  { %7415 = vpow2.f32 %v6161_v56  ;;  %v6162_v2 = vmul.f32 -1.442695, %v4138_v36  ;;  %v4140_v60 = vpop.f32.mrb[39].mxu0 }
 0xb16   :  { %7417 = vpow2.f32 %v6162_v2 }
 0xb1e   :  { %v7416_v3 = vpop.eup %7415 }
 0xb1f   :  { %v4149_v21 = vadd.f32 1.0, %v7416_v3  ;;  %v2157_v38 = vpop.xlane.xlu0 %2156 }
 0xb20   :  { %v7418_v39 = vpop.eup %7417  ;;  %v2161_v58 = vsub.f32 %v9087_v29, %v2157_v38 }
 0xb21   :  { %7419 = vrcp.f32 %v4149_v21  ;;  %v4150_v25 = vadd.f32 1.0, %v7418_v39 }
 0xb22   :  { %v2163_v27 = vmul.f32 1.442695, %v2161_v58 }
 0xb23   :  { %7421 = vrcp.f32 %v4150_v25  ;;  %v2160_v28 = vpop.xlane.xlu1 %2159 }
 0xb24   :  { %7423 = vpow2.f32 %v2163_v27  ;;  %v2162_v5 = vsub.f32 %v9097_v42, %v2160_v28 }
 0xb26   :  { %v2165_v52 = vmul.f32 1.442695, %v2162_v5 }
 0xb28   :  { %7425 = vpow2.f32 %v2165_v52  ;;  %v9196_v52 = vand.u32 127, %v73_v23 }
 0xb2b   :  { %v7420_v45 = vpop.eup %7419 }
 0xb2c   :  { %v4155_v8 = vmul.f32 %v7420_v45, %v4134_v61 }
 0xb2d   :  { %v7422_v9 = vpop.eup %7421 }
 0xb2e   :  { %v7424_v10 = vpop.eup %7423  ;;  %v9173_v11 = vmul.f32 %v4155_v8, %v4136_v1  ;;  %v4156_v13 = vmul.f32 %v7422_v9, %v4138_v36 }
 0xb2f   :  { %v2167_v15 = vsel %vm2154_vm1, %v7424_v10, 0.0 }
 0xb30   :  { %v9176_v29 = vmul.f32 %v4156_v13, %v4140_v60  ;;  %2168 = vadd.xlane.f32.xlu0 %v2167_v15 }
 0xb32   :  { %v7426_v16 = vpop.eup %7425 }
 0xb33   :  { %v2170_v17 = vsel %vm2154_vm1, %v7426_v16, 0.0 }
 0xb34   :  { %2171 = vadd.xlane.f32.xlu1 %v2170_v17 }
 0xb51   :  { %v4541_v18 = vpop.f32.mrb[40].mxu0 }
 0xb52   :  { %v6259_v42 = vmul.f32 -1.442695, %v4541_v18  ;;  %v4543_v19 = vpop.f32.mrb[41].mxu0 }
 0xb53   :  { %v4545_v32 = vpop.f32.mrb[42].mxu0 }
 0xb54   :  { %7427 = vpow2.f32 %v6259_v42  ;;  %v6260_v62 = vmul.f32 -1.442695, %v4545_v32  ;;  %v4547_v12 = vpop.f32.mrb[43].mxu0 }
 0xb56   :  { %7429 = vpow2.f32 %v6260_v62 }
 0xb5e   :  { %v7428_v20 = vpop.eup %7427 }
 0xb5f   :  { %v4556_v22 = vadd.f32 1.0, %v7428_v20 }
 0xb60   :  { %v7430_v24 = vpop.eup %7429 }
 0xb61   :  { %7431 = vrcp.f32 %v4556_v22  ;;  %v4557_v41 = vadd.f32 1.0, %v7430_v24 }
 0xb63   :  { %7433 = vrcp.f32 %v4557_v41 }
 0xb6b   :  { %v7432_v26 = vpop.eup %7431 }
 0xb6c   :  { %v4562_v63 = vmul.f32 %v7432_v26, %v4541_v18 }
 0xb6d   :  { %v7434_v14 = vpop.eup %7433 }
 0xb6e   :  { %v9179_v55 = vmul.f32 %v4562_v63, %v4543_v19  ;;  %v4563_v30 = vmul.f32 %v7434_v14, %v4545_v32 }
 0xb70   :  { %v9181_v31 = vmul.f32 %v4563_v30, %v4547_v12 }
 0xb91   :  { %v5355_v33 = vpop.f32.mrb[44].mxu0 }
 0xb92   :  { %v6455_v34 = vmul.f32 -1.442695, %v5355_v33  ;;  %v5357_v35 = vpop.f32.mrb[45].mxu0 }
 0xb93   :  { %v5359_v46 = vpop.f32.mrb[46].mxu0 }
 0xb94   :  { %7435 = vpow2.f32 %v6455_v34  ;;  %v6456_v43 = vmul.f32 -1.442695, %v5359_v46  ;;  %v5361_v44 = vpop.f32.mrb[47].mxu0 }
 0xb96   :  { %7437 = vpow2.f32 %v6456_v43 }
 0xb9e   :  { %v7436_v49 = vpop.eup %7435 }
 0xb9f   :  { %v5370_v50 = vadd.f32 1.0, %v7436_v49 }
 0xba0   :  { %v7438_v54 = vpop.eup %7437 }
 0xba1   :  { %7439 = vrcp.f32 %v5370_v50  ;;  %v5371_v61 = vadd.f32 1.0, %v7438_v54 }
 0xba3   :  { %7441 = vrcp.f32 %v5371_v61 }
 0xbab   :  { %v7440_v56 = vpop.eup %7439 }
 0xbac   :  { %v5376_v1 = vmul.f32 %v7440_v56, %v5355_v33 }
 0xbad   :  { %v7442_v36 = vpop.eup %7441 }
 0xbae   :  { %v9183_v2 = vmul.f32 %v5376_v1, %v5357_v35  ;;  %v5377_v60 = vmul.f32 %v7442_v36, %v5359_v46 }
 0xbb0   :  { %v9185_v3 = vmul.f32 %v5377_v60, %v5361_v44 }
 0xbbd   :  { %v2169_v21 = vpop.xlane.xlu0 %2168 }
 0xbbe   :  { %7443 = vrcp.f32 %v2169_v21 }
 0xbc1   :  { %v2172_v38 = vpop.xlane.xlu1 %2171 }
 0xbc2   :  { %7445 = vrcp.f32 %v2172_v38 }
 0xbc8   :  { %v7444_v39 = vpop.eup %7443 }
 0xbc9   :  { %v9187_v58 = vmul.f32 %v7444_v39, %v7424_v10 }
 0xbcb   :  { %v2179_v25 = vsel %vm2154_vm1, %v9187_v58, -inf }
 0xbcc   :  { %v7446_v27 = vpop.eup %7445  ;;  %2180 = vmax.xlane.f32.xlu0 %v2179_v25 }
 0xbcd   :  { %v9191_v28 = vmul.f32 %v7446_v27, %v7426_v16 }
 0xbcf   :  { %v2182_v5 = vsel %vm2154_vm1, %v9191_v28, -inf }
 0xbd0   :  { %2183 = vmax.xlane.f32.xlu1 %v2182_v5 }
 0xc59   :  { %v2181_v45 = vpop.xlane.xlu0 %2180 }
 0xc5a   :  { %vm2185_vm2 = vcmp.eq.f32.partialorder %v9187_v58, %v2181_v45 }
 0xc5b   :  { %v2187_v8 = vsel %vm2185_vm2, %v9196_v52, 8 }
 0xc5c   :  { %v2189_v9 = vsel %vm2154_vm1, %v2187_v8, 2147483647 }
 0xc5d   :  { %v2184_v10 = vpop.xlane.xlu1 %2183  ;;  %v2191_v13 = vshra.s32 %v2189_v9, 16  ;;  %v2190_v42 = vand.u32 65535, %v2189_v9 }
 0xc5e   :  { %vm2186_vm3 = vcmp.eq.f32.partialorder %v9191_v28, %v2184_v10 }
 0xc5f   :  { %v2188_v15 = vsel %vm2186_vm3, %v9196_v52, 8  ;;  %v2193_v16 = vcvt.s32.f32 %v2191_v13  ;;  %v2192_v32 = vcvt.s32.f32 %v2190_v42 }
 0xc60   :  { %v2204_v17 = vsel %vm2154_vm1, %v2188_v15, 2147483647 }
 0xc61   :  { %2194 = vmin.xlane.f32.xlu0 %v2193_v16  ;;  %v2206_v18 = vshra.s32 %v2204_v17, 16  ;;  %v2205_v62 = vand.u32 65535, %v2204_v17 }
 0xc63   :  { %v2208_v23 = vcvt.s32.f32 %v2206_v18  ;;  %v2207_v22 = vcvt.s32.f32 %v2205_v62 }
 0xc65   :  { %2209 = vmin.xlane.f32.xlu1 %v2208_v23 }
 0xcee   :  { %v2195_v19 = vpop.xlane.xlu0 %2194 }
 0xcef   :  { %vm2196_vm4 = vcmp.eq.f32.partialorder %v2193_v16, %v2195_v19  ;;  %v2201_v41 = vcvt.f32.s32 %v2195_v19 }
 0xcf0   :  { %v2197_v12 = vsel %vm2196_vm4, %v2192_v32, inf }
 0xcf1   :  { %2198 = vmin.xlane.f32.xlu0 %v2197_v12  ;;  %v2202_v63 = vshll.u32 %v2201_v41, 16 }
 0xcf2   :  { %v2210_v20 = vpop.xlane.xlu1 %2209 }
 0xcf3   :  { %vm2211_vm5 = vcmp.eq.f32.partialorder %v2208_v23, %v2210_v20  ;;  %v2216_v14 = vcvt.f32.s32 %v2210_v20 }
 0xcf4   :  { %v2212_v24 = vsel %vm2211_vm5, %v2207_v22, inf }
 0xcf5   :  { %2213 = vmin.xlane.f32.xlu1 %v2212_v24  ;;  %v2217_v35 = vshll.u32 %v2216_v14, 16  ;;  %v7500_v14 = vmov 0  }
 0xcf6   :  { %6643 = vset.pattern.permute.xlu0 %v7500_v14  ;;  %6644 = vset.pattern.permute.xlu1 %v7500_v14 }
 0xcf7   :  { %2671 = vmatprep.mubr.bf16.mxu1 %v7500_v14 }
 0xd7e   :  { %v2199_v26 = vpop.xlane.xlu0 %2198 }
 0xd7f   :  { %v2200_v30 = vcvt.f32.s32 %v2199_v26 }
 0xd81   :  { %v2203_v33 = vadd.s32 %v2202_v63, %v2200_v30  ;;  %v7042_v30 = vld [vmem:[%s9906_s12 + $0x10] ss:$8 sps:$4 sm:$0xff]  }
 0xd82   :  { %v2214_v34 = vpop.xlane.xlu1 %2213 }
 0xd83   :  { %v2215_v46 = vcvt.f32.s32 %v2214_v34  ;;  %vm2219_vm6 = vcmp.eq.s32.totalorder %v9196_v52, %v2203_v33  ;;  %v7047_v33 = vld [vmem:[%s9906_s12 + $0x24] ss:$8 sps:$4 sm:$0xff]   ;;  %v7045_v34 = vld [vmem:[%s9906_s12 + $0x20] ss:$8 sps:$4 sm:$0xff]  }
 0xd84   :  { %v2221_v43 = vsel %vm2219_vm6, -inf, %v9187_v58 }
 0xd85   :  { %v2218_v44 = vadd.s32 %v2217_v35, %v2215_v46  ;;  %v2223_v49 = vsel %vm2154_vm1, %v2221_v43, -inf  ;;  %v7050_v35 = vld [vmem:[%s9906_s12 + $0x34] ss:$8 sps:$4 sm:$0xff]   ;;  %v7048_v46 = vld [vmem:[%s9906_s12 + $0x30] ss:$8 sps:$4 sm:$0xff]  }
 0xd86   :  { %2224 = vmax.xlane.f32.xlu0 %v2223_v49  ;;  %v7056_v49 = vld [vmem:[%s9906_s12 + $0x54] ss:$8 sps:$4 sm:$0xff]  }
 0xd87   :  { %vm2220_vm7 = vcmp.eq.s32.totalorder %v9196_v52, %v2218_v44  ;;  %v7051_v44 = vld [vmem:[%s9906_s12 + $0x40] ss:$8 sps:$4 sm:$0xff]  }
 0xd88   :  { %v2222_v50 = vsel %vm2220_vm7, -inf, %v9191_v28 }
 0xd89   :  { %v2226_v54 = vsel %vm2154_vm1, %v2222_v50, -inf }
 0xd8a   :  { %2227 = vmax.xlane.f32.xlu1 %v2226_v54 }
 0xe13   :  { %v2225_v61 = vpop.xlane.xlu0 %2224 }
 0xe14   :  { %vm2229_vm8 = vcmp.eq.f32.partialorder %v2221_v43, %v2225_v61  ;;  %v7053_v43 = vld [vmem:[%s9906_s12 + $0x44] ss:$8 sps:$4 sm:$0xff]  }
 0xe15   :  { %v2231_v56 = vsel %vm2229_vm8, %v9196_v52, 8 }
 0xe16   :  { %v2233_v1 = vsel %vm2154_vm1, %v2231_v56, 2147483647 }
 0xe17   :  { %v2228_v36 = vpop.xlane.xlu1 %2227  ;;  %v2235_v60 = vshra.s32 %v2233_v1, 16  ;;  %v2234_v5 = vand.u32 65535, %v2233_v1 }
 0xe18   :  { %vm2230_vm9 = vcmp.eq.f32.partialorder %v2222_v50, %v2228_v36  ;;  %v7054_v50 = vld [vmem:[%s9906_s12 + $0x50] ss:$8 sps:$4 sm:$0xff]   ;;  %v7059_v36 = vld [vmem:[%s9906_s12 + $0x64] ss:$8 sps:$4 sm:$0xff]  }
 0xe19   :  { %v2232_v21 = vsel %vm2230_vm9, %v9196_v52, 8  ;;  %v2237_v38 = vcvt.s32.f32 %v2235_v60  ;;  %v2236_v8 = vcvt.s32.f32 %v2234_v5  ;;  %v7057_v60 = vld [vmem:[%s9906_s12 + $0x60] ss:$8 sps:$4 sm:$0xff]   ;;  %v7065_v5 = vld [vmem:[%s9906_s12 + $0x84] ss:$8 sps:$4 sm:$0xff]  }
 0xe1a   :  { %v2248_v39 = vsel %vm2154_vm1, %v2232_v21, 2147483647 }
 0xe1b   :  { %2238 = vmin.xlane.f32.xlu0 %v2237_v38  ;;  %v2250_v25 = vshra.s32 %v2248_v39, 16  ;;  %v2249_v9 = vand.u32 65535, %v2248_v39  ;;  %v7062_v39 = vld [vmem:[%s9906_s12 + $0x74] ss:$8 sps:$4 sm:$0xff]  }
 0xe1d   :  { %v2252_v27 = vcvt.s32.f32 %v2250_v25  ;;  %v2251_v15 = vcvt.s32.f32 %v2249_v9  ;;  %v7060_v25 = vld [vmem:[%s9906_s12 + $0x70] ss:$8 sps:$4 sm:$0xff]   ;;  %v7504_v9 = vmov 7  }
 0xe1f   :  { %2253 = vmin.xlane.f32.xlu1 %v2252_v27 }
 0xea8   :  { %v2239_v45 = vpop.xlane.xlu0 %2238 }
 0xea9   :  { %vm2240_vm10 = vcmp.eq.f32.partialorder %v2237_v38, %v2239_v45  ;;  %v2245_v17 = vcvt.f32.s32 %v2239_v45  ;;  %v7502_v45 = vmov 1  }
 0xeaa   :  { %v2241_v10 = vsel %vm2240_vm10, %v2236_v8, inf  ;;  %v7503_v8 = vmov 6  }
 0xeab   :  { %2242 = vmin.xlane.f32.xlu0 %v2241_v10  ;;  %v2246_v23 = vshll.u32 %v2245_v17, 16  ;;  %v7505_v10 = vmov 2  }
 0xeac   :  { %v2254_v13 = vpop.xlane.xlu1 %2253 }
 0xead   :  { %vm2255_vm11 = vcmp.eq.f32.partialorder %v2252_v27, %v2254_v13  ;;  %v2260_v42 = vcvt.f32.s32 %v2254_v13  ;;  %v7501_v27 = vmov 4   ;;  %v7506_v13 = vmov 3  }
 0xeae   :  { %v2256_v16 = vsel %vm2255_vm11, %v2251_v15, inf  ;;  %v7507_v15 = vmov 5  }
 0xeaf   :  { %2257 = vmin.xlane.f32.xlu1 %v2256_v16  ;;  %v2261_v12 = vshll.u32 %v2260_v42, 16  ;;  %v7063_v42 = vld [vmem:[%s9906_s12 + $0x80] ss:$8 sps:$4 sm:$0xff]  }
 0xf38   :  { %v2243_v18 = vpop.xlane.xlu0 %2242 }
 0xf39   :  { %v2244_v19 = vcvt.f32.s32 %v2243_v18 }
 0xf3b   :  { %v2247_v32 = vadd.s32 %v2246_v23, %v2244_v19 }
 0xf3c   :  { %v2258_v62 = vpop.xlane.xlu1 %2257 }
 0xf3d   :  { %v2259_v20 = vcvt.f32.s32 %v2258_v62  ;;  %vm2263_vm12 = vcmp.eq.s32.totalorder %v9196_v52, %v2247_v32  ;;  %v7068_v32 = vld [vmem:[%s9906_s12 + $0x94] ss:$8 sps:$4 sm:$0xff]  }
 0xf3e   :  { %vm2265_vm13 = vmor %vm2219_vm6, %vm2263_vm12 }
 0xf3f   :  { %v2262_v22 = vadd.s32 %v2261_v12, %v2259_v20  ;;  %v2267_v24 = vsel %vm2265_vm13, %v9187_v58, 0.0  ;;  %v7039_v58 = vld [vmem:[%s9906_s12] ss:$8 sps:$4 sm:$0xff]   ;;  %v7066_v12 = vld [vmem:[%s9906_s12 + $0x90] ss:$8 sps:$4 sm:$0xff]  }
 0xf40   :  { %v2269_v41 = vsel %vm2154_vm1, %v2267_v24, 0.0 }
 0xf41   :  { %2270 = vadd.xlane.f32.xlu0 %v2269_v41  ;;  %vm2264_vm14 = vcmp.eq.s32.totalorder %v9196_v52, %v2262_v22  ;;  %v7041_v52 = vld [vmem:[%s9906_s12 + $0x4] ss:$8 sps:$4 sm:$0xff]   ;;  %v7074_v41 = vld [vmem:[%s9906_s12 + $0xb4] ss:$8 sps:$4 sm:$0xff]  }
 0xf42   :  { %vm2266_vm15 = vmor %vm2220_vm7, %vm2264_vm14  ;;  %2639 = vmatprep.subr.bf16.mxu1 %v7041_v52  ;;  %v7075_v52 = vld [vmem:[%s9906_s12 + $0xc0] ss:$8 sps:$4 sm:$0xff]  }
 0xf43   :  { %v2268_v26 = vsel %vm2266_vm15, %v9191_v28, 0.0  ;;  %v7044_v28 = vld [vmem:[%s9906_s12 + $0x14] ss:$8 sps:$4 sm:$0xff]   ;;  %2640 = vmatpush1.bf16.msra.mxu1 %v7039_v58 }
 0xf44   :  { %v2272_v63 = vsel %vm2154_vm1, %v2268_v26, 0.0  ;;  %2641 = vmatprep.subr.bf16.mxu1 %v7044_v28  ;;  %v7080_v28 = vld [vmem:[%s9906_s12 + $0xd4] ss:$8 sps:$4 sm:$0xff]  }
 0xf45   :  { %2273 = vadd.xlane.f32.xlu1 %v2272_v63 }
 0xf47   :  { %2642 = vmatpush1.bf16.msra.mxu1 %v7042_v30  ;;  %v7078_v30 = vld [vmem:[%s9906_s12 + $0xd0] ss:$8 sps:$4 sm:$0xff]  }
 0xf48   :  { %2643 = vmatprep.subr.bf16.mxu1 %v7047_v33 }
 0xf4b   :  { %2644 = vmatpush1.bf16.msra.mxu1 %v7045_v34  ;;  %v7083_v34 = vld [vmem:[%s9906_s12 + $0xe4] ss:$8 sps:$4 sm:$0xff]  }
 0xf4c   :  { %2645 = vmatprep.subr.bf16.mxu1 %v7050_v35  ;;  %v7081_v35 = vld [vmem:[%s9906_s12 + $0xe0] ss:$8 sps:$4 sm:$0xff]  }
 0xf4f   :  { %2646 = vmatpush1.bf16.msra.mxu1 %v7048_v46 }
 0xf50   :  { %2647 = vmatprep.subr.bf16.mxu1 %v7053_v43  ;;  %v7086_v43 = vld [vmem:[%s9906_s12 + $0xf4] ss:$8 sps:$4 sm:$0xff]  }
 0xf53   :  { %2648 = vmatpush1.bf16.msra.mxu1 %v7051_v44 }
 0xf54   :  { %2649 = vmatprep.subr.bf16.mxu1 %v7056_v49 }
 0xf57   :  { %2650 = vmatpush1.bf16.msra.mxu1 %v7054_v50 }
 0xf58   :  { %2651 = vmatprep.subr.bf16.mxu1 %v7059_v36  ;;  %v7087_v36 = vld [vmem:[%s9905_s11 + $0x200] ss:$8 sps:$4 sm:$0xff]  }
 0xf5b   :  { %2652 = vmatpush1.bf16.msra.mxu1 %v7057_v60 }
 0xf5c   :  { %2653 = vmatprep.subr.bf16.mxu1 %v7062_v39 }
 0xf5f   :  { %2654 = vmatpush1.bf16.msra.mxu1 %v7060_v25 }
 0xf60   :  { %3046 = vmatprep.subr.bf16.mxu1 %v7065_v5  ;;  %v7093_v5 = vld [vmem:[%s9905_s11 + $0x220] ss:$8 sps:$4 sm:$0xff]  }
 0xfce   :  { %v2271_v54 = vpop.xlane.xlu0 %2270 }
 0xfcf   :  { %7447 = vrcp.f32 %v2271_v54 }
 0xfd2   :  { %v2274_v61 = vpop.xlane.xlu1 %2273 }
 0xfd3   :  { %7449 = vrcp.f32 %v2274_v61  ;;  %v7084_v61 = vld [vmem:[%s9906_s12 + $0xf0] ss:$8 sps:$4 sm:$0xff]  }
 0xfd9   :  { %v7448_v56 = vpop.eup %7447 }
 0xfda   :  { %v2276_v1 = vmul.f32 %v7448_v56, %v2267_v24  ;;  %v7069_v24 = vld [vmem:[%s9906_s12 + $0xa0] ss:$8 sps:$4 sm:$0xff]   ;;  %v7089_v56 = vld [vmem:[%s9905_s11 + $0x204] ss:$8 sps:$4 sm:$0xff]  }
 0xfdc   :  { %2532 = vperm.xlu0 %6643, %v2276_v1  }
 0xfdd   :  { %v7450_v21 = vpop.eup %7449 }
 0xfde   :  { %v2278_v38 = vmul.f32 %v7450_v21, %v2268_v26  ;;  %v7092_v21 = vld [vmem:[%s9905_s11 + $0x214] ss:$8 sps:$4 sm:$0xff]  }
 0xfe0   :  { %6649 = vset.pattern.permute.xlu0 %v7501_v27  ;;  %2537 = vperm.xlu1 %6644, %v2278_v38  }
 0xfe1   :  { %4164 = vperm.xlu0 %6649, %v2278_v38  }
 0xfe4   :  { %6645 = vset.pattern.permute.xlu1 %v7502_v45 }
 0xfe5   :  { %6651 = vset.pattern.permute.xlu0 %v7503_v8  ;;  %2939 = vperm.xlu1 %6645, %v2276_v1  }
 0xfe6   :  { %4974 = vperm.xlu0 %6651, %v2276_v1  }
 0xfe9   :  { %2943 = vperm.xlu1 %6645, %v2278_v38  }
 0xfea   :  { %6654 = vset.pattern.permute.xlu0 %v7504_v9 }
 0xfeb   :  { %5385 = vperm.xlu0 %6654, %v2278_v38  }
 0xfed   :  { %6646 = vset.pattern.permute.xlu1 %v7505_v10  ;;  %v7101_v10 = vld [vmem:[%s9905_s11 + $0x244] ss:$8 sps:$4 sm:$0xff]  }
 0xfee   :  { %3346 = vperm.xlu1 %6646, %v2276_v1  }
 0xff2   :  { %3350 = vperm.xlu1 %6646, %v2278_v38  }
 0xff6   :  { %6647 = vset.pattern.permute.xlu1 %v7506_v13 }
 0xff7   :  { %3753 = vperm.xlu1 %6647, %v2276_v1  }
 0xffb   :  { %3757 = vperm.xlu1 %6647, %v2278_v38  }
 0xfff   :  { %6648 = vset.pattern.permute.xlu1 %v7501_v27 }
0x1000   :  { %4160 = vperm.xlu1 %6648, %v2276_v1  }
0x1004   :  { %6650 = vset.pattern.permute.xlu1 %v7507_v15  ;;  %v7099_v15 = vld [vmem:[%s9905_s11 + $0x240] ss:$8 sps:$4 sm:$0xff]  }
0x1005   :  { %4567 = vperm.xlu1 %6650, %v2276_v1  }
0x1009   :  { %4571 = vperm.xlu1 %6650, %v2278_v38  }
0x100d   :  { %6652 = vset.pattern.permute.xlu1 %v7503_v8  ;;  %v7098_v8 = vld [vmem:[%s9905_s11 + $0x234] ss:$8 sps:$4 sm:$0xff]  }
0x100e   :  { %4978 = vperm.xlu1 %6652, %v2278_v38  }
0x1012   :  { %6653 = vset.pattern.permute.xlu1 %v7504_v9 }
0x1013   :  { %5381 = vperm.xlu1 %6653, %v2276_v1  }
0x105b   :  { %v2533_v16 = vpop.permute.xlu0 %2532 }
0x105c   :  { %v2540_v18 = vmul.f32 %v2533_v16, %v9163_v40  ;;  %v7071_v40 = vld [vmem:[%s9906_s12 + $0xa4] ss:$8 sps:$4 sm:$0xff]  }
0x105f   :  { %v2538_v17 = vpop.permute.xlu1 %2537 }
0x1060   :  { %v2541_v23 = vmul.f32 %v2538_v17, %v9165_v47  ;;  %v4165_v50 = vpop.permute.xlu0 %4164  ;;  %v7104_v17 = vld [vmem:[%s9905_s11 + $0x254] ss:$8 sps:$4 sm:$0xff]  }
0x1062   :  { %v2542_v19 = vpack.c.bf16 %v2541_v23, %v2540_v18 }
0x1064   :  { %v2940_v62 = vpop.permute.xlu1 %2939  ;;  %2672 = vmatmul.mubr.bf16.vlgmr.msra.gmra.mrb[16].mxu1 %v2542_v19  ;;  %v7102_v19 = vld [vmem:[%s9905_s11 + $0x250] ss:$8 sps:$4 sm:$0xff]  }
0x1065   :  { %3047 = vmatpush1.bf16.msra.mxu1 %v7063_v42  ;;  %3078 = vmatprep.mubr.bf16.mxu1 %v7500_v14  ;;  %v2946_v20 = vmul.f32 %v2940_v62, %v9143_v6  ;;  %v7072_v6 = vld [vmem:[%s9906_s12 + $0xb0] ss:$8 sps:$4 sm:$0xff]   ;;  %v9377_v45 = vpop.permute.xlu0 %4974 }
0x1066   :  { %3048 = vmatprep.subr.bf16.mxu1 %v7068_v32  ;;  %v7107_v32 = vld [vmem:[%s9905_s11 + $0x264] ss:$8 sps:$4 sm:$0xff]   ;;  %v7108_v62 = vld [vmem:[%s9905_s11 + $0x270] ss:$8 sps:$4 sm:$0xff]  }
0x1068   :  { %v2944_v47 = vpop.permute.xlu1 %2943 }
0x1069   :  { %v2947_v22 = vmul.f32 %v2944_v47, %v9148_v48  ;;  %3049 = vmatpush1.bf16.msra.mxu1 %v7066_v12  ;;  %v7077_v48 = vld [vmem:[%s9906_s12 + $0xc4] ss:$8 sps:$4 sm:$0xff]   ;;  %v7116_v47 = vld [vmem:[%s9905_s11 + $0x294] ss:$8 sps:$4 sm:$0xff]  }
0x106a   :  { %3050 = vmatprep.subr.bf16.mxu1 %v7071_v40  ;;  %v5386_v13 = vpop.permute.xlu0 %5385  ;;  %v7113_v12 = vld [vmem:[%s9905_s11 + $0x284] ss:$8 sps:$4 sm:$0xff]   ;;  %v7111_v40 = vld [vmem:[%s9905_s11 + $0x280] ss:$8 sps:$4 sm:$0xff]  }
0x106b   :  { %v2948_v26 = vpack.c.bf16 %v2947_v22, %v2946_v20  ;;  %v9399_v18 = vmul.f32 %v5386_v13, %v9185_v3  ;;  %v7105_v3 = vld [vmem:[%s9905_s11 + $0x260] ss:$8 sps:$4 sm:$0xff]   ;;  %v7114_v20 = vld [vmem:[%s9905_s11 + $0x290] ss:$8 sps:$4 sm:$0xff]   ;;  %v7119_v22 = vld [vmem:[%s9905_s11 + $0x2a4] ss:$8 sps:$4 sm:$0xff]  }
0x106c   :  { %v7161_v13 = vld [vmem:[%s9906_s12 + $0x184] ss:$8 sps:$4 sm:$0xff]  }
0x106d   :  { %3051 = vmatpush1.bf16.msra.mxu1 %v7069_v24  ;;  %v9305_v63 = vpop.permute.xlu1 %3346  ;;  %v7117_v24 = vld [vmem:[%s9905_s11 + $0x2a0] ss:$8 sps:$4 sm:$0xff]  }
0x106e   :  { %3052 = vmatprep.subr.bf16.mxu1 %v7074_v41  ;;  %v7122_v41 = vld [vmem:[%s9905_s11 + $0x2b4] ss:$8 sps:$4 sm:$0xff]  }
0x1071   :  { %3053 = vmatpush1.bf16.msra.mxu1 %v7072_v6  ;;  %v9313_v58 = vpop.permute.xlu1 %3350  ;;  %v7125_v6 = vld [vmem:[%s9905_s11 + $0x2c4] ss:$8 sps:$4 sm:$0xff]  }
0x1072   :  { %3054 = vmatprep.subr.bf16.mxu1 %v7077_v48  ;;  %v7123_v48 = vld [vmem:[%s9905_s11 + $0x2c0] ss:$8 sps:$4 sm:$0xff]  }
0x1075   :  { %3055 = vmatpush1.bf16.msra.mxu1 %v7075_v52  ;;  %v7128_v52 = vld [vmem:[%s9905_s11 + $0x2d4] ss:$8 sps:$4 sm:$0xff]  }
0x1076   :  { %v3754_v33 = vpop.permute.xlu1 %3753  ;;  %3056 = vmatprep.subr.bf16.mxu1 %v7080_v28  ;;  %v7126_v28 = vld [vmem:[%s9905_s11 + $0x2d0] ss:$8 sps:$4 sm:$0xff]  }
0x1077   :  { %v9334_v44 = vmul.f32 %v3754_v33, %v9167_v51  ;;  %v9348_v51 = vmul.f32 %v4165_v50, %v9176_v29  ;;  %v7095_v29 = vld [vmem:[%s9905_s11 + $0x224] ss:$8 sps:$4 sm:$0xff]   ;;  %v7129_v33 = vld [vmem:[%s9905_s11 + $0x2e0] ss:$8 sps:$4 sm:$0xff]   ;;  %v7140_v50 = vld [vmem:[%s9906_s12 + $0x114] ss:$8 sps:$4 sm:$0xff]  }
0x1079   :  { %3057 = vmatpush1.bf16.msra.mxu1 %v7078_v30  ;;  %v7131_v30 = vld [vmem:[%s9905_s11 + $0x2e4] ss:$8 sps:$4 sm:$0xff]  }
0x107a   :  { %v3758_v46 = vpop.permute.xlu1 %3757  ;;  %3058 = vmatprep.subr.bf16.mxu1 %v7083_v34  ;;  %v7134_v34 = vld [vmem:[%s9905_s11 + $0x2f4] ss:$8 sps:$4 sm:$0xff]  }
0x107b   :  { %v9337_v49 = vmul.f32 %v3758_v46, %v9169_v57  ;;  %v7137_v46 = vld [vmem:[%s9906_s12 + $0x104] ss:$8 sps:$4 sm:$0xff]  }
0x107d   :  { %v3762_v54 = vpack.c.bf16 %v9337_v49, %v9334_v44  ;;  %3059 = vmatpush1.bf16.msra.mxu1 %v7081_v35  ;;  %v7132_v35 = vld [vmem:[%s9905_s11 + $0x2f0] ss:$8 sps:$4 sm:$0xff]   ;;  %v7194_v44 = vld [vmem:[%s9906_s12 + $0x234] ss:$8 sps:$4 sm:$0xff]  }
0x107e   :  { %3060 = vmatprep.subr.bf16.mxu1 %v7086_v43  ;;  %v7135_v43 = vld [vmem:[%s9906_s12 + $0x100] ss:$8 sps:$4 sm:$0xff]   ;;  %v7192_v49 = vld [vmem:[%s9906_s12 + $0x230] ss:$8 sps:$4 sm:$0xff]  }
0x107f   :  { %v4161_v1 = vpop.permute.xlu1 %4160 }
0x1080   :  { %v9351_v57 = vmul.f32 %v4161_v1, %v9173_v11  ;;  %v7090_v11 = vld [vmem:[%s9905_s11 + $0x210] ss:$8 sps:$4 sm:$0xff]   ;;  %v7141_v1 = vld [vmem:[%s9906_s12 + $0x120] ss:$8 sps:$4 sm:$0xff]  }
0x1081   :  { %3061 = vmatpush1.bf16.msra.mxu1 %v7084_v61  ;;  %v7138_v61 = vld [vmem:[%s9906_s12 + $0x110] ss:$8 sps:$4 sm:$0xff]  }
0x1082   :  { %v4169_v60 = vpack.c.bf16 %v9348_v51, %v9351_v57  ;;  %3286 = vmatprep.subr.bf16.mxu1 %v7089_v56  ;;  %v7143_v56 = vld [vmem:[%s9906_s12 + $0x124] ss:$8 sps:$4 sm:$0xff]   ;;  %v7218_v51 = vld [vmem:[%s9906_s12 + $0x2b4] ss:$8 sps:$4 sm:$0xff]   ;;  %v7216_v57 = vld [vmem:[%s9906_s12 + $0x2b0] ss:$8 sps:$4 sm:$0xff]  }
0x1084   :  { %3079 = vmatmul.mubr.bf16.vlgmr.msra.gmra.mrb[16].mxu1 %v2948_v26  ;;  %v4568_v38 = vpop.permute.xlu1 %4567  ;;  %v7120_v26 = vld [vmem:[%s9905_s11 + $0x2b0] ss:$8 sps:$4 sm:$0xff]  }
0x1085   :  { %3287 = vmatpush1.bf16.msra.mxu1 %v7087_v36  ;;  %3318 = vmatprep.mubr.bf16.mxu1 %v8667_v4  ;;  %v9369_v25 = vmul.f32 %v4568_v38, %v9179_v55  ;;  %v7146_v36 = vld [vmem:[%s9906_s12 + $0x134] ss:$8 sps:$4 sm:$0xff]   ;;  %v7149_v38 = vld [vmem:[%s9906_s12 + $0x144] ss:$8 sps:$4 sm:$0xff]  }
0x1086   :  { %3288 = vmatprep.subr.bf16.mxu1 %v7092_v21  ;;  %v7144_v21 = vld [vmem:[%s9906_s12 + $0x130] ss:$8 sps:$4 sm:$0xff]  }
0x1088   :  { %v4572_v39 = vpop.permute.xlu1 %4571 }
0x1089   :  { %v9372_v27 = vmul.f32 %v4572_v39, %v9181_v31  ;;  %3289 = vmatpush1.bf16.msra.mxu1 %v7090_v11  ;;  %v7096_v31 = vld [vmem:[%s9905_s11 + $0x230] ss:$8 sps:$4 sm:$0xff]   ;;  %v7147_v11 = vld [vmem:[%s9906_s12 + $0x140] ss:$8 sps:$4 sm:$0xff]  }
0x108a   :  { %3290 = vmatprep.subr.bf16.mxu1 %v7095_v29  ;;  %v7152_v29 = vld [vmem:[%s9906_s12 + $0x154] ss:$8 sps:$4 sm:$0xff]   ;;  %v7150_v39 = vld [vmem:[%s9906_s12 + $0x150] ss:$8 sps:$4 sm:$0xff]  }
0x108b   :  { %v4576_v9 = vpack.c.bf16 %v9372_v27, %v9369_v25  ;;  %v7242_v25 = vld [vmem:[%s9905_s11 + $0x634] ss:$8 sps:$4 sm:$0xff]   ;;  %v7245_v27 = vld [vmem:[%s9905_s11 + $0x644] ss:$8 sps:$4 sm:$0xff]  }
0x108d   :  { %3291 = vmatpush1.bf16.msra.mxu1 %v7093_v5  ;;  %v9384_v55 = vpop.permute.xlu1 %4978  ;;  %v7155_v5 = vld [vmem:[%s9906_s12 + $0x164] ss:$8 sps:$4 sm:$0xff]  }
0x108e   :  { %3292 = vmatprep.subr.bf16.mxu1 %v7098_v8  ;;  %v7153_v8 = vld [vmem:[%s9906_s12 + $0x160] ss:$8 sps:$4 sm:$0xff]  }
0x1091   :  { %3293 = vmatpush1.bf16.msra.mxu1 %v7096_v31  ;;  %v7158_v31 = vld [vmem:[%s9906_s12 + $0x174] ss:$8 sps:$4 sm:$0xff]  }
0x1092   :  { %v5382_v16 = vpop.permute.xlu1 %5381  ;;  %3294 = vmatprep.subr.bf16.mxu1 %v7101_v10  ;;  %v7156_v10 = vld [vmem:[%s9906_s12 + $0x170] ss:$8 sps:$4 sm:$0xff]  }
0x1093   :  { %v9402_v23 = vmul.f32 %v5382_v16, %v9183_v2  ;;  %v7110_v2 = vld [vmem:[%s9905_s11 + $0x274] ss:$8 sps:$4 sm:$0xff]  }
0x1095   :  { %v5390_v42 = vpack.c.bf16 %v9399_v18, %v9402_v23  ;;  %3295 = vmatpush1.bf16.msra.mxu1 %v7099_v15 }
0x1096   :  { %3296 = vmatprep.subr.bf16.mxu1 %v7104_v17 }
0x1099   :  { %3297 = vmatpush1.bf16.msra.mxu1 %v7102_v19 }
0x109a   :  { %3298 = vmatprep.subr.bf16.mxu1 %v7107_v32 }
0x109d   :  { %3299 = vmatpush1.bf16.msra.mxu1 %v7105_v3 }
0x109e   :  { %3300 = vmatprep.subr.bf16.mxu1 %v7110_v2 }
0x10a1   :  { %3301 = vmatpush1.bf16.msra.mxu1 %v7108_v62 }
0x10a2   :  { %3302 = vmatprep.subr.bf16.mxu1 %v7113_v12 }
0x10a5   :  { %3303 = vmatpush1.bf16.msra.mxu1 %v7111_v40 }
0x10a6   :  { %3304 = vmatprep.subr.bf16.mxu1 %v7116_v47 }
0x10a9   :  { %3305 = vmatpush1.bf16.msra.mxu1 %v7114_v20 }
0x10aa   :  { %3306 = vmatprep.subr.bf16.mxu1 %v7119_v22 }
0x10ad   :  { %3307 = vmatpush1.bf16.msra.mxu1 %v7117_v24 }
0x10ae   :  { %3308 = vmatprep.subr.bf16.mxu1 %v7122_v41 }
0x10b1   :  { %3309 = vmatpush1.bf16.msra.mxu1 %v7120_v26 }
0x10b2   :  { %3310 = vmatprep.subr.bf16.mxu1 %v7125_v6 }
0x10b5   :  { %3311 = vmatpush1.bf16.msra.mxu1 %v7123_v48 }
0x10b6   :  { %3312 = vmatprep.subr.bf16.mxu1 %v7128_v52  ;;  %v7159_v52 = vld [vmem:[%s9906_s12 + $0x180] ss:$8 sps:$4 sm:$0xff]  }
0x10b9   :  { %3313 = vmatpush1.bf16.msra.mxu1 %v7126_v28 }
0x10ba   :  { %3314 = vmatprep.subr.bf16.mxu1 %v7131_v30  ;;  %v7164_v30 = vld [vmem:[%s9906_s12 + $0x194] ss:$8 sps:$4 sm:$0xff]  }
0x10bd   :  { %3315 = vmatpush1.bf16.msra.mxu1 %v7129_v33  ;;  %v7162_v33 = vld [vmem:[%s9906_s12 + $0x190] ss:$8 sps:$4 sm:$0xff]  }
0x10be   :  { %3316 = vmatprep.subr.bf16.mxu1 %v7134_v34  ;;  %v7170_v34 = vld [vmem:[%s9906_s12 + $0x1b4] ss:$8 sps:$4 sm:$0xff]  }
0x10c1   :  { %3317 = vmatpush1.bf16.msra.mxu1 %v7132_v35  ;;  %v7168_v35 = vld [vmem:[%s9906_s12 + $0x1b0] ss:$8 sps:$4 sm:$0xff]  }
0x10c2   :  { %3453 = vmatprep.subr.bf16.mxu1 %v7137_v46  ;;  %v7173_v46 = vld [vmem:[%s9906_s12 + $0x1c4] ss:$8 sps:$4 sm:$0xff]  }
0x10c4   :  { %3319 = vmatmul.mubr.bf16.vlgmr.msra.gmra.mrb[20].mxu1 %v8675_v7 }
0x10c5   :  { %3485 = vmatprep.mubr.bf16.mxu1 %v7500_v14  ;;  %3454 = vmatpush1.bf16.msra.mxu1 %v7135_v43  ;;  %v7171_v43 = vld [vmem:[%s9906_s12 + $0x1c0] ss:$8 sps:$4 sm:$0xff]  }
0x10c6   :  { %3455 = vmatprep.subr.bf16.mxu1 %v7140_v50  ;;  %v7176_v50 = vld [vmem:[%s9906_s12 + $0x1d4] ss:$8 sps:$4 sm:$0xff]  }
0x10c9   :  { %3456 = vmatpush1.bf16.msra.mxu1 %v7138_v61  ;;  %v7174_v61 = vld [vmem:[%s9906_s12 + $0x1d0] ss:$8 sps:$4 sm:$0xff]  }
0x10ca   :  { %3457 = vmatprep.subr.bf16.mxu1 %v7143_v56  ;;  %v7179_v56 = vld [vmem:[%s9906_s12 + $0x1e4] ss:$8 sps:$4 sm:$0xff]  }
0x10cd   :  { %3458 = vmatpush1.bf16.msra.mxu1 %v7141_v1  ;;  %v7177_v1 = vld [vmem:[%s9906_s12 + $0x1e0] ss:$8 sps:$4 sm:$0xff]  }
0x10ce   :  { %3459 = vmatprep.subr.bf16.mxu1 %v7146_v36  ;;  %v7182_v36 = vld [vmem:[%s9906_s12 + $0x1f4] ss:$8 sps:$4 sm:$0xff]  }
0x10d1   :  { %3460 = vmatpush1.bf16.msra.mxu1 %v7144_v21  ;;  %v7180_v21 = vld [vmem:[%s9906_s12 + $0x1f0] ss:$8 sps:$4 sm:$0xff]  }
0x10d2   :  { %3461 = vmatprep.subr.bf16.mxu1 %v7149_v38  ;;  %v7185_v38 = vld [vmem:[%s9906_s12 + $0x204] ss:$8 sps:$4 sm:$0xff]  }
0x10d5   :  { %3462 = vmatpush1.bf16.msra.mxu1 %v7147_v11  ;;  %v7183_v11 = vld [vmem:[%s9906_s12 + $0x200] ss:$8 sps:$4 sm:$0xff]  }
0x10d6   :  { %3463 = vmatprep.subr.bf16.mxu1 %v7152_v29  ;;  %v7188_v29 = vld [vmem:[%s9906_s12 + $0x214] ss:$8 sps:$4 sm:$0xff]  }
0x10d9   :  { %3464 = vmatpush1.bf16.msra.mxu1 %v7150_v39  ;;  %v7186_v39 = vld [vmem:[%s9906_s12 + $0x210] ss:$8 sps:$4 sm:$0xff]  }
0x10da   :  { %3465 = vmatprep.subr.bf16.mxu1 %v7155_v5  ;;  %v7191_v5 = vld [vmem:[%s9906_s12 + $0x224] ss:$8 sps:$4 sm:$0xff]  }
0x10dd   :  { %3466 = vmatpush1.bf16.msra.mxu1 %v7153_v8  ;;  %v7189_v8 = vld [vmem:[%s9906_s12 + $0x220] ss:$8 sps:$4 sm:$0xff]  }
0x10de   :  { %3467 = vmatprep.subr.bf16.mxu1 %v7158_v31  ;;  %v7195_v31 = vld [vmem:[%s9906_s12 + $0x240] ss:$8 sps:$4 sm:$0xff]  }
0x10e1   :  { %3468 = vmatpush1.bf16.msra.mxu1 %v7156_v10  ;;  %v7200_v10 = vld [vmem:[%s9906_s12 + $0x254] ss:$8 sps:$4 sm:$0xff]  }
0x10e2   :  { %3860 = vmatprep.subr.bf16.mxu1 %v7161_v13  ;;  %v7198_v13 = vld [vmem:[%s9906_s12 + $0x250] ss:$8 sps:$4 sm:$0xff]  }
0x1197   :  { %v3320_v15 = vpop.f32.mrb[20].mxu1 }
0x1198   :  { %v5965_v16 = vmul.f32 -1.442695, %v3320_v15  ;;  %v3322_v17 = vpop.f32.mrb[21].mxu1 }
0x1199   :  { %v3324_v19 = vpop.f32.mrb[22].mxu1 }
0x119a   :  { %7451 = vpow2.f32 %v5965_v16  ;;  %v5966_v32 = vmul.f32 -1.442695, %v3324_v19  ;;  %v3326_v3 = vpop.f32.mrb[23].mxu1  ;;  %v7201_v16 = vld [vmem:[%s9906_s12 + $0x260] ss:$8 sps:$4 sm:$0xff]  }
0x119c   :  { %7453 = vpow2.f32 %v5966_v32  ;;  %v7209_v32 = vld [vmem:[%s9906_s12 + $0x284] ss:$8 sps:$4 sm:$0xff]  }
0x11a4   :  { %v7452_v2 = vpop.eup %7451 }
0x11a5   :  { %v3335_v62 = vadd.f32 1.0, %v7452_v2  ;;  %v7212_v2 = vld [vmem:[%s9906_s12 + $0x294] ss:$8 sps:$4 sm:$0xff]  }
0x11a6   :  { %v7454_v12 = vpop.eup %7453 }
0x11a7   :  { %7455 = vrcp.f32 %v3335_v62  ;;  %v3336_v40 = vadd.f32 1.0, %v7454_v12  ;;  %v7210_v62 = vld [vmem:[%s9906_s12 + $0x290] ss:$8 sps:$4 sm:$0xff]   ;;  %v7215_v12 = vld [vmem:[%s9906_s12 + $0x2a4] ss:$8 sps:$4 sm:$0xff]  }
0x11a9   :  { %7457 = vrcp.f32 %v3336_v40  ;;  %v7213_v40 = vld [vmem:[%s9906_s12 + $0x2a0] ss:$8 sps:$4 sm:$0xff]  }
0x11b1   :  { %v7456_v47 = vpop.eup %7455 }
0x11b2   :  { %v3341_v20 = vmul.f32 %v7456_v47, %v3320_v15  ;;  %v7203_v15 = vld [vmem:[%s9906_s12 + $0x264] ss:$8 sps:$4 sm:$0xff]   ;;  %v7219_v47 = vld [vmem:[%s9906_s12 + $0x2c0] ss:$8 sps:$4 sm:$0xff]  }
0x11b3   :  { %v7458_v22 = vpop.eup %7457 }
0x11b4   :  { %v3343_v24 = vmul.f32 %v3341_v20, %v3322_v17  ;;  %v3342_v41 = vmul.f32 %v7458_v22, %v3324_v19  ;;  %v7206_v17 = vld [vmem:[%s9906_s12 + $0x274] ss:$8 sps:$4 sm:$0xff]   ;;  %v7204_v19 = vld [vmem:[%s9906_s12 + $0x270] ss:$8 sps:$4 sm:$0xff]  }
0x11b5   :  { %v7224_v20 = vld [vmem:[%s9906_s12 + $0x2d4] ss:$8 sps:$4 sm:$0xff]   ;;  %v7222_v22 = vld [vmem:[%s9906_s12 + $0x2d0] ss:$8 sps:$4 sm:$0xff]  }
0x11b6   :  { %v3344_v26 = vmul.f32 %v3342_v41, %v3326_v3  ;;  %v3353_v6 = vmul.f32 %v9305_v63, %v3343_v24  ;;  %v7167_v63 = vld [vmem:[%s9906_s12 + $0x1a4] ss:$8 sps:$4 sm:$0xff]   ;;  %v7207_v3 = vld [vmem:[%s9906_s12 + $0x280] ss:$8 sps:$4 sm:$0xff]  }
0x11b7   :  { %v7227_v24 = vld [vmem:[%s9906_s12 + $0x2e4] ss:$8 sps:$4 sm:$0xff]   ;;  %v7225_v41 = vld [vmem:[%s9906_s12 + $0x2e0] ss:$8 sps:$4 sm:$0xff]  }
0x11b8   :  { %v3354_v48 = vmul.f32 %v9313_v58, %v3344_v26  ;;  %v7165_v58 = vld [vmem:[%s9906_s12 + $0x1a0] ss:$8 sps:$4 sm:$0xff]   ;;  %v7230_v26 = vld [vmem:[%s9906_s12 + $0x2f4] ss:$8 sps:$4 sm:$0xff]  }
0x11ba   :  { %v3355_v28 = vpack.c.bf16 %v3354_v48, %v3353_v6  ;;  %v7228_v6 = vld [vmem:[%s9906_s12 + $0x2f0] ss:$8 sps:$4 sm:$0xff]   ;;  %v7233_v48 = vld [vmem:[%s9905_s11 + $0x604] ss:$8 sps:$4 sm:$0xff]  }
0x11bc   :  { %3486 = vmatmul.mubr.bf16.vlgmr.msra.gmra.mrb[16].mxu1 %v3355_v28  ;;  %v7236_v28 = vld [vmem:[%s9905_s11 + $0x614] ss:$8 sps:$4 sm:$0xff]  }
0x11bd   :  { %3861 = vmatpush1.bf16.msra.mxu1 %v7159_v52  ;;  %3892 = vmatprep.mubr.bf16.mxu1 %v7500_v14  ;;  %v7231_v52 = vld [vmem:[%s9905_s11 + $0x600] ss:$8 sps:$4 sm:$0xff]  }
0x11be   :  { %3862 = vmatprep.subr.bf16.mxu1 %v7164_v30  ;;  %v7234_v30 = vld [vmem:[%s9905_s11 + $0x610] ss:$8 sps:$4 sm:$0xff]  }
0x11c1   :  { %3863 = vmatpush1.bf16.msra.mxu1 %v7162_v33  ;;  %v7239_v33 = vld [vmem:[%s9905_s11 + $0x624] ss:$8 sps:$4 sm:$0xff]  }
0x11c2   :  { %3864 = vmatprep.subr.bf16.mxu1 %v7167_v63  ;;  %v7237_v63 = vld [vmem:[%s9905_s11 + $0x620] ss:$8 sps:$4 sm:$0xff]  }
0x11c5   :  { %3865 = vmatpush1.bf16.msra.mxu1 %v7165_v58  ;;  %v7248_v58 = vld [vmem:[%s9905_s11 + $0x654] ss:$8 sps:$4 sm:$0xff]  }
0x11c6   :  { %3866 = vmatprep.subr.bf16.mxu1 %v7170_v34  ;;  %v7246_v34 = vld [vmem:[%s9905_s11 + $0x650] ss:$8 sps:$4 sm:$0xff]  }
0x11c9   :  { %3867 = vmatpush1.bf16.msra.mxu1 %v7168_v35  ;;  %v7251_v35 = vld [vmem:[%s9905_s11 + $0x664] ss:$8 sps:$4 sm:$0xff]  }
0x11ca   :  { %3868 = vmatprep.subr.bf16.mxu1 %v7173_v46  ;;  %v7249_v46 = vld [vmem:[%s9905_s11 + $0x660] ss:$8 sps:$4 sm:$0xff]  }
0x11cd   :  { %3869 = vmatpush1.bf16.msra.mxu1 %v7171_v43  ;;  %v7254_v43 = vld [vmem:[%s9905_s11 + $0x674] ss:$8 sps:$4 sm:$0xff]  }
0x11ce   :  { %3870 = vmatprep.subr.bf16.mxu1 %v7176_v50  ;;  %v7252_v50 = vld [vmem:[%s9905_s11 + $0x670] ss:$8 sps:$4 sm:$0xff]  }
0x11d1   :  { %3871 = vmatpush1.bf16.msra.mxu1 %v7174_v61  ;;  %v7257_v61 = vld [vmem:[%s9905_s11 + $0x684] ss:$8 sps:$4 sm:$0xff]  }
0x11d2   :  { %3872 = vmatprep.subr.bf16.mxu1 %v7179_v56  ;;  %v7255_v56 = vld [vmem:[%s9905_s11 + $0x680] ss:$8 sps:$4 sm:$0xff]  }
0x11d5   :  { %3873 = vmatpush1.bf16.msra.mxu1 %v7177_v1  ;;  %v7260_v1 = vld [vmem:[%s9905_s11 + $0x694] ss:$8 sps:$4 sm:$0xff]  }
0x11d6   :  { %3874 = vmatprep.subr.bf16.mxu1 %v7182_v36  ;;  %v7258_v36 = vld [vmem:[%s9905_s11 + $0x690] ss:$8 sps:$4 sm:$0xff]  }
0x11d9   :  { %3875 = vmatpush1.bf16.msra.mxu1 %v7180_v21  ;;  %v7263_v21 = vld [vmem:[%s9905_s11 + $0x6a4] ss:$8 sps:$4 sm:$0xff]  }
0x11da   :  { %4267 = vmatprep.subr.bf16.mxu1 %v7185_v38  ;;  %v7261_v38 = vld [vmem:[%s9905_s11 + $0x6a0] ss:$8 sps:$4 sm:$0xff]  }
0x11dc   :  { %3893 = vmatmul.mubr.bf16.vlgmr.msra.gmra.mrb[16].mxu1 %v3762_v54  ;;  %v7197_v54 = vld [vmem:[%s9906_s12 + $0x244] ss:$8 sps:$4 sm:$0xff]  }
0x11dd   :  { %4268 = vmatpush1.bf16.msra.mxu1 %v7183_v11  ;;  %4299 = vmatprep.mubr.bf16.mxu1 %v7500_v14  ;;  %v7266_v11 = vld [vmem:[%s9905_s11 + $0x6b4] ss:$8 sps:$4 sm:$0xff]  }
0x11de   :  { %4269 = vmatprep.subr.bf16.mxu1 %v7188_v29  ;;  %v7264_v29 = vld [vmem:[%s9905_s11 + $0x6b0] ss:$8 sps:$4 sm:$0xff]  }
0x11e1   :  { %4270 = vmatpush1.bf16.msra.mxu1 %v7186_v39  ;;  %v7269_v39 = vld [vmem:[%s9905_s11 + $0x6c4] ss:$8 sps:$4 sm:$0xff]  }
0x11e2   :  { %4271 = vmatprep.subr.bf16.mxu1 %v7191_v5  ;;  %v7267_v5 = vld [vmem:[%s9905_s11 + $0x6c0] ss:$8 sps:$4 sm:$0xff]  }
0x11e5   :  { %4272 = vmatpush1.bf16.msra.mxu1 %v7189_v8  ;;  %v7272_v8 = vld [vmem:[%s9905_s11 + $0x6d4] ss:$8 sps:$4 sm:$0xff]  }
0x11e6   :  { %4273 = vmatprep.subr.bf16.mxu1 %v7194_v44  ;;  %v7270_v44 = vld [vmem:[%s9905_s11 + $0x6d0] ss:$8 sps:$4 sm:$0xff]  }
0x11e9   :  { %4274 = vmatpush1.bf16.msra.mxu1 %v7192_v49  ;;  %v7275_v49 = vld [vmem:[%s9905_s11 + $0x6e4] ss:$8 sps:$4 sm:$0xff]  }
0x11ea   :  { %4275 = vmatprep.subr.bf16.mxu1 %v7197_v54  ;;  %v7273_v54 = vld [vmem:[%s9905_s11 + $0x6e0] ss:$8 sps:$4 sm:$0xff]  }
0x11ed   :  { %4276 = vmatpush1.bf16.msra.mxu1 %v7195_v31  ;;  %v7278_v31 = vld [vmem:[%s9905_s11 + $0x6f4] ss:$8 sps:$4 sm:$0xff]  }
0x11ee   :  { %4277 = vmatprep.subr.bf16.mxu1 %v7200_v10  ;;  %v7276_v10 = vld [vmem:[%s9905_s11 + $0x6f0] ss:$8 sps:$4 sm:$0xff]  }
0x11f1   :  { %4278 = vmatpush1.bf16.msra.mxu1 %v7198_v13  ;;  %v7281_v13 = vld [vmem:[%s9906_s12 + $0x304] ss:$8 sps:$4 sm:$0xff]  }
0x11f2   :  { %4279 = vmatprep.subr.bf16.mxu1 %v7203_v15  ;;  %v7279_v15 = vld [vmem:[%s9906_s12 + $0x300] ss:$8 sps:$4 sm:$0xff]  }
0x11f5   :  { %4280 = vmatpush1.bf16.msra.mxu1 %v7201_v16  ;;  %v7284_v16 = vld [vmem:[%s9906_s12 + $0x314] ss:$8 sps:$4 sm:$0xff]  }
0x11f6   :  { %4281 = vmatprep.subr.bf16.mxu1 %v7206_v17  ;;  %v7287_v17 = vld [vmem:[%s9906_s12 + $0x324] ss:$8 sps:$4 sm:$0xff]  }
0x11f9   :  { %4282 = vmatpush1.bf16.msra.mxu1 %v7204_v19  ;;  %v7285_v19 = vld [vmem:[%s9906_s12 + $0x320] ss:$8 sps:$4 sm:$0xff]  }
0x11fa   :  { %4674 = vmatprep.subr.bf16.mxu1 %v7209_v32  ;;  %v7290_v32 = vld [vmem:[%s9906_s12 + $0x334] ss:$8 sps:$4 sm:$0xff]  }
0x11fc   :  { %4300 = vmatmul.mubr.bf16.vlgmr.msra.gmra.mrb[16].mxu1 %v4169_v60  ;;  %v7221_v60 = vld [vmem:[%s9906_s12 + $0x2c4] ss:$8 sps:$4 sm:$0xff]  }
0x11fd   :  { %4675 = vmatpush1.bf16.msra.mxu1 %v7207_v3  ;;  %4706 = vmatprep.mubr.bf16.mxu1 %v7500_v14  ;;  %v7288_v3 = vld [vmem:[%s9906_s12 + $0x330] ss:$8 sps:$4 sm:$0xff]  }
0x11fe   :  { %4676 = vmatprep.subr.bf16.mxu1 %v7212_v2  ;;  %v7293_v2 = vld [vmem:[%s9906_s12 + $0x344] ss:$8 sps:$4 sm:$0xff]  }
0x1201   :  { %4677 = vmatpush1.bf16.msra.mxu1 %v7210_v62  ;;  %v7291_v62 = vld [vmem:[%s9906_s12 + $0x340] ss:$8 sps:$4 sm:$0xff]  }
0x1202   :  { %4678 = vmatprep.subr.bf16.mxu1 %v7215_v12  ;;  %v7296_v12 = vld [vmem:[%s9906_s12 + $0x354] ss:$8 sps:$4 sm:$0xff]  }
0x1205   :  { %4679 = vmatpush1.bf16.msra.mxu1 %v7213_v40  ;;  %v7294_v40 = vld [vmem:[%s9906_s12 + $0x350] ss:$8 sps:$4 sm:$0xff]  }
0x1206   :  { %4680 = vmatprep.subr.bf16.mxu1 %v7218_v51  ;;  %v7299_v51 = vld [vmem:[%s9906_s12 + $0x364] ss:$8 sps:$4 sm:$0xff]  }
0x1209   :  { %4681 = vmatpush1.bf16.msra.mxu1 %v7216_v57  ;;  %v7297_v57 = vld [vmem:[%s9906_s12 + $0x360] ss:$8 sps:$4 sm:$0xff]  }
0x120a   :  { %4682 = vmatprep.subr.bf16.mxu1 %v7221_v60  ;;  %v7302_v60 = vld [vmem:[%s9906_s12 + $0x374] ss:$8 sps:$4 sm:$0xff]  }
0x120d   :  { %4683 = vmatpush1.bf16.msra.mxu1 %v7219_v47  ;;  %v7300_v47 = vld [vmem:[%s9906_s12 + $0x370] ss:$8 sps:$4 sm:$0xff]  }
0x120e   :  { %4684 = vmatprep.subr.bf16.mxu1 %v7224_v20  ;;  %v7305_v20 = vld [vmem:[%s9906_s12 + $0x384] ss:$8 sps:$4 sm:$0xff]  }
0x1211   :  { %4685 = vmatpush1.bf16.msra.mxu1 %v7222_v22 }
0x1212   :  { %4686 = vmatprep.subr.bf16.mxu1 %v7227_v24 }
0x1215   :  { %4687 = vmatpush1.bf16.msra.mxu1 %v7225_v41 }
0x1216   :  { %4688 = vmatprep.subr.bf16.mxu1 %v7230_v26 }
0x1219   :  { %4689 = vmatpush1.bf16.msra.mxu1 %v7228_v6 }
0x121a   :  { %4914 = vmatprep.subr.bf16.mxu1 %v7233_v48 }
0x121c   :  { %4707 = vmatmul.mubr.bf16.vlgmr.msra.gmra.mrb[16].mxu1 %v4576_v9  ;;  %v7243_v9 = vld [vmem:[%s9905_s11 + $0x640] ss:$8 sps:$4 sm:$0xff]  }
0x121d   :  { %4915 = vmatpush1.bf16.msra.mxu1 %v7231_v52  ;;  %4946 = vmatprep.mubr.bf16.mxu1 %v8667_v4  ;;  %v7240_v4 = vld [vmem:[%s9905_s11 + $0x630] ss:$8 sps:$4 sm:$0xff]   ;;  %s7508_s11 = smov [#allocation2]  }
0x121e   :  { %4916 = vmatprep.subr.bf16.mxu1 %v7236_v28  ;;  %s5544_s27 = sshll.u32 %s7508_s11, 4  ;;  %s5545_s27 = int_to_ptr.vmem [resolvable:$true] %s5544_s27 }
0x121f   :  { %p7480_p1 = scmp.lt.s32.totalorder %s5545_s27, %s5545_s27 }
0x1221   :  { %4917 = vmatpush1.bf16.msra.mxu1 %v7234_v30 }
0x1222   :  { %4918 = vmatprep.subr.bf16.mxu1 %v7239_v33 }
0x1225   :  { %4919 = vmatpush1.bf16.msra.mxu1 %v7237_v63 }
0x1226   :  { %4920 = vmatprep.subr.bf16.mxu1 %v7242_v25 }
0x1229   :  { %4921 = vmatpush1.bf16.msra.mxu1 %v7240_v4 }
0x122a   :  { %4922 = vmatprep.subr.bf16.mxu1 %v7245_v27 }
0x122d   :  { %4923 = vmatpush1.bf16.msra.mxu1 %v7243_v9 }
0x122e   :  { %4924 = vmatprep.subr.bf16.mxu1 %v7248_v58 }
0x1231   :  { %4925 = vmatpush1.bf16.msra.mxu1 %v7246_v34 }
0x1232   :  { %4926 = vmatprep.subr.bf16.mxu1 %v7251_v35 }
0x1235   :  { %4927 = vmatpush1.bf16.msra.mxu1 %v7249_v46  ;;  %v7303_v46 = vld [vmem:[%s9906_s12 + $0x380] ss:$8 sps:$4 sm:$0xff]  }
0x1236   :  { %4928 = vmatprep.subr.bf16.mxu1 %v7254_v43 }
0x1239   :  { %4929 = vmatpush1.bf16.msra.mxu1 %v7252_v50  ;;  %v7308_v50 = vld [vmem:[%s9906_s12 + $0x394] ss:$8 sps:$4 sm:$0xff]  }
0x123a   :  { %4930 = vmatprep.subr.bf16.mxu1 %v7257_v61  ;;  %v7306_v61 = vld [vmem:[%s9906_s12 + $0x390] ss:$8 sps:$4 sm:$0xff]  }
0x123d   :  { %4931 = vmatpush1.bf16.msra.mxu1 %v7255_v56  ;;  %v7314_v56 = vld [vmem:[%s9906_s12 + $0x3b4] ss:$8 sps:$4 sm:$0xff]  }
0x123e   :  { %4932 = vmatprep.subr.bf16.mxu1 %v7260_v1  ;;  %v7317_v1 = vld [vmem:[%s9906_s12 + $0x3c4] ss:$8 sps:$4 sm:$0xff]  }
0x1241   :  { %4933 = vmatpush1.bf16.msra.mxu1 %v7258_v36  ;;  %v7315_v36 = vld [vmem:[%s9906_s12 + $0x3c0] ss:$8 sps:$4 sm:$0xff]  }
0x1242   :  { %4934 = vmatprep.subr.bf16.mxu1 %v7263_v21  ;;  %v7320_v21 = vld [vmem:[%s9906_s12 + $0x3d4] ss:$8 sps:$4 sm:$0xff]  }
0x1245   :  { %4935 = vmatpush1.bf16.msra.mxu1 %v7261_v38  ;;  %v7318_v38 = vld [vmem:[%s9906_s12 + $0x3d0] ss:$8 sps:$4 sm:$0xff]  }
0x1246   :  { %4936 = vmatprep.subr.bf16.mxu1 %v7266_v11  ;;  %v7323_v11 = vld [vmem:[%s9906_s12 + $0x3e4] ss:$8 sps:$4 sm:$0xff]  }
0x1249   :  { %4937 = vmatpush1.bf16.msra.mxu1 %v7264_v29  ;;  %v7321_v29 = vld [vmem:[%s9906_s12 + $0x3e0] ss:$8 sps:$4 sm:$0xff]  }
0x124a   :  { %4938 = vmatprep.subr.bf16.mxu1 %v7269_v39  ;;  %v7326_v39 = vld [vmem:[%s9906_s12 + $0x3f4] ss:$8 sps:$4 sm:$0xff]  }
0x124d   :  { %4939 = vmatpush1.bf16.msra.mxu1 %v7267_v5  ;;  %v7324_v5 = vld [vmem:[%s9906_s12 + $0x3f0] ss:$8 sps:$4 sm:$0xff]  }
0x124e   :  { %4940 = vmatprep.subr.bf16.mxu1 %v7272_v8 }
0x1251   :  { %4941 = vmatpush1.bf16.msra.mxu1 %v7270_v44 }
0x1252   :  { %4942 = vmatprep.subr.bf16.mxu1 %v7275_v49 }
0x1255   :  { %4943 = vmatpush1.bf16.msra.mxu1 %v7273_v54 }
0x1256   :  { %4944 = vmatprep.subr.bf16.mxu1 %v7278_v31 }
0x1259   :  { %4945 = vmatpush1.bf16.msra.mxu1 %v7276_v10 }
0x125a   :  { %5081 = vmatprep.subr.bf16.mxu1 %v7281_v13 }
0x125c   :  { %4947 = vmatmul.mubr.bf16.vlgmr.msra.gmra.mrb[24].mxu1 %v8675_v7  ;;  %v7282_v7 = vld [vmem:[%s9906_s12 + $0x310] ss:$8 sps:$4 sm:$0xff]  }
0x125d   :  { %5113 = vmatprep.mubr.bf16.mxu1 %v7500_v14  ;;  %5082 = vmatpush1.bf16.msra.mxu1 %v7279_v15 }
0x125e   :  { %5083 = vmatprep.subr.bf16.mxu1 %v7284_v16 }
0x1261   :  { %5084 = vmatpush1.bf16.msra.mxu1 %v7282_v7 }
0x1262   :  { %5085 = vmatprep.subr.bf16.mxu1 %v7287_v17 }
0x1265   :  { %5086 = vmatpush1.bf16.msra.mxu1 %v7285_v19 }
0x1266   :  { %5087 = vmatprep.subr.bf16.mxu1 %v7290_v32 }
0x1269   :  { %5088 = vmatpush1.bf16.msra.mxu1 %v7288_v3 }
0x126a   :  { %5089 = vmatprep.subr.bf16.mxu1 %v7293_v2 }
0x126d   :  { %5090 = vmatpush1.bf16.msra.mxu1 %v7291_v62 }
0x126e   :  { %5091 = vmatprep.subr.bf16.mxu1 %v7296_v12 }
0x1271   :  { %5092 = vmatpush1.bf16.msra.mxu1 %v7294_v40 }
0x1272   :  { %5093 = vmatprep.subr.bf16.mxu1 %v7299_v51 }
0x1275   :  { %5094 = vmatpush1.bf16.msra.mxu1 %v7297_v57 }
0x1276   :  { %5095 = vmatprep.subr.bf16.mxu1 %v7302_v60 }
0x1279   :  { %5096 = vmatpush1.bf16.msra.mxu1 %v7300_v47 }
0x127a   :  { %5488 = vmatprep.subr.bf16.mxu1 %v7305_v20 }
0x132f   :  { %v4948_v22 = vpop.f32.mrb[24].mxu1 }
0x1330   :  { %v6357_v24 = vmul.f32 -1.442695, %v4948_v22  ;;  %v4950_v41 = vpop.f32.mrb[25].mxu1 }
0x1331   :  { %v4952_v26 = vpop.f32.mrb[26].mxu1 }
0x1332   :  { %7459 = vpow2.f32 %v6357_v24  ;;  %v6358_v6 = vmul.f32 -1.442695, %v4952_v26  ;;  %v4954_v48 = vpop.f32.mrb[27].mxu1 }
0x1334   :  { %7461 = vpow2.f32 %v6358_v6 }
0x133c   :  { %v7460_v52 = vpop.eup %7459 }
0x133d   :  { %v4963_v28 = vadd.f32 1.0, %v7460_v52 }
0x133e   :  { %v7462_v30 = vpop.eup %7461 }
0x133f   :  { %7463 = vrcp.f32 %v4963_v28  ;;  %v4964_v33 = vadd.f32 1.0, %v7462_v30 }
0x1341   :  { %7465 = vrcp.f32 %v4964_v33 }
0x1349   :  { %v7464_v63 = vpop.eup %7463 }
0x134a   :  { %v4969_v25 = vmul.f32 %v7464_v63, %v4948_v22 }
0x134b   :  { %v7466_v4 = vpop.eup %7465 }
0x134c   :  { %v4971_v27 = vmul.f32 %v4969_v25, %v4950_v41  ;;  %v4970_v9 = vmul.f32 %v7466_v4, %v4952_v26 }
0x134e   :  { %v4972_v58 = vmul.f32 %v4970_v9, %v4954_v48  ;;  %v4981_v34 = vmul.f32 %v9377_v45, %v4971_v27  ;;  %v7311_v45 = vld [vmem:[%s9906_s12 + $0x3a4] ss:$8 sps:$4 sm:$0xff]  }
0x1350   :  { %v4982_v35 = vmul.f32 %v9384_v55, %v4972_v58  ;;  %v7309_v55 = vld [vmem:[%s9906_s12 + $0x3a0] ss:$8 sps:$4 sm:$0xff]  }
0x1352   :  { %v4983_v43 = vpack.c.bf16 %v4982_v35, %v4981_v34 }
0x1354   :  { %5114 = vmatmul.mubr.bf16.vlgmr.msra.gmra.mrb[16].mxu1 %v4983_v43 }
0x1355   :  { %5489 = vmatpush1.bf16.msra.mxu1 %v7303_v46  ;;  %5520 = vmatprep.mubr.bf16.mxu1 %v7500_v14  ;;  %v7312_v14 = vld [vmem:[%s9906_s12 + $0x3b0] ss:$8 sps:$4 sm:$0xff]   ;;  %s7475_s12 = scalar_lea.vmem %s5545_s27, 512 }
0x1356   :  { %5490 = vmatprep.subr.bf16.mxu1 %v7308_v50  ;;  %p7476_p0 = scmp.ne.s32.totalorder %s5545_s27, %s7475_s12  ;;  %p7481_p2 = scmp.lt.s32.totalorder %s7475_s12, %s7475_s12 }
0x1358   :  { %p7482_p3 = por %p7481_p2, %p7480_p1 }
0x1359   :  { %5491 = vmatpush1.bf16.msra.mxu1 %v7306_v61 }
0x135a   :  { %5492 = vmatprep.subr.bf16.mxu1 %v7311_v45  ;;  %p7483_p4 = pnand %p7482_p3, %p7476_p0 }
0x135d   :  { %5493 = vmatpush1.bf16.msra.mxu1 %v7309_v55 }
0x135e   :  { %5494 = vmatprep.subr.bf16.mxu1 %v7314_v56 }
0x1361   :  { %5495 = vmatpush1.bf16.msra.mxu1 %v7312_v14 }
0x1362   :  { %5496 = vmatprep.subr.bf16.mxu1 %v7317_v1 }
0x1365   :  { %5497 = vmatpush1.bf16.msra.mxu1 %v7315_v36 }
0x1366   :  { %5498 = vmatprep.subr.bf16.mxu1 %v7320_v21 }
0x1369   :  { %5499 = vmatpush1.bf16.msra.mxu1 %v7318_v38 }
0x136a   :  { %5500 = vmatprep.subr.bf16.mxu1 %v7323_v11 }
0x136d   :  { %5501 = vmatpush1.bf16.msra.mxu1 %v7321_v29 }
0x136e   :  { %5502 = vmatprep.subr.bf16.mxu1 %v7326_v39 }
0x1371   :  { %5503 = vmatpush1.bf16.msra.mxu1 %v7324_v5 }
0x1374   :  { %5521 = vmatmul.mubr.bf16.vlgmr.msra.gmra.mrb[16].mxu1 %v5390_v42 }
0x1447   :  { %v5522_v8 = vpop.f32.mrb[16].mxu1 }
0x1448   :  { %v6595_v44 = vadd.f32 %v5522_v8, %v8535_v53  ;;  %v5524_v49 = vpop.f32.mrb[17].mxu1 }
0x1449   :  { %v6596_v54 = vadd.f32 %v5524_v49, %v8540_v59  ;;  %v5526_v31 = vpop.f32.mrb[18].mxu1 }
0x144a   :  { %5535 = vst [vmem:[#allocation2] sm:$0xff] %v6595_v44  ;;  %v6597_v10 = vadd.f32 %v5526_v31, %v8545_v0  ;;  %v5528_v13 = vpop.f32.mrb[19].mxu1 }
0x144b   :  { %5536 = vst [vmem:[#allocation2 + $0x8] sm:$0xff] %v6596_v54  ;;  %v6598_v15 = vadd.f32 %v5528_v13, %v8552_v37 }
0x144c   :  { %5537 = vst [vmem:[#allocation2 + $0x10] sm:$0xff] %v6597_v10 }
0x144d   :  { %5538 = vst [vmem:[#allocation2 + $0x18] sm:$0xff] %v6598_v15 }
0x144e   :  { %7486 = shalt.err (!%p7483_p4)
}
0x144f   :  { %s7487_s7 = scalar_lea.hbm %s9907_s13, 512 }
0x1450   :  { %p7488_p5 = scmp.ne.s32.totalorder %s9907_s13, %s7487_s7  ;;  %p7491_p6 = scmp.lt.u32.totalorder %s7487_s7, %s9907_s13 }
0x1452   :  { %p7493_p7 = pnand %p7491_p6, %p7488_p5 }
0x1454   :  { %7496 = shalt.err (!%p7493_p7)
}
0x1455   :  { %s7509_s14 = smov 256   ;;  %s7510_s15 = smov 16  }
0x1456   :  { %5550 = dma.vmem_to_hbm [thread:$0]  %s5545_s27, 512, %s9907_s13, [#allocation3], %s7509_s14, %s7509_s14, %s7510_s15  }
0x1457   :  { %7497 = dma.done.wait [#allocation3], 512  }
0x1458   :  { %7498 = vsyncadd [#allocation3], 4294966784 }
0x1459   :  { %5554 = vsyncpa [#allocation3], 1 }

</bundles_post_ra>
